<compile_context>
chip_gen: v5e
topology: v5e:2x2
jax: 0.10.0
libtpu: 0.0.40
codegen_flags: <defaults>
</compile_context>

<pallas_src>
import functools

import jax
import jax.numpy as jnp
from jax.experimental import pallas as pl
from jax.experimental.pallas import tpu as pltpu

LANE_PAD = 128  # fc2 output padded to a full lane tile; sliced outside.


def conv_out(n, k, s):
    return (n - k) // s + 1


# ----------------------------------------------------------------------------
# Fused kernel: whole DQN forward for `bb` samples per grid step.
# ----------------------------------------------------------------------------
def _dqn_kernel(x_ref, w1_ref, b1_ref, w2_ref, b2_ref, w3_ref, b3_ref,
                wfc1_ref, bfc1_ref, wfc2_ref, bfc2_ref, o_ref,
                *, bb, o2h, o2w, o3h, o3w):
    f32 = jnp.float32
    rp, cp = o2h + 1, o2w + 1           # conv1-output row-pair / col-pair counts
    g = rp * cp * bb                    # rows per parity chunk of conv1 output
    c1 = w1_ref.shape[1]                # 32
    c2 = w2_ref.shape[2]                # 64
    c3 = w3_ref.shape[2]                # 64

    # ---- conv1 + ReLU: ONE matmul, K = 8*8*C (im2col done in the wrapper) ---
    h1 = jnp.dot(x_ref[0], w1_ref[...], preferred_element_type=f32)
    h1 = jnp.maximum(h1 + b1_ref[...], 0.0)             # (4*g, c1)

    # Rows are ordered (jpar, par, row-pair, col-pair, b): chunk q = jpar*2+par
    # holds conv1 output at (row = 2*rp_i + par, col = 2*cp_i + jpar).
    # Lane-concat the two column parities -> K = 2*c1 per conv2 tap pair.
    gpar = []
    for par in range(2):
        cat = jnp.concatenate([h1[par * g:(par + 1) * g],
                               h1[(2 + par) * g:(3 + par) * g]], axis=-1)
        gpar.append(cat.reshape(rp, cp, bb, 2 * c1))     # (rp, cp, bb, 2*c1)

    # ---- conv2 + ReLU: 8 matmuls, M = o2h*o2w*bb, K = 2*c1 ------------------
    m2 = o2h * o2w * bb
    acc2 = None
    for i in range(4):                                   # kernel row tap
        src = gpar[i % 2]
        for jq in range(2):                              # kernel column pair
            slab = src[i // 2:i // 2 + o2h, jq:jq + o2w] # (o2h, o2w, bb, 2*c1)
            part = jnp.dot(slab.reshape(m2, 2 * c1), w2_ref[i * 2 + jq],
                           preferred_element_type=f32)
            acc2 = part if acc2 is None else acc2 + part
    h2 = jnp.maximum(acc2 + b2_ref[...], 0.0)            # (m2, c2)

    # ---- conv3 + ReLU: 3 matmuls, M = o3h*o3w*bb, K = 3*c2 ------------------
    h2r = h2.reshape(o2h, o2w, bb, c2)
    m3 = o3h * o3w * bb
    acc3 = None
    for i in range(3):
        lhs3 = jnp.concatenate(
            [h2r[i:i + o3h, j:j + o3w].reshape(m3, c2) for j in range(3)],
            axis=-1)                                     # (m3, 3*c2)
        part = jnp.dot(lhs3, w3_ref[i], preferred_element_type=f32)
        acc3 = part if acc3 is None else acc3 + part
    h3 = jnp.maximum(acc3 + b3_ref[...], 0.0)            # (m3, c3)

    # ---- fc1 + ReLU: ONE (bb, fc_in) x (fc_in, 512) matmul ------------------
    h3r = h3.reshape(o3h, o3w, bb, c3)
    z = jnp.concatenate([h3r[h, w] for h in range(o3h) for w in range(o3w)],
                        axis=-1)                         # (bb, o3h*o3w*c3)
    z = jnp.dot(z, wfc1_ref[...], preferred_element_type=f32) + bfc1_ref[...]
    z = jnp.maximum(z, 0.0)                              # (bb, 512)

    # ---- fc2: lane-padded so the single HBM store is an unmasked (bb,128) ---
    q = jnp.dot(z, wfc2_ref[...], preferred_element_type=f32) + bfc2_ref[...]
    o_ref[...] = q.astype(o_ref.dtype)


# ----------------------------------------------------------------------------
# Wrapper-side conv1 im2col with the row ordering the kernel expects.
# ----------------------------------------------------------------------------
def _conv1_patches(x, block_b, o2h, o2w):
    """x: (Npad, C, H, W) f32 -> (Npad/block_b, 4*(o2h+1)*(o2w+1)*block_b, 64*C)."""
    n, c, _, _ = x.shape
    rp, cp = o2h + 1, o2w + 1
    rows, cols = 2 * rp, 2 * cp          # conv1 output rows/cols consumed by conv2
    taps = []
    for u in range(8):
        for v in range(8):
            taps.append(jax.lax.slice(
                x, (0, 0, u, v),
                (n, c, u + 4 * (rows - 1) + 1, v + 4 * (cols - 1) + 1),
                (1, 1, 4, 4)))                          # (n, c, rows, cols)
    p = jnp.stack(taps, axis=-1)                        # (n, c, rows, cols, 64)
    p = p.reshape(n, c, rp, 2, cp, 2, 8, 8)             # (n,ch,rp,par,cp,jpar,u,v)
    nblk = n // block_b
    p = p.reshape(nblk, block_b, c, rp, 2, cp, 2, 8, 8)
    p = jnp.transpose(p, (0, 6, 4, 3, 5, 1, 7, 8, 2))   # (nb,jpar,par,rp,cp,b,u,v,ch)
    return p.reshape(nblk, 4 * rp * cp * block_b, 64 * c)


# ----------------------------------------------------------------------------
# Forward wrapper: wrapper-side im2col + single fused pallas_call.
# ----------------------------------------------------------------------------
def dqn_forward(packed, x_nchw, *, num_actions, block_b=8):
    assert block_b > 0 and block_b % 8 == 0, "batch block must be a multiple of 8"
    assert num_actions <= LANE_PAD
    n, c, h, w = x_nchw.shape
    o1h, o1w = conv_out(h, 8, 4), conv_out(w, 8, 4)
    o2h, o2w = conv_out(o1h, 4, 2), conv_out(o1w, 4, 2)
    o3h, o3w = conv_out(o2h, 3, 1), conv_out(o2w, 3, 1)
    assert o1h >= 4 and o1w >= 4 and o2h >= 3 and o2w >= 3, "input too small"

    (w1p, b1, w2p, b2, w3p, b3, wfc1p, bfc1, wfc2p, bfc2) = packed

    n_pad = ((n + block_b - 1) // block_b) * block_b
    xf = x_nchw.astype(jnp.float32)
    if n_pad != n:
        xf = jnp.concatenate(
            [xf, jnp.zeros((n_pad - n, c, h, w), jnp.float32)], axis=0)

    x_col = _conv1_patches(xf, block_b, o2h, o2w)       # (nblk, m1, 64*C)
    nblk, m1, k1 = x_col.shape

    m2 = o2h * o2w * block_b
    m3 = o3h * o3w * block_b
    fc_in = wfc1p.shape[0]
    flops = 2 * nblk * (m1 * k1 * w1p.shape[1]
                        + 8 * m2 * w2p.shape[1] * w2p.shape[2]
                        + 3 * m3 * w3p.shape[1] * w3p.shape[2]
                        + block_b * fc_in * wfc1p.shape[1]
                        + block_b * wfc2p.shape[0] * LANE_PAD)
    bytes_accessed = 4 * (int(x_col.size) + sum(int(a.size) for a in packed)
                          + n_pad * LANE_PAD)

    kernel = functools.partial(_dqn_kernel, bb=block_b,
                               o2h=o2h, o2w=o2w, o3h=o3h, o3w=o3w)

    out = pl.pallas_call(
        kernel,
        out_shape=jax.ShapeDtypeStruct((n_pad, LANE_PAD), jnp.float32),
        grid_spec=pltpu.PrefetchScalarGridSpec(
            num_scalar_prefetch=0,
            grid=(nblk,),
            in_specs=[
                pl.BlockSpec((1, m1, k1), lambda i: (i, 0, 0)),
                pl.BlockSpec(w1p.shape, lambda i: (0, 0)),
                pl.BlockSpec(b1.shape, lambda i: (0, 0)),
                pl.BlockSpec(w2p.shape, lambda i: (0, 0, 0)),
                pl.BlockSpec(b2.shape, lambda i: (0, 0)),
                pl.BlockSpec(w3p.shape, lambda i: (0, 0, 0)),
                pl.BlockSpec(b3.shape, lambda i: (0, 0)),
                pl.BlockSpec(wfc1p.shape, lambda i: (0, 0)),
                pl.BlockSpec(bfc1.shape, lambda i: (0, 0)),
                pl.BlockSpec(wfc2p.shape, lambda i: (0, 0)),
                pl.BlockSpec(bfc2.shape, lambda i: (0, 0)),
            ],
            out_specs=pl.BlockSpec((block_b, LANE_PAD), lambda i: (i, 0)),
        ),
        compiler_params=pltpu.CompilerParams(
            dimension_semantics=("parallel",)),
        cost_estimate=pl.CostEstimate(
            flops=flops, transcendentals=0, bytes_accessed=bytes_accessed),
    )(x_col, w1p, b1, w2p, b2, w3p, b3, wfc1p, bfc1, wfc2p, bfc2)

    return out[:n, :num_actions]


# ----------------------------------------------------------------------------
# Parameter construction (PyTorch layout) and one-time weight pre-packing.
# ----------------------------------------------------------------------------
def _uniform(key, shape, fan_in):
    bound = 1.0 / jnp.sqrt(jnp.float32(fan_in))
    return jax.random.uniform(key, shape, jnp.float32, -bound, bound)


def init_dqn_params(key, in_channels, fc_in_dim, num_actions):
    """PyTorch-layout params: Conv2d (Cout, Cin, kH, kW); Linear (out, in)."""
    ks = jax.random.split(key, 10)
    p = {}
    p["w1"] = _uniform(ks[0], (32, in_channels, 8, 8), in_channels * 64)
    p["b1"] = _uniform(ks[1], (32,), in_channels * 64)
    p["w2"] = _uniform(ks[2], (64, 32, 4, 4), 32 * 16)
    p["b2"] = _uniform(ks[3], (64,), 32 * 16)
    p["w3"] = _uniform(ks[4], (64, 64, 3, 3), 64 * 9)
    p["b3"] = _uniform(ks[5], (64,), 64 * 9)
    p["wfc1"] = _uniform(ks[6], (512, fc_in_dim), fc_in_dim)
    p["bfc1"] = _uniform(ks[7], (512,), fc_in_dim)
    p["wfc2"] = _uniform(ks[8], (num_actions, 512), 512)
    p["bfc2"] = _uniform(ks[9], (num_actions,), 512)
    return p


def pack_dqn_params(p, o3h, o3w):
    """One-time repack of PyTorch-layout weights into the fused-kernel layout."""
    f32 = jnp.float32
    cout1, cin = p["w1"].shape[:2]
    # conv1: (Cout, Cin, 8, 8) -> (64*Cin, Cout), row = (u*8 + v)*Cin + ch.
    w1p = jnp.transpose(p["w1"], (2, 3, 1, 0)).reshape(64 * cin, cout1)
    # conv2: (Cout, Cin, 4, 4) -> (8, 2*Cin, Cout); block t = ki*2 + kj//2,
    # row = (kj % 2)*Cin + ch  (column pairs folded into the contraction dim).
    c2o, c2i = p["w2"].shape[:2]
    w2p = jnp.transpose(p["w2"], (2, 3, 1, 0)).reshape(4, 2, 2, c2i, c2o)
    w2p = w2p.reshape(8, 2 * c2i, c2o)
    # conv3: (Cout, Cin, 3, 3) -> (3, 3*Cin, Cout); block = ki, row = kj*Cin + ch.
    c3o, c3i = p["w3"].shape[:2]
    w3p = jnp.transpose(p["w3"], (2, 3, 1, 0)).reshape(3, 3 * c3i, c3o)
    # fc1: torch flatten order is (c, h, w); kernel lane order is (h, w, c).
    f1_out, f1_in = p["wfc1"].shape
    c3 = f1_in // (o3h * o3w)
    wfc1p = jnp.transpose(p["wfc1"].reshape(f1_out, c3, o3h, o3w),
                          (2, 3, 1, 0)).reshape(f1_in, f1_out)
    # fc2: (A, 512) -> (512, 128) zero-padded -> lane-dense single output store.
    a = p["wfc2"].shape[0]
    wfc2p = jnp.zeros((f1_out, LANE_PAD), f32).at[:, :a].set(p["wfc2"].T)
    bfc2p = jnp.zeros((1, LANE_PAD), f32).at[0, :a].set(p["bfc2"])
    return (w1p, p["b1"].reshape(1, -1), w2p, p["b2"].reshape(1, -1),
            w3p, p["b3"].reshape(1, -1), wfc1p, p["bfc1"].reshape(1, -1),
            wfc2p, bfc2p)


# ----------------------------------------------------------------------------
# Pure-JAX reference (same math as the PyTorch module's forward).
# ----------------------------------------------------------------------------
def dqn_reference(p, x):
    prec = jax.lax.Precision.HIGHEST

    def conv(h, w, b, stride):
        dn = jax.lax.conv_dimension_numbers(h.shape, w.shape,
                                            ("NCHW", "OIHW", "NCHW"))
        h = jax.lax.conv_general_dilated(h, w, (stride, stride), "VALID",
                                         dimension_numbers=dn, precision=prec)
        return jax.nn.relu(h + b[None, :, None, None])

    h = conv(x.astype(jnp.float32), p["w1"], p["b1"], 4)
    h = conv(h, p["w2"], p["b2"], 2)
    h = conv(h, p["w3"], p["b3"], 1)
    h = h.reshape(h.shape[0], -1)
    h = jax.nn.relu(jnp.dot(h, p["wfc1"].T, precision=prec) + p["bfc1"])
    return jnp.dot(h, p["wfc2"].T, precision=prec) + p["bfc2"]


if __name__ == "__main__":
    # Small shapes consistent with the module (spatial must survive 3 convs).
    batch, in_channels, H, W = 16, 4, 44, 44
    num_actions = 6

    o1h, o1w = conv_out(H, 8, 4), conv_out(W, 8, 4)      # 10, 10
    o2h, o2w = conv_out(o1h, 4, 2), conv_out(o1w, 4, 2)  # 4, 4
    o3h, o3w = conv_out(o2h, 3, 1), conv_out(o2w, 3, 1)  # 2, 2
    fc_in_dim = 64 * o3h * o3w                           # actual conv3 flatten size

    key = jax.random.PRNGKey(0)
    k_params, k_x = jax.random.split(key)
    params = init_dqn_params(k_params, in_channels, fc_in_dim, num_actions)
    packed = pack_dqn_params(params, o3h, o3w)           # one-time weight repack
    x = jax.random.normal(k_x, (batch, in_channels, H, W), jnp.float32)

    fwd = jax.jit(functools.partial(dqn_forward, num_actions=num_actions,
                                    block_b=8))          # grid = (2,) on 16 samples
    q_values = jax.block_until_ready(fwd(packed, x))

    assert q_values.shape == (batch, num_actions), q_values.shape
    assert bool(jnp.all(jnp.isfinite(q_values)))

    q_ref = jax.block_until_ready(dqn_reference(params, x))
    err = float(jnp.max(jnp.abs(q_values - q_ref)))
    assert err < 2e-2, f"max abs error vs reference: {err}"
    print("KERNEL_OK")
</pallas_src>

<mosaic_0001>
module attributes {stable_mosaic.version = 11 : i64} {
  func.func @_dqn_kernel(%arg0: i32, %arg1: memref<1x800x256xf32, #tpu.memory_space<vmem>>, %arg2: memref<256x32xf32, #tpu.memory_space<vmem>>, %arg3: memref<1x32xf32, #tpu.memory_space<vmem>>, %arg4: memref<8x64x64xf32, #tpu.memory_space<vmem>>, %arg5: memref<1x64xf32, #tpu.memory_space<vmem>>, %arg6: memref<3x192x64xf32, #tpu.memory_space<vmem>>, %arg7: memref<1x64xf32, #tpu.memory_space<vmem>>, %arg8: memref<256x512xf32, #tpu.memory_space<vmem>>, %arg9: memref<1x512xf32, #tpu.memory_space<vmem>>, %arg10: memref<512x128xf32, #tpu.memory_space<vmem>>, %arg11: memref<1x128xf32, #tpu.memory_space<vmem>>, %arg12: memref<8x128xf32, #tpu.memory_space<vmem>>) attributes {dimension_semantics = [#tpu.dimension_semantics<parallel>], iteration_bounds = array<i64: 2>, scalar_prefetch = 0 : i64, scratch_operands = 0 : i64, tpu.core_type = #tpu.core_type<tc>, window_params = [{transform_indices = @transform_0, window_bounds = array<i64: 1, 800, 256>}, {pipeline_mode = #tpu.pipeline_mode<synchronous>, transform_indices = @transform_1, window_bounds = array<i64: 256, 32>}, {pipeline_mode = #tpu.pipeline_mode<synchronous>, transform_indices = @transform_2, window_bounds = array<i64: 1, 32>}, {pipeline_mode = #tpu.pipeline_mode<synchronous>, transform_indices = @transform_3, window_bounds = array<i64: 8, 64, 64>}, {pipeline_mode = #tpu.pipeline_mode<synchronous>, transform_indices = @transform_4, window_bounds = array<i64: 1, 64>}, {pipeline_mode = #tpu.pipeline_mode<synchronous>, transform_indices = @transform_5, window_bounds = array<i64: 3, 192, 64>}, {pipeline_mode = #tpu.pipeline_mode<synchronous>, transform_indices = @transform_6, window_bounds = array<i64: 1, 64>}, {pipeline_mode = #tpu.pipeline_mode<synchronous>, transform_indices = @transform_7, window_bounds = array<i64: 256, 512>}, {pipeline_mode = #tpu.pipeline_mode<synchronous>, transform_indices = @transform_8, window_bounds = array<i64: 1, 512>}, {pipeline_mode = #tpu.pipeline_mode<synchronous>, transform_indices = @transform_9, window_bounds = array<i64: 512, 128>}, {pipeline_mode = #tpu.pipeline_mode<synchronous>, transform_indices = @transform_10, window_bounds = array<i64: 1, 128>}, {transform_indices = @transform_11, window_bounds = array<i64: 8, 128>}]} {
    %c0 = arith.constant 0 : index
    %c0_0 = arith.constant 0 : index
    %c0_1 = arith.constant 0 : index
    %0 = vector.load %arg1[%c0, %c0_0, %c0_1] : memref<1x800x256xf32, #tpu.memory_space<vmem>>, vector<1x800x256xf32>
    %1 = vector.shape_cast %0 : vector<1x800x256xf32> to vector<800x256xf32>
    %c0_2 = arith.constant 0 : index
    %c0_3 = arith.constant 0 : index
    %2 = vector.load %arg2[%c0_2, %c0_3] : memref<256x32xf32, #tpu.memory_space<vmem>>, vector<256x32xf32>
    %cst = arith.constant dense<0.000000e+00> : vector<800x32xf32>
    %3 = tpu.matmul %1, %2, %cst {dimension_numbers = #tpu.dot_dimension_numbers<[1], [0], [0], [1], [0, 0, 1, 1], [], []>} : vector<800x256xf32>, vector<256x32xf32>, vector<800x32xf32> -> vector<800x32xf32>
    %c0_4 = arith.constant 0 : index
    %c0_5 = arith.constant 0 : index
    %4 = vector.load %arg3[%c0_4, %c0_5] : memref<1x32xf32, #tpu.memory_space<vmem>>, vector<1x32xf32>
    %5 = vector.broadcast %4 : vector<1x32xf32> to vector<800x32xf32>
    %6 = arith.addf %3, %5 : vector<800x32xf32>
    %cst_6 = arith.constant 0.000000e+00 : f32
    %7 = vector.broadcast %cst_6 : f32 to vector<800x32xf32>
    %8 = arith.maximumf %6, %7 : vector<800x32xf32>
    %9 = vector.extract_strided_slice %8 {offsets = [0, 0], sizes = [200, 32], strides = [1, 1]} : vector<800x32xf32> to vector<200x32xf32>
    %10 = vector.extract_strided_slice %8 {offsets = [400, 0], sizes = [200, 32], strides = [1, 1]} : vector<800x32xf32> to vector<200x32xf32>
    %11 = tpu.concatenate %9, %10 in 1 : vector<200x32xf32>, vector<200x32xf32> -> vector<200x64xf32>
    %12 = vector.shape_cast %11 : vector<200x64xf32> to vector<5x5x8x64xf32>
    %13 = vector.extract_strided_slice %8 {offsets = [200, 0], sizes = [200, 32], strides = [1, 1]} : vector<800x32xf32> to vector<200x32xf32>
    %14 = vector.extract_strided_slice %8 {offsets = [600, 0], sizes = [200, 32], strides = [1, 1]} : vector<800x32xf32> to vector<200x32xf32>
    %15 = tpu.concatenate %13, %14 in 1 : vector<200x32xf32>, vector<200x32xf32> -> vector<200x64xf32>
    %16 = vector.shape_cast %15 : vector<200x64xf32> to vector<5x5x8x64xf32>
    %17 = vector.extract_strided_slice %12 {offsets = [0, 0, 0, 0], sizes = [4, 4, 8, 64], strides = [1, 1, 1, 1]} : vector<5x5x8x64xf32> to vector<4x4x8x64xf32>
    %18 = vector.shape_cast %17 : vector<4x4x8x64xf32> to vector<128x64xf32>
    %c0_7 = arith.constant 0 : index
    %c0_8 = arith.constant 0 : index
    %c0_9 = arith.constant 0 : index
    %19 = vector.load %arg4[%c0_7, %c0_8, %c0_9] : memref<8x64x64xf32, #tpu.memory_space<vmem>>, vector<1x64x64xf32>
    %20 = vector.shape_cast %19 : vector<1x64x64xf32> to vector<64x64xf32>
    %cst_10 = arith.constant dense<0.000000e+00> : vector<128x64xf32>
    %21 = tpu.matmul %18, %20, %cst_10 {dimension_numbers = #tpu.dot_dimension_numbers<[1], [0], [0], [1], [0, 0, 1, 1], [], []>} : vector<128x64xf32>, vector<64x64xf32>, vector<128x64xf32> -> vector<128x64xf32>
    %22 = vector.extract_strided_slice %12 {offsets = [0, 1, 0, 0], sizes = [4, 4, 8, 64], strides = [1, 1, 1, 1]} : vector<5x5x8x64xf32> to vector<4x4x8x64xf32>
    %23 = vector.shape_cast %22 : vector<4x4x8x64xf32> to vector<128x64xf32>
    %c1 = arith.constant 1 : index
    %c0_11 = arith.constant 0 : index
    %c0_12 = arith.constant 0 : index
    %24 = vector.load %arg4[%c1, %c0_11, %c0_12] : memref<8x64x64xf32, #tpu.memory_space<vmem>>, vector<1x64x64xf32>
    %25 = vector.shape_cast %24 : vector<1x64x64xf32> to vector<64x64xf32>
    %cst_13 = arith.constant dense<0.000000e+00> : vector<128x64xf32>
    %26 = tpu.matmul %23, %25, %cst_13 {dimension_numbers = #tpu.dot_dimension_numbers<[1], [0], [0], [1], [0, 0, 1, 1], [], []>} : vector<128x64xf32>, vector<64x64xf32>, vector<128x64xf32> -> vector<128x64xf32>
    %27 = arith.addf %21, %26 : vector<128x64xf32>
    %28 = vector.extract_strided_slice %16 {offsets = [0, 0, 0, 0], sizes = [4, 4, 8, 64], strides = [1, 1, 1, 1]} : vector<5x5x8x64xf32> to vector<4x4x8x64xf32>
    %29 = vector.shape_cast %28 : vector<4x4x8x64xf32> to vector<128x64xf32>
    %c2 = arith.constant 2 : index
    %c0_14 = arith.constant 0 : index
    %c0_15 = arith.constant 0 : index
    %30 = vector.load %arg4[%c2, %c0_14, %c0_15] : memref<8x64x64xf32, #tpu.memory_space<vmem>>, vector<1x64x64xf32>
    %31 = vector.shape_cast %30 : vector<1x64x64xf32> to vector<64x64xf32>
    %cst_16 = arith.constant dense<0.000000e+00> : vector<128x64xf32>
    %32 = tpu.matmul %29, %31, %cst_16 {dimension_numbers = #tpu.dot_dimension_numbers<[1], [0], [0], [1], [0, 0, 1, 1], [], []>} : vector<128x64xf32>, vector<64x64xf32>, vector<128x64xf32> -> vector<128x64xf32>
    %33 = arith.addf %27, %32 : vector<128x64xf32>
    %34 = vector.extract_strided_slice %16 {offsets = [0, 1, 0, 0], sizes = [4, 4, 8, 64], strides = [1, 1, 1, 1]} : vector<5x5x8x64xf32> to vector<4x4x8x64xf32>
    %35 = vector.shape_cast %34 : vector<4x4x8x64xf32> to vector<128x64xf32>
    %c3 = arith.constant 3 : index
    %c0_17 = arith.constant 0 : index
    %c0_18 = arith.constant 0 : index
    %36 = vector.load %arg4[%c3, %c0_17, %c0_18] : memref<8x64x64xf32, #tpu.memory_space<vmem>>, vector<1x64x64xf32>
    %37 = vector.shape_cast %36 : vector<1x64x64xf32> to vector<64x64xf32>
    %cst_19 = arith.constant dense<0.000000e+00> : vector<128x64xf32>
    %38 = tpu.matmul %35, %37, %cst_19 {dimension_numbers = #tpu.dot_dimension_numbers<[1], [0], [0], [1], [0, 0, 1, 1], [], []>} : vector<128x64xf32>, vector<64x64xf32>, vector<128x64xf32> -> vector<128x64xf32>
    %39 = arith.addf %33, %38 : vector<128x64xf32>
    %40 = vector.extract_strided_slice %12 {offsets = [1, 0, 0, 0], sizes = [4, 4, 8, 64], strides = [1, 1, 1, 1]} : vector<5x5x8x64xf32> to vector<4x4x8x64xf32>
    %41 = vector.shape_cast %40 : vector<4x4x8x64xf32> to vector<128x64xf32>
    %c4 = arith.constant 4 : index
    %c0_20 = arith.constant 0 : index
    %c0_21 = arith.constant 0 : index
    %42 = vector.load %arg4[%c4, %c0_20, %c0_21] : memref<8x64x64xf32, #tpu.memory_space<vmem>>, vector<1x64x64xf32>
    %43 = vector.shape_cast %42 : vector<1x64x64xf32> to vector<64x64xf32>
    %cst_22 = arith.constant dense<0.000000e+00> : vector<128x64xf32>
    %44 = tpu.matmul %41, %43, %cst_22 {dimension_numbers = #tpu.dot_dimension_numbers<[1], [0], [0], [1], [0, 0, 1, 1], [], []>} : vector<128x64xf32>, vector<64x64xf32>, vector<128x64xf32> -> vector<128x64xf32>
    %45 = arith.addf %39, %44 : vector<128x64xf32>
    %46 = vector.extract_strided_slice %12 {offsets = [1, 1, 0, 0], sizes = [4, 4, 8, 64], strides = [1, 1, 1, 1]} : vector<5x5x8x64xf32> to vector<4x4x8x64xf32>
    %47 = vector.shape_cast %46 : vector<4x4x8x64xf32> to vector<128x64xf32>
    %c5 = arith.constant 5 : index
    %c0_23 = arith.constant 0 : index
    %c0_24 = arith.constant 0 : index
    %48 = vector.load %arg4[%c5, %c0_23, %c0_24] : memref<8x64x64xf32, #tpu.memory_space<vmem>>, vector<1x64x64xf32>
    %49 = vector.shape_cast %48 : vector<1x64x64xf32> to vector<64x64xf32>
    %cst_25 = arith.constant dense<0.000000e+00> : vector<128x64xf32>
    %50 = tpu.matmul %47, %49, %cst_25 {dimension_numbers = #tpu.dot_dimension_numbers<[1], [0], [0], [1], [0, 0, 1, 1], [], []>} : vector<128x64xf32>, vector<64x64xf32>, vector<128x64xf32> -> vector<128x64xf32>
    %51 = arith.addf %45, %50 : vector<128x64xf32>
    %52 = vector.extract_strided_slice %16 {offsets = [1, 0, 0, 0], sizes = [4, 4, 8, 64], strides = [1, 1, 1, 1]} : vector<5x5x8x64xf32> to vector<4x4x8x64xf32>
    %53 = vector.shape_cast %52 : vector<4x4x8x64xf32> to vector<128x64xf32>
    %c6 = arith.constant 6 : index
    %c0_26 = arith.constant 0 : index
    %c0_27 = arith.constant 0 : index
    %54 = vector.load %arg4[%c6, %c0_26, %c0_27] : memref<8x64x64xf32, #tpu.memory_space<vmem>>, vector<1x64x64xf32>
    %55 = vector.shape_cast %54 : vector<1x64x64xf32> to vector<64x64xf32>
    %cst_28 = arith.constant dense<0.000000e+00> : vector<128x64xf32>
    %56 = tpu.matmul %53, %55, %cst_28 {dimension_numbers = #tpu.dot_dimension_numbers<[1], [0], [0], [1], [0, 0, 1, 1], [], []>} : vector<128x64xf32>, vector<64x64xf32>, vector<128x64xf32> -> vector<128x64xf32>
    %57 = arith.addf %51, %56 : vector<128x64xf32>
    %58 = vector.extract_strided_slice %16 {offsets = [1, 1, 0, 0], sizes = [4, 4, 8, 64], strides = [1, 1, 1, 1]} : vector<5x5x8x64xf32> to vector<4x4x8x64xf32>
    %59 = vector.shape_cast %58 : vector<4x4x8x64xf32> to vector<128x64xf32>
    %c7 = arith.constant 7 : index
    %c0_29 = arith.constant 0 : index
    %c0_30 = arith.constant 0 : index
    %60 = vector.load %arg4[%c7, %c0_29, %c0_30] : memref<8x64x64xf32, #tpu.memory_space<vmem>>, vector<1x64x64xf32>
    %61 = vector.shape_cast %60 : vector<1x64x64xf32> to vector<64x64xf32>
    %cst_31 = arith.constant dense<0.000000e+00> : vector<128x64xf32>
    %62 = tpu.matmul %59, %61, %cst_31 {dimension_numbers = #tpu.dot_dimension_numbers<[1], [0], [0], [1], [0, 0, 1, 1], [], []>} : vector<128x64xf32>, vector<64x64xf32>, vector<128x64xf32> -> vector<128x64xf32>
    %63 = arith.addf %57, %62 : vector<128x64xf32>
    %c0_32 = arith.constant 0 : index
    %c0_33 = arith.constant 0 : index
    %64 = vector.load %arg5[%c0_32, %c0_33] : memref<1x64xf32, #tpu.memory_space<vmem>>, vector<1x64xf32>
    %65 = vector.broadcast %64 : vector<1x64xf32> to vector<128x64xf32>
    %66 = arith.addf %63, %65 : vector<128x64xf32>
    %cst_34 = arith.constant 0.000000e+00 : f32
    %67 = vector.broadcast %cst_34 : f32 to vector<128x64xf32>
    %68 = arith.maximumf %66, %67 : vector<128x64xf32>
    %69 = vector.shape_cast %68 : vector<128x64xf32> to vector<4x4x8x64xf32>
    %70 = vector.extract_strided_slice %69 {offsets = [0, 0, 0, 0], sizes = [2, 2, 8, 64], strides = [1, 1, 1, 1]} : vector<4x4x8x64xf32> to vector<2x2x8x64xf32>
    %71 = vector.shape_cast %70 : vector<2x2x8x64xf32> to vector<32x64xf32>
    %72 = vector.extract_strided_slice %69 {offsets = [0, 1, 0, 0], sizes = [2, 2, 8, 64], strides = [1, 1, 1, 1]} : vector<4x4x8x64xf32> to vector<2x2x8x64xf32>
    %73 = vector.shape_cast %72 : vector<2x2x8x64xf32> to vector<32x64xf32>
    %74 = vector.extract_strided_slice %69 {offsets = [0, 2, 0, 0], sizes = [2, 2, 8, 64], strides = [1, 1, 1, 1]} : vector<4x4x8x64xf32> to vector<2x2x8x64xf32>
    %75 = vector.shape_cast %74 : vector<2x2x8x64xf32> to vector<32x64xf32>
    %76 = tpu.concatenate %71, %73, %75 in 1 : vector<32x64xf32>, vector<32x64xf32>, vector<32x64xf32> -> vector<32x192xf32>
    %c0_35 = arith.constant 0 : index
    %c0_36 = arith.constant 0 : index
    %c0_37 = arith.constant 0 : index
    %77 = vector.load %arg6[%c0_35, %c0_36, %c0_37] : memref<3x192x64xf32, #tpu.memory_space<vmem>>, vector<1x192x64xf32>
    %78 = vector.shape_cast %77 : vector<1x192x64xf32> to vector<192x64xf32>
    %cst_38 = arith.constant dense<0.000000e+00> : vector<32x64xf32>
    %79 = tpu.matmul %76, %78, %cst_38 {dimension_numbers = #tpu.dot_dimension_numbers<[1], [0], [0], [1], [0, 0, 1, 1], [], []>} : vector<32x192xf32>, vector<192x64xf32>, vector<32x64xf32> -> vector<32x64xf32>
    %80 = vector.extract_strided_slice %69 {offsets = [1, 0, 0, 0], sizes = [2, 2, 8, 64], strides = [1, 1, 1, 1]} : vector<4x4x8x64xf32> to vector<2x2x8x64xf32>
    %81 = vector.shape_cast %80 : vector<2x2x8x64xf32> to vector<32x64xf32>
    %82 = vector.extract_strided_slice %69 {offsets = [1, 1, 0, 0], sizes = [2, 2, 8, 64], strides = [1, 1, 1, 1]} : vector<4x4x8x64xf32> to vector<2x2x8x64xf32>
    %83 = vector.shape_cast %82 : vector<2x2x8x64xf32> to vector<32x64xf32>
    %84 = vector.extract_strided_slice %69 {offsets = [1, 2, 0, 0], sizes = [2, 2, 8, 64], strides = [1, 1, 1, 1]} : vector<4x4x8x64xf32> to vector<2x2x8x64xf32>
    %85 = vector.shape_cast %84 : vector<2x2x8x64xf32> to vector<32x64xf32>
    %86 = tpu.concatenate %81, %83, %85 in 1 : vector<32x64xf32>, vector<32x64xf32>, vector<32x64xf32> -> vector<32x192xf32>
    %c1_39 = arith.constant 1 : index
    %c0_40 = arith.constant 0 : index
    %c0_41 = arith.constant 0 : index
    %87 = vector.load %arg6[%c1_39, %c0_40, %c0_41] : memref<3x192x64xf32, #tpu.memory_space<vmem>>, vector<1x192x64xf32>
    %88 = vector.shape_cast %87 : vector<1x192x64xf32> to vector<192x64xf32>
    %cst_42 = arith.constant dense<0.000000e+00> : vector<32x64xf32>
    %89 = tpu.matmul %86, %88, %cst_42 {dimension_numbers = #tpu.dot_dimension_numbers<[1], [0], [0], [1], [0, 0, 1, 1], [], []>} : vector<32x192xf32>, vector<192x64xf32>, vector<32x64xf32> -> vector<32x64xf32>
    %90 = arith.addf %79, %89 : vector<32x64xf32>
    %91 = vector.extract_strided_slice %69 {offsets = [2, 0, 0, 0], sizes = [2, 2, 8, 64], strides = [1, 1, 1, 1]} : vector<4x4x8x64xf32> to vector<2x2x8x64xf32>
    %92 = vector.shape_cast %91 : vector<2x2x8x64xf32> to vector<32x64xf32>
    %93 = vector.extract_strided_slice %69 {offsets = [2, 1, 0, 0], sizes = [2, 2, 8, 64], strides = [1, 1, 1, 1]} : vector<4x4x8x64xf32> to vector<2x2x8x64xf32>
    %94 = vector.shape_cast %93 : vector<2x2x8x64xf32> to vector<32x64xf32>
    %95 = vector.extract_strided_slice %69 {offsets = [2, 2, 0, 0], sizes = [2, 2, 8, 64], strides = [1, 1, 1, 1]} : vector<4x4x8x64xf32> to vector<2x2x8x64xf32>
    %96 = vector.shape_cast %95 : vector<2x2x8x64xf32> to vector<32x64xf32>
    %97 = tpu.concatenate %92, %94, %96 in 1 : vector<32x64xf32>, vector<32x64xf32>, vector<32x64xf32> -> vector<32x192xf32>
    %c2_43 = arith.constant 2 : index
    %c0_44 = arith.constant 0 : index
    %c0_45 = arith.constant 0 : index
    %98 = vector.load %arg6[%c2_43, %c0_44, %c0_45] : memref<3x192x64xf32, #tpu.memory_space<vmem>>, vector<1x192x64xf32>
    %99 = vector.shape_cast %98 : vector<1x192x64xf32> to vector<192x64xf32>
    %cst_46 = arith.constant dense<0.000000e+00> : vector<32x64xf32>
    %100 = tpu.matmul %97, %99, %cst_46 {dimension_numbers = #tpu.dot_dimension_numbers<[1], [0], [0], [1], [0, 0, 1, 1], [], []>} : vector<32x192xf32>, vector<192x64xf32>, vector<32x64xf32> -> vector<32x64xf32>
    %101 = arith.addf %90, %100 : vector<32x64xf32>
    %c0_47 = arith.constant 0 : index
    %c0_48 = arith.constant 0 : index
    %102 = vector.load %arg7[%c0_47, %c0_48] : memref<1x64xf32, #tpu.memory_space<vmem>>, vector<1x64xf32>
    %103 = vector.broadcast %102 : vector<1x64xf32> to vector<32x64xf32>
    %104 = arith.addf %101, %103 : vector<32x64xf32>
    %cst_49 = arith.constant 0.000000e+00 : f32
    %105 = vector.broadcast %cst_49 : f32 to vector<32x64xf32>
    %106 = arith.maximumf %104, %105 : vector<32x64xf32>
    %107 = vector.shape_cast %106 : vector<32x64xf32> to vector<2x2x8x64xf32>
    %108 = vector.extract_strided_slice %107 {offsets = [0, 0, 0, 0], sizes = [1, 1, 8, 64], strides = [1, 1, 1, 1]} : vector<2x2x8x64xf32> to vector<1x1x8x64xf32>
    %109 = vector.shape_cast %108 : vector<1x1x8x64xf32> to vector<8x64xf32>
    %110 = vector.extract_strided_slice %107 {offsets = [0, 1, 0, 0], sizes = [1, 1, 8, 64], strides = [1, 1, 1, 1]} : vector<2x2x8x64xf32> to vector<1x1x8x64xf32>
    %111 = vector.shape_cast %110 : vector<1x1x8x64xf32> to vector<8x64xf32>
    %112 = vector.extract_strided_slice %107 {offsets = [1, 0, 0, 0], sizes = [1, 1, 8, 64], strides = [1, 1, 1, 1]} : vector<2x2x8x64xf32> to vector<1x1x8x64xf32>
    %113 = vector.shape_cast %112 : vector<1x1x8x64xf32> to vector<8x64xf32>
    %114 = vector.extract_strided_slice %107 {offsets = [1, 1, 0, 0], sizes = [1, 1, 8, 64], strides = [1, 1, 1, 1]} : vector<2x2x8x64xf32> to vector<1x1x8x64xf32>
    %115 = vector.shape_cast %114 : vector<1x1x8x64xf32> to vector<8x64xf32>
    %116 = tpu.concatenate %109, %111, %113, %115 in 1 : vector<8x64xf32>, vector<8x64xf32>, vector<8x64xf32>, vector<8x64xf32> -> vector<8x256xf32>
    %c0_50 = arith.constant 0 : index
    %c0_51 = arith.constant 0 : index
    %117 = vector.load %arg8[%c0_50, %c0_51] : memref<256x512xf32, #tpu.memory_space<vmem>>, vector<256x512xf32>
    %cst_52 = arith.constant dense<0.000000e+00> : vector<8x512xf32>
    %118 = tpu.matmul %116, %117, %cst_52 {dimension_numbers = #tpu.dot_dimension_numbers<[1], [0], [0], [1], [0, 0, 1, 1], [], []>} : vector<8x256xf32>, vector<256x512xf32>, vector<8x512xf32> -> vector<8x512xf32>
    %c0_53 = arith.constant 0 : index
    %c0_54 = arith.constant 0 : index
    %119 = vector.load %arg9[%c0_53, %c0_54] : memref<1x512xf32, #tpu.memory_space<vmem>>, vector<1x512xf32>
    %120 = vector.broadcast %119 : vector<1x512xf32> to vector<8x512xf32>
    %121 = arith.addf %118, %120 : vector<8x512xf32>
    %cst_55 = arith.constant 0.000000e+00 : f32
    %122 = vector.broadcast %cst_55 : f32 to vector<8x512xf32>
    %123 = arith.maximumf %121, %122 : vector<8x512xf32>
    %c0_56 = arith.constant 0 : index
    %c0_57 = arith.constant 0 : index
    %124 = vector.load %arg10[%c0_56, %c0_57] : memref<512x128xf32, #tpu.memory_space<vmem>>, vector<512x128xf32>
    %cst_58 = arith.constant dense<0.000000e+00> : vector<8x128xf32>
    %125 = tpu.matmul %123, %124, %cst_58 {dimension_numbers = #tpu.dot_dimension_numbers<[1], [0], [0], [1], [0, 0, 1, 1], [], []>} : vector<8x512xf32>, vector<512x128xf32>, vector<8x128xf32> -> vector<8x128xf32>
    %c0_59 = arith.constant 0 : index
    %c0_60 = arith.constant 0 : index
    %126 = vector.load %arg11[%c0_59, %c0_60] : memref<1x128xf32, #tpu.memory_space<vmem>>, vector<1x128xf32>
    %127 = vector.broadcast %126 : vector<1x128xf32> to vector<8x128xf32>
    %128 = arith.addf %125, %127 : vector<8x128xf32>
    %c0_61 = arith.constant 0 : index
    %c0_62 = arith.constant 0 : index
    %129 = vector.load %arg12[%c0_61, %c0_62] : memref<8x128xf32, #tpu.memory_space<vmem>>, vector<8x128xf32>
    tpu.vector_store %arg12[%c0_61, %c0_62], %128 {strides = array<i32>} : memref<8x128xf32, #tpu.memory_space<vmem>>, vector<8x128xf32>,
    return
  }
  func.func @transform_0(%arg0: i32) -> (i32, i32, i32) {
    %c0_i32 = arith.constant 0 : i32
    %c0_i32_0 = arith.constant 0 : i32
    %c0_i32_1 = arith.constant 0 : i32
    return %arg0, %c0_i32, %c0_i32_0 : i32, i32, i32
  }
  func.func @transform_1(%arg0: i32) -> (i32, i32) {
    %c0_i32 = arith.constant 0 : i32
    %c0_i32_0 = arith.constant 0 : i32
    %c0_i32_1 = arith.constant 0 : i32
    return %c0_i32, %c0_i32_0 : i32, i32
  }
  func.func @transform_2(%arg0: i32) -> (i32, i32) {
    %c0_i32 = arith.constant 0 : i32
    %c0_i32_0 = arith.constant 0 : i32
    %c0_i32_1 = arith.constant 0 : i32
    return %c0_i32, %c0_i32_0 : i32, i32
  }
  func.func @transform_3(%arg0: i32) -> (i32, i32, i32) {
    %c0_i32 = arith.constant 0 : i32
    %c0_i32_0 = arith.constant 0 : i32
    %c0_i32_1 = arith.constant 0 : i32
    %c0_i32_2 = arith.constant 0 : i32
    return %c0_i32, %c0_i32_0, %c0_i32_1 : i32, i32, i32
  }
  func.func @transform_4(%arg0: i32) -> (i32, i32) {
    %c0_i32 = arith.constant 0 : i32
    %c0_i32_0 = arith.constant 0 : i32
    %c0_i32_1 = arith.constant 0 : i32
    return %c0_i32, %c0_i32_0 : i32, i32
  }
  func.func @transform_5(%arg0: i32) -> (i32, i32, i32) {
    %c0_i32 = arith.constant 0 : i32
    %c0_i32_0 = arith.constant 0 : i32
    %c0_i32_1 = arith.constant 0 : i32
    %c0_i32_2 = arith.constant 0 : i32
    return %c0_i32, %c0_i32_0, %c0_i32_1 : i32, i32, i32
  }
  func.func @transform_6(%arg0: i32) -> (i32, i32) {
    %c0_i32 = arith.constant 0 : i32
    %c0_i32_0 = arith.constant 0 : i32
    %c0_i32_1 = arith.constant 0 : i32
    return %c0_i32, %c0_i32_0 : i32, i32
  }
  func.func @transform_7(%arg0: i32) -> (i32, i32) {
    %c0_i32 = arith.constant 0 : i32
    %c0_i32_0 = arith.constant 0 : i32
    %c0_i32_1 = arith.constant 0 : i32
    return %c0_i32, %c0_i32_0 : i32, i32
  }
  func.func @transform_8(%arg0: i32) -> (i32, i32) {
    %c0_i32 = arith.constant 0 : i32
    %c0_i32_0 = arith.constant 0 : i32
    %c0_i32_1 = arith.constant 0 : i32
    return %c0_i32, %c0_i32_0 : i32, i32
  }
  func.func @transform_9(%arg0: i32) -> (i32, i32) {
    %c0_i32 = arith.constant 0 : i32
    %c0_i32_0 = arith.constant 0 : i32
    %c0_i32_1 = arith.constant 0 : i32
    return %c0_i32, %c0_i32_0 : i32, i32
  }
  func.func @transform_10(%arg0: i32) -> (i32, i32) {
    %c0_i32 = arith.constant 0 : i32
    %c0_i32_0 = arith.constant 0 : i32
    %c0_i32_1 = arith.constant 0 : i32
    return %c0_i32, %c0_i32_0 : i32, i32
  }
  func.func @transform_11(%arg0: i32) -> (i32, i32) {
    %c0_i32 = arith.constant 0 : i32
    %c0_i32_0 = arith.constant 0 : i32
    return %arg0, %c0_i32 : i32, i32
  }
}

</mosaic_0001>

<bundles_post_ra>
// kernel: dqn_forward.1
= control target key start
LH: loop header
LB: loop body
LE: loop exit
PB: predicated region body
PF: predicated region fallthrough
CT: control target
= control target key end

     0   :  { %s3679_s17 = smov 0   ;;  %s6259_s0 = inlined_call_operand.vmem [shape: f32[2,800,256], index: 0, kind: input, shape index: {}]   ;;  %s6260_s1 = inlined_call_operand.vmem [shape: f32[256,32], index: 1, kind: input, shape index: {}]   ;;  %s6261_s2 = inlined_call_operand.vmem [shape: f32[1,32], index: 2, kind: input, shape index: {}]   ;;  %s6262_s3 = inlined_call_operand.vmem [shape: f32[8,64,64], index: 3, kind: input, shape index: {}]   ;;  %s6263_s4 = inlined_call_operand.vmem [shape: f32[1,64], index: 4, kind: input, shape index: {}]   ;;  %s6264_s5 = inlined_call_operand.vmem [shape: f32[3,192,64], index: 5, kind: input, shape index: {}]   ;;  %s6265_s6 = inlined_call_operand.vmem [shape: f32[1,64], index: 6, kind: input, shape index: {}]   ;;  %s6266_s7 = inlined_call_operand.vmem [shape: f32[256,512], index: 7, kind: input, shape index: {}]   ;;  %s6267_s8 = inlined_call_operand.vmem [shape: f32[1,512], index: 8, kind: input, shape index: {}]   ;;  %s6268_s9 = inlined_call_operand.vmem [shape: f32[512,128], index: 9, kind: input, shape index: {}]   ;;  %s6269_s10 = inlined_call_operand.vmem [shape: f32[1,128], index: 10, kind: input, shape index: {}]   ;;  %s6270_s11 = inlined_call_operand.vmem [shape: f32[16,128], index: 11, kind: output, shape index: {}]  }
   0x1 LB: > { %s3318_s18 = sadd.s32 4294967295, %s3615_s17   ;;  %p3322_p0 = scmp.ge.s32.totalorder %s3615_s17, 1  ;;  %s3615_s17 = sphi %s3679_s17, %s21_s17  }
   0x2   : > { %p337_p1 = scmp.lt.s32.totalorder %s3615_s17, 3 }
   0x4   : > { %p338_p2 = pnand %p3322_p0, %p337_p1 }
   0x6   : > { %341 = sbr.rel (%p338_p2) target bundleno = 2175 (0x87f), region = 64 }
   0xb   : > { %v600_v0 = vld [vmem:[%s6260_s1 + $0x78] sm:$0xff]  ;;  %v599_v2 = vld [vmem:[%s6260_s1 + $0x70] sm:$0xff]  ;;  %v598_v4 = vld [vmem:[%s6260_s1 + $0x68] sm:$0xff]  ;;  %p376_p3 = scmp.lt.s32.totalorder %s3318_s18, 1  ;;  %s3617_s21 = smov 32   ;;  %vm1455_vm0 = vcmask 261120  }
   0xc   : > { %v616_v1 = vld [vmem:[%s6260_s1 + $0xf8] sm:$0xff]  ;;  %621 = vmatpush.msra.mxu0 %v600_v0  ;;  %v615_v3 = vld [vmem:[%s6260_s1 + $0xf0] sm:$0xff]  ;;  %v614_v5 = vld [vmem:[%s6260_s1 + $0xe8] sm:$0xff]  ;;  %3571 = vmatpush.msra.mxu2 %v600_v0  ;;  %vm1623_vm1 = vcmask 523264  }
   0xd   : > { %938 = vmatpush.msra.mxu1 %v616_v1  ;;  %v597_v6 = vld [vmem:[%s6260_s1 + $0x60] sm:$0xff]  ;;  %v596_v8 = vld [vmem:[%s6260_s1 + $0x58] sm:$0xff]  ;;  %v595_v10 = vld [vmem:[%s6260_s1 + $0x50] sm:$0xff]  ;;  %s6440_s18 = smov (!%p376_p3, %s3318_s18), 1 }
   0xe   : > { %622 = vmatpush.msra.mxu0 %v599_v2  ;;  %v613_v7 = vld [vmem:[%s6260_s1 + $0xe0] sm:$0xff]  ;;  %3572 = vmatpush.msra.mxu2 %v599_v2  ;;  %v612_v9 = vld [vmem:[%s6260_s1 + $0xd8] sm:$0xff]  ;;  %v611_v11 = vld [vmem:[%s6260_s1 + $0xd0] sm:$0xff]  ;;  %s3587_s20 = smul.u32 1600, %s6440_s18  ;;  %s3324_s30 = sshll.u32 %s6440_s18, 3 }
   0xf   : > { %939 = vmatpush.msra.mxu1 %v615_v3  ;;  %v594_v12 = vld [vmem:[%s6260_s1 + $0x48] sm:$0xff]  ;;  %v593_v14 = vld [vmem:[%s6260_s1 + $0x40] sm:$0xff]  ;;  %v592_v16 = vld [vmem:[%s6260_s1 + $0x38] sm:$0xff]  ;;  %s384_s14 = scalar_lea.vmem %s6270_s11, %s3324_s30 }
  0x10   : > { %623 = vmatpush.msra.mxu0 %v598_v4  ;;  %3573 = vmatpush.msra.mxu2 %v598_v4  ;;  %v610_v13 = vld [vmem:[%s6260_s1 + $0xc8] sm:$0xff]  ;;  %v609_v15 = vld [vmem:[%s6260_s1 + $0xc0] sm:$0xff]  ;;  %v608_v17 = vld [vmem:[%s6260_s1 + $0xb8] sm:$0xff]  ;;  %s3787_s12 = scalar_lea.vmem %s6259_s0, %s3587_s20 }
  0x11   : > { %940 = vmatpush.msra.mxu1 %v614_v5  ;;  %v591_v18 = vld [vmem:[%s6260_s1 + $0x30] sm:$0xff]  ;;  %v590_v20 = vld [vmem:[%s6260_s1 + $0x28] sm:$0xff]  ;;  %v589_v22 = vld [vmem:[%s6260_s1 + $0x20] sm:$0xff] }
  0x12   : > { %624 = vmatpush.msra.mxu0 %v597_v6  ;;  %3574 = vmatpush.msra.mxu2 %v597_v6  ;;  %v607_v19 = vld [vmem:[%s6260_s1 + $0xb0] sm:$0xff]  ;;  %v606_v21 = vld [vmem:[%s6260_s1 + $0xa8] sm:$0xff]  ;;  %v605_v23 = vld [vmem:[%s6260_s1 + $0xa0] sm:$0xff] }
  0x13   : > { %941 = vmatpush.msra.mxu1 %v613_v7  ;;  %v588_v24 = vld [vmem:[%s6260_s1 + $0x18] sm:$0xff]  ;;  %v587_v26 = vld [vmem:[%s6260_s1 + $0x10] sm:$0xff]  ;;  %v586_v28 = vld [vmem:[%s6260_s1 + $0x8] sm:$0xff] }
  0x14   : > { %625 = vmatpush.msra.mxu0 %v596_v8  ;;  %3575 = vmatpush.msra.mxu2 %v596_v8  ;;  %v604_v25 = vld [vmem:[%s6260_s1 + $0x98] sm:$0xff]  ;;  %v603_v27 = vld [vmem:[%s6260_s1 + $0x90] sm:$0xff]  ;;  %v602_v29 = vld [vmem:[%s6260_s1 + $0x88] sm:$0xff] }
  0x15   : > { %942 = vmatpush.msra.mxu1 %v612_v9  ;;  %v585_v30 = vld [vmem:[%s6260_s1] sm:$0xff]  ;;  %v386_v33 = vld [vmem:[%s3787_s12 + $0x8] sm:$0xff]  ;;  %v387_v34 = vld [vmem:[%s3787_s12 + $0x10] sm:$0xff] }
  0x16   : > { %626 = vmatpush.msra.mxu0 %v595_v10  ;;  %3576 = vmatpush.msra.mxu2 %v595_v10  ;;  %v601_v31 = vld [vmem:[%s6260_s1 + $0x80] sm:$0xff]  ;;  %v388_v35 = vld [vmem:[%s3787_s12 + $0x18] sm:$0xff]  ;;  %v390_v37 = vld [vmem:[%s3787_s12 + $0x28] sm:$0xff] }
  0x17   : > { %943 = vmatpush.msra.mxu1 %v611_v11  ;;  %v385_v32 = vld [vmem:[%s3787_s12] sm:$0xff]  ;;  %v391_v38 = vld [vmem:[%s3787_s12 + $0x30] sm:$0xff]  ;;  %v392_v39 = vld [vmem:[%s3787_s12 + $0x38] sm:$0xff] }
  0x18   : > { %627 = vmatpush.msra.mxu0 %v594_v12  ;;  %3577 = vmatpush.msra.mxu2 %v594_v12  ;;  %v389_v36 = vld [vmem:[%s3787_s12 + $0x20] sm:$0xff]  ;;  %v394_v41 = vld [vmem:[%s3787_s12 + $0x48] sm:$0xff]  ;;  %v395_v42 = vld [vmem:[%s3787_s12 + $0x50] sm:$0xff] }
  0x19   : > { %944 = vmatpush.msra.mxu1 %v610_v13  ;;  %v393_v40 = vld [vmem:[%s3787_s12 + $0x40] sm:$0xff]  ;;  %v396_v43 = vld [vmem:[%s3787_s12 + $0x58] sm:$0xff]  ;;  %v398_v45 = vld [vmem:[%s3787_s12 + $0x68] sm:$0xff] }
  0x1a   : > { %628 = vmatpush.msra.mxu0 %v593_v14  ;;  %3578 = vmatpush.msra.mxu2 %v593_v14  ;;  %v397_v44 = vld [vmem:[%s3787_s12 + $0x60] sm:$0xff]  ;;  %v399_v46 = vld [vmem:[%s3787_s12 + $0x70] sm:$0xff]  ;;  %v400_v47 = vld [vmem:[%s3787_s12 + $0x78] sm:$0xff] }
  0x1b   : > { %945 = vmatpush.msra.mxu1 %v609_v15  ;;  %v401_v48 = vld [vmem:[%s3787_s12 + $0x80] sm:$0xff]  ;;  %v402_v49 = vld [vmem:[%s3787_s12 + $0x88] sm:$0xff]  ;;  %v403_v50 = vld [vmem:[%s3787_s12 + $0x90] sm:$0xff] }
  0x1c   : > { %629 = vmatpush.msra.mxu0 %v592_v16  ;;  %3579 = vmatpush.msra.mxu2 %v592_v16  ;;  %v404_v51 = vld [vmem:[%s3787_s12 + $0x98] sm:$0xff]  ;;  %v405_v52 = vld [vmem:[%s3787_s12 + $0xa0] sm:$0xff]  ;;  %v406_v53 = vld [vmem:[%s3787_s12 + $0xa8] sm:$0xff] }
  0x1d   : > { %946 = vmatpush.msra.mxu1 %v608_v17  ;;  %v407_v54 = vld [vmem:[%s3787_s12 + $0xb0] sm:$0xff]  ;;  %v408_v55 = vld [vmem:[%s3787_s12 + $0xb8] sm:$0xff]  ;;  %v409_v56 = vld [vmem:[%s3787_s12 + $0xc0] sm:$0xff] }
  0x1e   : > { %630 = vmatpush.msra.mxu0 %v591_v18  ;;  %3580 = vmatpush.msra.mxu2 %v591_v18  ;;  %v410_v57 = vld [vmem:[%s3787_s12 + $0xc8] sm:$0xff]  ;;  %v411_v58 = vld [vmem:[%s3787_s12 + $0xd0] sm:$0xff]  ;;  %v412_v59 = vld [vmem:[%s3787_s12 + $0xd8] sm:$0xff] }
  0x1f   : > { %947 = vmatpush.msra.mxu1 %v607_v19  ;;  %v413_v60 = vld [vmem:[%s3787_s12 + $0xe0] sm:$0xff]  ;;  %v414_v61 = vld [vmem:[%s3787_s12 + $0xe8] sm:$0xff]  ;;  %v415_v62 = vld [vmem:[%s3787_s12 + $0xf0] sm:$0xff] }
  0x20   : > { %631 = vmatpush.msra.mxu0 %v590_v20  ;;  %3581 = vmatpush.msra.mxu2 %v590_v20  ;;  %v416_v63 = vld [vmem:[%s3787_s12 + $0xf8] sm:$0xff]  ;;  %v417_v2 = vld [vmem:[%s3787_s12 + $0x100] sm:$0xff]  ;;  %v418_v3 = vld [vmem:[%s3787_s12 + $0x108] sm:$0xff] }
  0x21   : > { %948 = vmatpush.msra.mxu1 %v606_v21  ;;  %v419_v6 = vld [vmem:[%s3787_s12 + $0x110] sm:$0xff]  ;;  %v420_v7 = vld [vmem:[%s3787_s12 + $0x118] sm:$0xff]  ;;  %v421_v10 = vld [vmem:[%s3787_s12 + $0x120] sm:$0xff] }
  0x22   : > { %632 = vmatpush.msra.mxu0 %v589_v22  ;;  %3582 = vmatpush.msra.mxu2 %v589_v22  ;;  %v422_v11 = vld [vmem:[%s3787_s12 + $0x128] sm:$0xff]  ;;  %v423_v14 = vld [vmem:[%s3787_s12 + $0x130] sm:$0xff]  ;;  %v424_v15 = vld [vmem:[%s3787_s12 + $0x138] sm:$0xff] }
  0x23   : > { %949 = vmatpush.msra.mxu1 %v605_v23  ;;  %v425_v18 = vld [vmem:[%s3787_s12 + $0x140] sm:$0xff]  ;;  %v426_v19 = vld [vmem:[%s3787_s12 + $0x148] sm:$0xff]  ;;  %v427_v22 = vld [vmem:[%s3787_s12 + $0x150] sm:$0xff] }
  0x24   : > { %633 = vmatpush.msra.mxu0 %v588_v24  ;;  %3583 = vmatpush.msra.mxu2 %v588_v24  ;;  %v428_v23 = vld [vmem:[%s3787_s12 + $0x158] sm:$0xff] }
  0x25   : > { %950 = vmatpush.msra.mxu1 %v604_v25 }
  0x26   : > { %634 = vmatpush.msra.mxu0 %v587_v26  ;;  %3584 = vmatpush.msra.mxu2 %v587_v26  ;;  %v429_v26 = vld [vmem:[%s3787_s12 + $0x160] sm:$0xff] }
  0x27   : > { %951 = vmatpush.msra.mxu1 %v603_v27  ;;  %v430_v27 = vld [vmem:[%s3787_s12 + $0x168] sm:$0xff] }
  0x28   : > { %635 = vmatpush.msra.mxu0 %v586_v28  ;;  %3585 = vmatpush.msra.mxu2 %v586_v28 }
  0x29   : > { %952 = vmatpush.msra.mxu1 %v602_v29 }
  0x2a   : > { %636 = vmatpush.msra.mxu0 %v585_v30  ;;  %3586 = vmatpush.msra.mxu2 %v585_v30  ;;  %v431_v30 = vld [vmem:[%s3787_s12 + $0x170] sm:$0xff] }
  0x2b   : > { %953 = vmatpush.msra.mxu1 %v601_v31  ;;  %637 = vmatmul.f32.vlgmr.msra.gmra.mxu0 %v385_v32  ;;  %v432_v31 = vld [vmem:[%s3787_s12 + $0x178] sm:$0xff] }
  0x2c   : > { %954 = vmatmul.f32.vlgmr.msra.gmra.mxu1 %v386_v33 }
  0x33   : > { %640 = vmatmul.f32.gmra.mxu0 %v387_v34  ;;  %v433_v34 = vld [vmem:[%s3787_s12 + $0x180] sm:$0xff] }
  0x34   : > { %957 = vmatmul.f32.gmra.mxu1 %v388_v35  ;;  %v434_v35 = vld [vmem:[%s3787_s12 + $0x188] sm:$0xff] }
  0x3b   : > { %643 = vmatmul.f32.gmra.mxu0 %v389_v36 }
  0x3c   : > { %960 = vmatmul.f32.gmra.mxu1 %v390_v37 }
  0x43   : > { %646 = vmatmul.f32.gmra.mxu0 %v391_v38  ;;  %v435_v38 = vld [vmem:[%s3787_s12 + $0x190] sm:$0xff] }
  0x44   : > { %963 = vmatmul.f32.gmra.mxu1 %v392_v39  ;;  %v436_v39 = vld [vmem:[%s3787_s12 + $0x198] sm:$0xff] }
  0x4b   : > { %649 = vmatmul.f32.gmra.mxu0 %v393_v40 }
  0x4c   : > { %966 = vmatmul.f32.gmra.mxu1 %v394_v41 }
  0x53   : > { %652 = vmatmul.f32.gmra.mxu0 %v395_v42  ;;  %v437_v42 = vld [vmem:[%s3787_s12 + $0x1a0] sm:$0xff] }
  0x54   : > { %969 = vmatmul.f32.gmra.mxu1 %v396_v43  ;;  %v438_v43 = vld [vmem:[%s3787_s12 + $0x1a8] sm:$0xff] }
  0x5b   : > { %655 = vmatmul.f32.gmra.mxu0 %v397_v44 }
  0x5c   : > { %972 = vmatmul.f32.gmra.mxu1 %v398_v45 }
  0x63   : > { %658 = vmatmul.f32.gmra.mxu0 %v399_v46  ;;  %v439_v46 = vld [vmem:[%s3787_s12 + $0x1b0] sm:$0xff] }
  0x64   : > { %975 = vmatmul.f32.gmra.mxu1 %v400_v47  ;;  %v440_v47 = vld [vmem:[%s3787_s12 + $0x1b8] sm:$0xff] }
  0x6b   : > { %661 = vmatmul.f32.gmra.mxu0 %v401_v48 }
  0x6c   : > { %978 = vmatmul.f32.gmra.mxu1 %v402_v49 }
  0x73   : > { %664 = vmatmul.f32.gmra.mxu0 %v403_v50  ;;  %v441_v50 = vld [vmem:[%s3787_s12 + $0x1c0] sm:$0xff] }
  0x74   : > { %981 = vmatmul.f32.gmra.mxu1 %v404_v51  ;;  %v442_v51 = vld [vmem:[%s3787_s12 + $0x1c8] sm:$0xff] }
  0x7b   : > { %667 = vmatmul.f32.gmra.mxu0 %v405_v52 }
  0x7c   : > { %984 = vmatmul.f32.gmra.mxu1 %v406_v53 }
  0x83   : > { %670 = vmatmul.f32.gmra.mxu0 %v407_v54  ;;  %v443_v54 = vld [vmem:[%s3787_s12 + $0x1d0] sm:$0xff] }
  0x84   : > { %987 = vmatmul.f32.gmra.mxu1 %v408_v55  ;;  %v444_v55 = vld [vmem:[%s3787_s12 + $0x1d8] sm:$0xff] }
  0x8b   : > { %673 = vmatmul.f32.gmra.mxu0 %v409_v56 }
  0x8c   : > { %990 = vmatmul.f32.gmra.mxu1 %v410_v57 }
  0x93   : > { %676 = vmatmul.f32.gmra.mxu0 %v411_v58  ;;  %v445_v58 = vld [vmem:[%s3787_s12 + $0x1e0] sm:$0xff] }
  0x94   : > { %993 = vmatmul.f32.gmra.mxu1 %v412_v59  ;;  %v446_v59 = vld [vmem:[%s3787_s12 + $0x1e8] sm:$0xff] }
  0x9b   : > { %679 = vmatmul.f32.gmra.mxu0 %v413_v60 }
  0x9c   : > { %996 = vmatmul.f32.gmra.mxu1 %v414_v61 }
  0xa3   : > { %682 = vmatmul.f32.gmra.mxu0 %v415_v62  ;;  %v447_v62 = vld [vmem:[%s3787_s12 + $0x1f0] sm:$0xff] }
  0xa4   : > { %999 = vmatmul.f32.gmra.mxu1 %v416_v63  ;;  %v448_v63 = vld [vmem:[%s3787_s12 + $0x1f8] sm:$0xff] }
  0xa8   : > { %v3827_v0 = vpop.f32.mrf.mxu0 }
  0xa9   : > { %v3829_v1 = vpop.f32.mrf.mxu1 }
  0xab   : > { %685 = vmatmul.f32.gmra.mxu0 %v417_v2 }
  0xac   : > { %1002 = vmatmul.f32.gmra.mxu1 %v418_v3 }
  0xb0   : > { %v3833_v4 = vpop.f32.mrf.mxu0 }
  0xb1   : > { %v3835_v5 = vpop.f32.mrf.mxu1 }
  0xb3   : > { %688 = vmatmul.f32.gmra.mxu0 %v419_v6  ;;  %v449_v6 = vld [vmem:[%s3787_s12 + $0x200] sm:$0xff] }
  0xb4   : > { %1005 = vmatmul.f32.gmra.mxu1 %v420_v7  ;;  %v450_v7 = vld [vmem:[%s3787_s12 + $0x208] sm:$0xff] }
  0xb8   : > { %v3839_v8 = vpop.f32.mrf.mxu0 }
  0xb9   : > { %v3841_v9 = vpop.f32.mrf.mxu1 }
  0xbb   : > { %691 = vmatmul.f32.gmra.mxu0 %v421_v10 }
  0xbc   : > { %1008 = vmatmul.f32.gmra.mxu1 %v422_v11 }
  0xc0   : > { %v3845_v12 = vpop.f32.mrf.mxu0 }
  0xc1   : > { %v3847_v13 = vpop.f32.mrf.mxu1 }
  0xc3   : > { %694 = vmatmul.f32.gmra.mxu0 %v423_v14  ;;  %v451_v14 = vld [vmem:[%s3787_s12 + $0x210] sm:$0xff] }
  0xc4   : > { %1011 = vmatmul.f32.gmra.mxu1 %v424_v15  ;;  %v452_v15 = vld [vmem:[%s3787_s12 + $0x218] sm:$0xff] }
  0xc8   : > { %v3851_v16 = vpop.f32.mrf.mxu0 }
  0xc9   : > { %v3853_v17 = vpop.f32.mrf.mxu1 }
  0xcb   : > { %697 = vmatmul.f32.gmra.mxu0 %v425_v18 }
  0xcc   : > { %1014 = vmatmul.f32.gmra.mxu1 %v426_v19 }
  0xd0   : > { %v3857_v20 = vpop.f32.mrf.mxu0 }
  0xd1   : > { %v3859_v21 = vpop.f32.mrf.mxu1 }
  0xd3   : > { %700 = vmatmul.f32.gmra.mxu0 %v427_v22  ;;  %v453_v22 = vld [vmem:[%s3787_s12 + $0x220] sm:$0xff] }
  0xd4   : > { %1017 = vmatmul.f32.gmra.mxu1 %v428_v23  ;;  %v454_v23 = vld [vmem:[%s3787_s12 + $0x228] sm:$0xff] }
  0xd8   : > { %v3863_v24 = vpop.f32.mrf.mxu0 }
  0xd9   : > { %v3865_v25 = vpop.f32.mrf.mxu1 }
  0xdb   : > { %703 = vmatmul.f32.gmra.mxu0 %v429_v26 }
  0xdc   : > { %1020 = vmatmul.f32.gmra.mxu1 %v430_v27 }
  0xe0   : > { %v3869_v28 = vpop.f32.mrf.mxu0 }
  0xe1   : > { %v3871_v29 = vpop.f32.mrf.mxu1 }
  0xe3   : > { %706 = vmatmul.f32.gmra.mxu0 %v431_v30  ;;  %v455_v30 = vld [vmem:[%s3787_s12 + $0x230] sm:$0xff] }
  0xe4   : > { %1023 = vmatmul.f32.gmra.mxu1 %v432_v31  ;;  %v456_v31 = vld [vmem:[%s3787_s12 + $0x238] sm:$0xff] }
  0xe8   : > { %v3875_v32 = vpop.f32.mrf.mxu0 }
  0xe9   : > { %v3877_v33 = vpop.f32.mrf.mxu1 }
  0xeb   : > { %709 = vmatmul.f32.gmra.mxu0 %v433_v34 }
  0xec   : > { %1026 = vmatmul.f32.gmra.mxu1 %v434_v35 }
  0xf0   : > { %v3881_v36 = vpop.f32.mrf.mxu0 }
  0xf1   : > { %v3883_v37 = vpop.f32.mrf.mxu1 }
  0xf3   : > { %712 = vmatmul.f32.gmra.mxu0 %v435_v38  ;;  %v457_v38 = vld [vmem:[%s3787_s12 + $0x240] sm:$0xff] }
  0xf4   : > { %1029 = vmatmul.f32.gmra.mxu1 %v436_v39  ;;  %v458_v39 = vld [vmem:[%s3787_s12 + $0x248] sm:$0xff] }
  0xf8   : > { %v3887_v40 = vpop.f32.mrf.mxu0 }
  0xf9   : > { %v3889_v41 = vpop.f32.mrf.mxu1 }
  0xfb   : > { %715 = vmatmul.f32.gmra.mxu0 %v437_v42 }
  0xfc   : > { %1032 = vmatmul.f32.gmra.mxu1 %v438_v43 }
 0x100   : > { %v3893_v44 = vpop.f32.mrf.mxu0 }
 0x101   : > { %v3895_v45 = vpop.f32.mrf.mxu1 }
 0x103   : > { %718 = vmatmul.f32.gmra.mxu0 %v439_v46  ;;  %v459_v46 = vld [vmem:[%s3787_s12 + $0x250] sm:$0xff] }
 0x104   : > { %1035 = vmatmul.f32.gmra.mxu1 %v440_v47  ;;  %v460_v47 = vld [vmem:[%s3787_s12 + $0x258] sm:$0xff] }
 0x108   : > { %v3899_v48 = vpop.f32.mrf.mxu0 }
 0x109   : > { %v3901_v49 = vpop.f32.mrf.mxu1 }
 0x10b   : > { %721 = vmatmul.f32.gmra.mxu0 %v441_v50 }
 0x10c   : > { %1038 = vmatmul.f32.gmra.mxu1 %v442_v51 }
 0x110   : > { %v3905_v52 = vpop.f32.mrf.mxu0 }
 0x111   : > { %v3907_v53 = vpop.f32.mrf.mxu1 }
 0x113   : > { %724 = vmatmul.f32.gmra.mxu0 %v443_v54  ;;  %v461_v54 = vld [vmem:[%s3787_s12 + $0x260] sm:$0xff] }
 0x114   : > { %1041 = vmatmul.f32.gmra.mxu1 %v444_v55  ;;  %v462_v55 = vld [vmem:[%s3787_s12 + $0x268] sm:$0xff] }
 0x118   : > { %v3911_v56 = vpop.f32.mrf.mxu0 }
 0x119   : > { %v3913_v57 = vpop.f32.mrf.mxu1 }
 0x11b   : > { %727 = vmatmul.f32.gmra.mxu0 %v445_v58 }
 0x11c   : > { %1044 = vmatmul.f32.gmra.mxu1 %v446_v59 }
 0x120   : > { %v3917_v60 = vpop.f32.mrf.mxu0 }
 0x121   : > { %v3919_v61 = vpop.f32.mrf.mxu1 }
 0x123   : > { %730 = vmatmul.f32.gmra.mxu0 %v447_v62  ;;  %v463_v62 = vld [vmem:[%s3787_s12 + $0x270] sm:$0xff] }
 0x124   : > { %1047 = vmatmul.f32.gmra.mxu1 %v448_v63  ;;  %v464_v63 = vld [vmem:[%s3787_s12 + $0x278] sm:$0xff] }
 0x128   : > { %v3923_v2 = vpop.f32.mrf.mxu0 }
 0x129   : > { %v3925_v3 = vpop.f32.mrf.mxu1 }
 0x12b   : > { %733 = vmatmul.f32.gmra.mxu0 %v449_v6 }
 0x12c   : > { %1050 = vmatmul.f32.gmra.mxu1 %v450_v7 }
 0x130   : > { %v3929_v10 = vpop.f32.mrf.mxu0 }
 0x131   : > { %v3931_v11 = vpop.f32.mrf.mxu1 }
 0x133   : > { %736 = vmatmul.f32.gmra.mxu0 %v451_v14  ;;  %v465_v14 = vld [vmem:[%s3787_s12 + $0x280] sm:$0xff] }
 0x134   : > { %1053 = vmatmul.f32.gmra.mxu1 %v452_v15  ;;  %v466_v15 = vld [vmem:[%s3787_s12 + $0x288] sm:$0xff] }
 0x138   : > { %v3935_v18 = vpop.f32.mrf.mxu0 }
 0x139   : > { %v3937_v19 = vpop.f32.mrf.mxu1 }
 0x13b   : > { %739 = vmatmul.f32.gmra.mxu0 %v453_v22 }
 0x13c   : > { %1056 = vmatmul.f32.gmra.mxu1 %v454_v23 }
 0x140   : > { %v3941_v26 = vpop.f32.mrf.mxu0 }
 0x141   : > { %v3943_v27 = vpop.f32.mrf.mxu1 }
 0x143   : > { %742 = vmatmul.f32.gmra.mxu0 %v455_v30  ;;  %v467_v30 = vld [vmem:[%s3787_s12 + $0x290] sm:$0xff] }
 0x144   : > { %1059 = vmatmul.f32.gmra.mxu1 %v456_v31  ;;  %v468_v31 = vld [vmem:[%s3787_s12 + $0x298] sm:$0xff] }
 0x148   : > { %v3947_v34 = vpop.f32.mrf.mxu0 }
 0x149   : > { %6279 = vst [vmem:[#allocation2_spill] sm:$0xff] %v3947_v34  ;;  %v3949_v35 = vpop.f32.mrf.mxu1  ;;  %v484_v34 = vld [vmem:[%s3787_s12 + $0x318] sm:$0xff] }
 0x14a   : > { %6280 = vst [vmem:[#allocation3_spill] sm:$0xff] %v3949_v35  ;;  %v483_v35 = vld [vmem:[%s3787_s12 + $0x310] sm:$0xff] }
 0x14b   : > { %745 = vmatmul.f32.gmra.mxu0 %v457_v38 }
 0x14c   : > { %1062 = vmatmul.f32.gmra.mxu1 %v458_v39 }
 0x150   : > { %v3953_v42 = vpop.f32.mrf.mxu0 }
 0x151   : > { %6281 = vst [vmem:[#allocation4_spill] sm:$0xff] %v3953_v42  ;;  %v3955_v43 = vpop.f32.mrf.mxu1  ;;  %v482_v42 = vld [vmem:[%s3787_s12 + $0x308] sm:$0xff] }
 0x152   : > { %6282 = vst [vmem:[#allocation5_spill] sm:$0xff] %v3955_v43  ;;  %v481_v43 = vld [vmem:[%s3787_s12 + $0x300] sm:$0xff] }
 0x153   : > { %748 = vmatmul.f32.gmra.mxu0 %v459_v46  ;;  %v469_v46 = vld [vmem:[%s3787_s12 + $0x2a0] sm:$0xff] }
 0x154   : > { %1065 = vmatmul.f32.gmra.mxu1 %v460_v47  ;;  %v470_v47 = vld [vmem:[%s3787_s12 + $0x2a8] sm:$0xff] }
 0x158   : > { %v3959_v50 = vpop.f32.mrf.mxu0 }
 0x159   : > { %6283 = vst [vmem:[#allocation6_spill] sm:$0xff] %v3959_v50  ;;  %v3961_v51 = vpop.f32.mrf.mxu1  ;;  %v480_v50 = vld [vmem:[%s3787_s12 + $0x2f8] sm:$0xff] }
 0x15a   : > { %6284 = vst [vmem:[#allocation7_spill] sm:$0xff] %v3961_v51  ;;  %v479_v51 = vld [vmem:[%s3787_s12 + $0x2f0] sm:$0xff] }
 0x15b   : > { %751 = vmatmul.f32.gmra.mxu0 %v461_v54 }
 0x15c   : > { %1068 = vmatmul.f32.gmra.mxu1 %v462_v55 }
 0x160   : > { %v3965_v58 = vpop.f32.mrf.mxu0 }
 0x161   : > { %6285 = vst [vmem:[#allocation8_spill] sm:$0xff] %v3965_v58  ;;  %v3967_v59 = vpop.f32.mrf.mxu1  ;;  %v478_v58 = vld [vmem:[%s3787_s12 + $0x2e8] sm:$0xff] }
 0x162   : > { %6286 = vst [vmem:[#allocation9_spill] sm:$0xff] %v3967_v59  ;;  %v477_v59 = vld [vmem:[%s3787_s12 + $0x2e0] sm:$0xff] }
 0x163   : > { %754 = vmatmul.f32.gmra.mxu0 %v463_v62  ;;  %v471_v62 = vld [vmem:[%s3787_s12 + $0x2b0] sm:$0xff] }
 0x164   : > { %1071 = vmatmul.f32.gmra.mxu1 %v464_v63  ;;  %v472_v63 = vld [vmem:[%s3787_s12 + $0x2b8] sm:$0xff] }
 0x168   : > { %v3971_v6 = vpop.f32.mrf.mxu0 }
 0x169   : > { %6287 = vst [vmem:[#allocation10_spill] sm:$0xff] %v3971_v6  ;;  %v3973_v7 = vpop.f32.mrf.mxu1  ;;  %v476_v6 = vld [vmem:[%s3787_s12 + $0x2d8] sm:$0xff] }
 0x16a   : > { %6288 = vst [vmem:[#allocation11_spill] sm:$0xff] %v3973_v7  ;;  %v475_v7 = vld [vmem:[%s3787_s12 + $0x2d0] sm:$0xff] }
 0x16b   : > { %757 = vmatmul.f32.gmra.mxu0 %v465_v14 }
 0x16c   : > { %1074 = vmatmul.f32.gmra.mxu1 %v466_v15 }
 0x170   : > { %v3977_v22 = vpop.f32.mrf.mxu0 }
 0x171   : > { %v3979_v23 = vpop.f32.mrf.mxu1 }
 0x173   : > { %760 = vmatmul.f32.gmra.mxu0 %v467_v30  ;;  %v473_v30 = vld [vmem:[%s3787_s12 + $0x2c0] sm:$0xff] }
 0x174   : > { %1077 = vmatmul.f32.gmra.mxu1 %v468_v31  ;;  %v474_v31 = vld [vmem:[%s3787_s12 + $0x2c8] sm:$0xff] }
 0x178   : > { %v3983_v38 = vpop.f32.mrf.mxu0 }
 0x179   : > { %v3985_v39 = vpop.f32.mrf.mxu1 }
 0x17b   : > { %763 = vmatmul.f32.gmra.mxu0 %v469_v46 }
 0x17c   : > { %1080 = vmatmul.f32.gmra.mxu1 %v470_v47 }
 0x180   : > { %v3989_v54 = vpop.f32.mrf.mxu0 }
 0x181   : > { %v3991_v55 = vpop.f32.mrf.mxu1 }
 0x183   : > { %766 = vmatmul.f32.gmra.mxu0 %v471_v62 }
 0x184   : > { %1083 = vmatmul.f32.gmra.mxu1 %v472_v63 }
 0x188   : > { %v3995_v14 = vpop.f32.mrf.mxu0 }
 0x189   : > { %6289 = vst [vmem:[#allocation12_spill] sm:$0xff] %v3995_v14  ;;  %v3997_v15 = vpop.f32.mrf.mxu1 }
 0x18a   : > { %6290 = vst [vmem:[#allocation13_spill] sm:$0xff] %v3997_v15 }
 0x18b   : > { %769 = vmatmul.f32.gmra.mxu0 %v473_v30 }
 0x18c   : > { %1086 = vmatmul.f32.gmra.mxu1 %v474_v31 }
 0x190   : > { %v4001_v46 = vpop.f32.mrf.mxu0 }
 0x191   : > { %6291 = vst [vmem:[#allocation14_spill] sm:$0xff] %v4001_v46  ;;  %v4003_v47 = vpop.f32.mrf.mxu1 }
 0x192   : > { %6292 = vst [vmem:[#allocation15_spill] sm:$0xff] %v4003_v47  ;;  %v522_v47 = vld [vmem:[%s3787_s12 + $0x448] sm:$0xff] }
 0x193   : > { %772 = vmatmul.f32.gmra.mxu0 %v475_v7 }
 0x194   : > { %1089 = vmatmul.f32.gmra.mxu1 %v476_v6 }
 0x198   : > { %v4007_v62 = vpop.f32.mrf.mxu0 }
 0x199   : > { %6293 = vst [vmem:[#allocation16_spill] sm:$0xff] %v4007_v62  ;;  %v4009_v63 = vpop.f32.mrf.mxu1  ;;  %v521_v62 = vld [vmem:[%s3787_s12 + $0x440] sm:$0xff] }
 0x19a   : > { %6294 = vst [vmem:[#allocation17_spill] sm:$0xff] %v4009_v63 }
 0x19b   : > { %775 = vmatmul.f32.gmra.mxu0 %v477_v59 }
 0x19c   : > { %1092 = vmatmul.f32.gmra.mxu1 %v478_v58 }
 0x1a0   : > { %v4013_v30 = vpop.f32.mrf.mxu0 }
 0x1a1   : > { %6295 = vst [vmem:[#allocation18_spill] sm:$0xff] %v4013_v30  ;;  %v4015_v31 = vpop.f32.mrf.mxu1 }
 0x1a2   : > { %6296 = vst [vmem:[#allocation19_spill] sm:$0xff] %v4015_v31  ;;  %v517_v31 = vld [vmem:[%s3787_s12 + $0x420] sm:$0xff] }
 0x1a3   : > { %778 = vmatmul.f32.gmra.mxu0 %v479_v51 }
 0x1a4   : > { %1095 = vmatmul.f32.gmra.mxu1 %v480_v50 }
 0x1a8   : > { %v4019_v6 = vpop.f32.mrf.mxu0 }
 0x1a9   : > { %6297 = vst [vmem:[#allocation20_spill] sm:$0xff] %v4019_v6  ;;  %v4021_v7 = vpop.f32.mrf.mxu1  ;;  %v486_v6 = vld [vmem:[%s3787_s12 + $0x328] sm:$0xff] }
 0x1aa   : > { %6298 = vst [vmem:[#allocation21_spill] sm:$0xff] %v4021_v7  ;;  %v485_v7 = vld [vmem:[%s3787_s12 + $0x320] sm:$0xff] }
 0x1ab   : > { %781 = vmatmul.f32.gmra.mxu0 %v481_v43 }
 0x1ac   : > { %1098 = vmatmul.f32.gmra.mxu1 %v482_v42 }
 0x1b0   : > { %v4025_v58 = vpop.f32.mrf.mxu0 }
 0x1b1   : > { %6299 = vst [vmem:[#allocation22_spill] sm:$0xff] %v4025_v58  ;;  %v4027_v59 = vpop.f32.mrf.mxu1  ;;  %v488_v58 = vld [vmem:[%s3787_s12 + $0x338] sm:$0xff] }
 0x1b2   : > { %6300 = vst [vmem:[#allocation23_spill] sm:$0xff] %v4027_v59  ;;  %v487_v59 = vld [vmem:[%s3787_s12 + $0x330] sm:$0xff] }
 0x1b3   : > { %784 = vmatmul.f32.gmra.mxu0 %v483_v35 }
 0x1b4   : > { %1101 = vmatmul.f32.gmra.mxu1 %v484_v34 }
 0x1b8   : > { %v4031_v50 = vpop.f32.mrf.mxu0 }
 0x1b9   : > { %6301 = vst [vmem:[#allocation24_spill] sm:$0xff] %v4031_v50  ;;  %v4033_v51 = vpop.f32.mrf.mxu1  ;;  %v490_v50 = vld [vmem:[%s3787_s12 + $0x348] sm:$0xff] }
 0x1ba   : > { %6302 = vst [vmem:[#allocation25_spill] sm:$0xff] %v4033_v51  ;;  %v489_v51 = vld [vmem:[%s3787_s12 + $0x340] sm:$0xff] }
 0x1bb   : > { %787 = vmatmul.f32.gmra.mxu0 %v485_v7 }
 0x1bc   : > { %1104 = vmatmul.f32.gmra.mxu1 %v486_v6 }
 0x1c0   : > { %v4037_v42 = vpop.f32.mrf.mxu0 }
 0x1c1   : > { %6303 = vst [vmem:[#allocation26_spill] sm:$0xff] %v4037_v42  ;;  %v4039_v43 = vpop.f32.mrf.mxu1  ;;  %v492_v42 = vld [vmem:[%s3787_s12 + $0x358] sm:$0xff] }
 0x1c2   : > { %6304 = vst [vmem:[#allocation27_spill] sm:$0xff] %v4039_v43  ;;  %v491_v43 = vld [vmem:[%s3787_s12 + $0x350] sm:$0xff] }
 0x1c3   : > { %790 = vmatmul.f32.gmra.mxu0 %v487_v59 }
 0x1c4   : > { %1107 = vmatmul.f32.gmra.mxu1 %v488_v58 }
 0x1c8   : > { %v4043_v34 = vpop.f32.mrf.mxu0 }
 0x1c9   : > { %6305 = vst [vmem:[#allocation28_spill] sm:$0xff] %v4043_v34  ;;  %v4045_v35 = vpop.f32.mrf.mxu1  ;;  %v494_v34 = vld [vmem:[%s3787_s12 + $0x368] sm:$0xff] }
 0x1ca   : > { %6306 = vst [vmem:[#allocation29_spill] sm:$0xff] %v4045_v35  ;;  %v493_v35 = vld [vmem:[%s3787_s12 + $0x360] sm:$0xff] }
 0x1cb   : > { %793 = vmatmul.f32.gmra.mxu0 %v489_v51 }
 0x1cc   : > { %1110 = vmatmul.f32.gmra.mxu1 %v490_v50 }
 0x1d0   : > { %v4049_v6 = vpop.f32.mrf.mxu0 }
 0x1d1   : > { %6307 = vst [vmem:[#allocation30_spill] sm:$0xff] %v4049_v6  ;;  %v4051_v7 = vpop.f32.mrf.mxu1  ;;  %v496_v6 = vld [vmem:[%s3787_s12 + $0x378] sm:$0xff] }
 0x1d2   : > { %6308 = vst [vmem:[#allocation31_spill] sm:$0xff] %v4051_v7  ;;  %v495_v7 = vld [vmem:[%s3787_s12 + $0x370] sm:$0xff] }
 0x1d3   : > { %796 = vmatmul.f32.gmra.mxu0 %v491_v43 }
 0x1d4   : > { %1113 = vmatmul.f32.gmra.mxu1 %v492_v42 }
 0x1d8   : > { %v4055_v58 = vpop.f32.mrf.mxu0 }
 0x1d9   : > { %6309 = vst [vmem:[#allocation32_spill] sm:$0xff] %v4055_v58  ;;  %v4057_v59 = vpop.f32.mrf.mxu1  ;;  %v498_v58 = vld [vmem:[%s3787_s12 + $0x388] sm:$0xff] }
 0x1da   : > { %6310 = vst [vmem:[#allocation33_spill] sm:$0xff] %v4057_v59  ;;  %v497_v59 = vld [vmem:[%s3787_s12 + $0x380] sm:$0xff] }
 0x1db   : > { %799 = vmatmul.f32.gmra.mxu0 %v493_v35 }
 0x1dc   : > { %1116 = vmatmul.f32.gmra.mxu1 %v494_v34 }
 0x1e0   : > { %v4061_v50 = vpop.f32.mrf.mxu0 }
 0x1e1   : > { %6311 = vst [vmem:[#allocation34_spill] sm:$0xff] %v4061_v50  ;;  %v4063_v51 = vpop.f32.mrf.mxu1  ;;  %v500_v50 = vld [vmem:[%s3787_s12 + $0x398] sm:$0xff] }
 0x1e2   : > { %6312 = vst [vmem:[#allocation35_spill] sm:$0xff] %v4063_v51  ;;  %v499_v51 = vld [vmem:[%s3787_s12 + $0x390] sm:$0xff] }
 0x1e3   : > { %802 = vmatmul.f32.gmra.mxu0 %v495_v7 }
 0x1e4   : > { %1119 = vmatmul.f32.gmra.mxu1 %v496_v6 }
 0x1e8   : > { %v4067_v42 = vpop.f32.mrf.mxu0 }
 0x1e9   : > { %6313 = vst [vmem:[#allocation36_spill] sm:$0xff] %v4067_v42  ;;  %v4069_v43 = vpop.f32.mrf.mxu1  ;;  %v502_v42 = vld [vmem:[%s3787_s12 + $0x3a8] sm:$0xff] }
 0x1ea   : > { %6314 = vst [vmem:[#allocation37_spill] sm:$0xff] %v4069_v43  ;;  %v501_v43 = vld [vmem:[%s3787_s12 + $0x3a0] sm:$0xff] }
 0x1eb   : > { %805 = vmatmul.f32.gmra.mxu0 %v497_v59 }
 0x1ec   : > { %1122 = vmatmul.f32.gmra.mxu1 %v498_v58 }
 0x1f0   : > { %v4073_v34 = vpop.f32.mrf.mxu0 }
 0x1f1   : > { %6315 = vst [vmem:[#allocation38_spill] sm:$0xff] %v4073_v34  ;;  %v4075_v35 = vpop.f32.mrf.mxu1  ;;  %v504_v34 = vld [vmem:[%s3787_s12 + $0x3b8] sm:$0xff] }
 0x1f2   : > { %6316 = vst [vmem:[#allocation39_spill] sm:$0xff] %v4075_v35  ;;  %v503_v35 = vld [vmem:[%s3787_s12 + $0x3b0] sm:$0xff] }
 0x1f3   : > { %808 = vmatmul.f32.gmra.mxu0 %v499_v51 }
 0x1f4   : > { %1125 = vmatmul.f32.gmra.mxu1 %v500_v50 }
 0x1f8   : > { %v4079_v6 = vpop.f32.mrf.mxu0 }
 0x1f9   : > { %6317 = vst [vmem:[#allocation40_spill] sm:$0xff] %v4079_v6  ;;  %v4081_v7 = vpop.f32.mrf.mxu1  ;;  %v506_v6 = vld [vmem:[%s3787_s12 + $0x3c8] sm:$0xff] }
 0x1fa   : > { %6318 = vst [vmem:[#allocation41_spill] sm:$0xff] %v4081_v7  ;;  %v505_v7 = vld [vmem:[%s3787_s12 + $0x3c0] sm:$0xff] }
 0x1fb   : > { %811 = vmatmul.f32.gmra.mxu0 %v501_v43 }
 0x1fc   : > { %1128 = vmatmul.f32.gmra.mxu1 %v502_v42 }
 0x200   : > { %v4085_v58 = vpop.f32.mrf.mxu0 }
 0x201   : > { %6319 = vst [vmem:[#allocation42_spill] sm:$0xff] %v4085_v58  ;;  %v4087_v59 = vpop.f32.mrf.mxu1  ;;  %v508_v58 = vld [vmem:[%s3787_s12 + $0x3d8] sm:$0xff] }
 0x202   : > { %6320 = vst [vmem:[#allocation43_spill] sm:$0xff] %v4087_v59  ;;  %v507_v59 = vld [vmem:[%s3787_s12 + $0x3d0] sm:$0xff] }
 0x203   : > { %814 = vmatmul.f32.gmra.mxu0 %v503_v35 }
 0x204   : > { %1131 = vmatmul.f32.gmra.mxu1 %v504_v34 }
 0x208   : > { %v4091_v50 = vpop.f32.mrf.mxu0 }
 0x209   : > { %6321 = vst [vmem:[#allocation44_spill] sm:$0xff] %v4091_v50  ;;  %v4093_v51 = vpop.f32.mrf.mxu1  ;;  %v510_v50 = vld [vmem:[%s3787_s12 + $0x3e8] sm:$0xff] }
 0x20a   : > { %6322 = vst [vmem:[#allocation45_spill] sm:$0xff] %v4093_v51  ;;  %v509_v51 = vld [vmem:[%s3787_s12 + $0x3e0] sm:$0xff] }
 0x20b   : > { %817 = vmatmul.f32.gmra.mxu0 %v505_v7 }
 0x20c   : > { %1134 = vmatmul.f32.gmra.mxu1 %v506_v6 }
 0x210   : > { %v4097_v42 = vpop.f32.mrf.mxu0 }
 0x211   : > { %6323 = vst [vmem:[#allocation46_spill] sm:$0xff] %v4097_v42  ;;  %v4099_v43 = vpop.f32.mrf.mxu1  ;;  %v512_v42 = vld [vmem:[%s3787_s12 + $0x3f8] sm:$0xff] }
 0x212   : > { %6324 = vst [vmem:[#allocation47_spill] sm:$0xff] %v4099_v43  ;;  %v511_v43 = vld [vmem:[%s3787_s12 + $0x3f0] sm:$0xff] }
 0x213   : > { %820 = vmatmul.f32.gmra.mxu0 %v507_v59 }
 0x214   : > { %1137 = vmatmul.f32.gmra.mxu1 %v508_v58 }
 0x218   : > { %v4103_v34 = vpop.f32.mrf.mxu0 }
 0x219   : > { %6325 = vst [vmem:[#allocation48_spill] sm:$0xff] %v4103_v34  ;;  %v4105_v35 = vpop.f32.mrf.mxu1  ;;  %v514_v34 = vld [vmem:[%s3787_s12 + $0x408] sm:$0xff] }
 0x21a   : > { %6326 = vst [vmem:[#allocation49_spill] sm:$0xff] %v4105_v35  ;;  %v513_v35 = vld [vmem:[%s3787_s12 + $0x400] sm:$0xff] }
 0x21b   : > { %823 = vmatmul.f32.gmra.mxu0 %v509_v51 }
 0x21c   : > { %1140 = vmatmul.f32.gmra.mxu1 %v510_v50 }
 0x220   : > { %v4109_v6 = vpop.f32.mrf.mxu0 }
 0x221   : > { %6327 = vst [vmem:[#allocation50_spill] sm:$0xff] %v4109_v6  ;;  %v4111_v7 = vpop.f32.mrf.mxu1  ;;  %v516_v6 = vld [vmem:[%s3787_s12 + $0x418] sm:$0xff] }
 0x222   : > { %6328 = vst [vmem:[#allocation51_spill] sm:$0xff] %v4111_v7  ;;  %v515_v7 = vld [vmem:[%s3787_s12 + $0x410] sm:$0xff] }
 0x223   : > { %826 = vmatmul.f32.gmra.mxu0 %v511_v43 }
 0x224   : > { %1143 = vmatmul.f32.gmra.mxu1 %v512_v42 }
 0x228   : > { %v4115_v58 = vpop.f32.mrf.mxu0 }
 0x229   : > { %6329 = vst [vmem:[#allocation52_spill] sm:$0xff] %v4115_v58  ;;  %v4117_v59 = vpop.f32.mrf.mxu1  ;;  %v518_v58 = vld [vmem:[%s3787_s12 + $0x428] sm:$0xff] }
 0x22a   : > { %6330 = vst [vmem:[#allocation53_spill] sm:$0xff] %v4117_v59  ;;  %v520_v59 = vld [vmem:[%s3787_s12 + $0x438] sm:$0xff] }
 0x22b   : > { %829 = vmatmul.f32.gmra.mxu0 %v513_v35 }
 0x22c   : > { %1146 = vmatmul.f32.gmra.mxu1 %v514_v34  ;;  %v4132_v34 = vld [vmem:[%s6261_s2] ss:$0 sm:$0xff] }
 0x230   : > { %v4121_v50 = vpop.f32.mrf.mxu0 }
 0x231   : > { %6331 = vst [vmem:[#allocation54_spill] sm:$0xff] %v4121_v50  ;;  %v4123_v51 = vpop.f32.mrf.mxu1 }
 0x232   : > { %6332 = vst [vmem:[#allocation55_spill] sm:$0xff] %v4123_v51  ;;  %v519_v51 = vld [vmem:[%s3787_s12 + $0x430] sm:$0xff] }
 0x233   : > { %832 = vmatmul.f32.gmra.mxu0 %v515_v7 }
 0x234   : > { %1149 = vmatmul.f32.gmra.mxu1 %v516_v6 }
 0x238   : > { %v788_v42 = vpop.f32.mrf.mxu0 }
 0x239   : > { %v1105_v43 = vpop.f32.mrf.mxu1  ;;  %v789_v63 = vadd.f32 %v4132_v34, %v788_v42 }
 0x23b   : > { %835 = vmatmul.f32.gmra.mxu0 %v517_v31  ;;  %v1106_v46 = vadd.f32 %v1105_v43, %v789_v63 }
 0x23c   : > { %1152 = vmatmul.f32.gmra.mxu1 %v518_v58 }
 0x240   : > { %v791_v35 = vpop.f32.mrf.mxu0 }
 0x241   : > { %v1108_v50 = vpop.f32.mrf.mxu1  ;;  %v792_v7 = vadd.f32 %v4132_v34, %v791_v35  ;;  %v523_v35 = vld [vmem:[%s3787_s12 + $0x450] sm:$0xff] }
 0x243   : > { %v1109_v6 = vadd.f32 %v1108_v50, %v792_v7  ;;  %838 = vmatmul.f32.gmra.mxu0 %v519_v51  ;;  %v1305_v50 = vmax.f32 %v1106_v46, 0.0  ;;  %v524_v7 = vld [vmem:[%s3787_s12 + $0x458] sm:$0xff] }
 0x244   : > { %1155 = vmatmul.f32.gmra.mxu1 %v520_v59 }
 0x245   : > { %v1306_v31 = vmax.f32 %v1109_v6, 0.0 }
 0x247   : > { %1382 = vrot.lane.b32.xlu0 %v1306_v31, %s3617_s21 }
 0x248   : > { %v794_v58 = vpop.f32.mrf.mxu0 }
 0x249   : > { %v1111_v30 = vpop.f32.mrf.mxu1  ;;  %v795_v15 = vadd.f32 %v4132_v34, %v794_v58 }
 0x24b   : > { %v1112_v14 = vadd.f32 %v1111_v30, %v795_v15  ;;  %841 = vmatmul.f32.gmra.mxu0 %v521_v62  ;;  %v526_v62 = vld [vmem:[%s3787_s12 + $0x468] sm:$0xff] }
 0x24c   : > { %1158 = vmatmul.f32.gmra.mxu1 %v522_v47  ;;  %v525_v47 = vld [vmem:[%s3787_s12 + $0x460] sm:$0xff] }
 0x24d   : > { %v1307_v59 = vmax.f32 %v1112_v14, 0.0 }
 0x24f   : > { %1384 = vrot.lane.b32.xlu1 %v1307_v59, %s3617_s21  ;;  %1380 = vrot.lane.b32.xlu0 %v1305_v50, %s3617_s21  ;;  %v527_v59 = vld [vmem:[%s3787_s12 + $0x470] sm:$0xff] }
 0x250   : > { %v797_v51 = vpop.f32.mrf.mxu0 }
 0x251   : > { %v1114_v42 = vpop.f32.mrf.mxu1  ;;  %v798_v6 = vadd.f32 %v4132_v34, %v797_v51  ;;  %v528_v51 = vld [vmem:[%s3787_s12 + $0x478] sm:$0xff] }
 0x253   : > { %v1115_v63 = vadd.f32 %v1114_v42, %v798_v6  ;;  %844 = vmatmul.f32.gmra.mxu0 %v523_v35 }
 0x254   : > { %1161 = vmatmul.f32.gmra.mxu1 %v524_v7 }
 0x255   : > { %v1308_v15 = vmax.f32 %v1115_v63, 0.0 }
 0x257   : > { %1386 = vrot.lane.b32.xlu1 %v1308_v15, %s3617_s21  ;;  %v529_v15 = vld [vmem:[%s3787_s12 + $0x480] sm:$0xff] }
 0x258   : > { %v800_v14 = vpop.f32.mrf.mxu0 }
 0x259   : > { %v1117_v46 = vpop.f32.mrf.mxu1  ;;  %v801_v30 = vadd.f32 %v4132_v34, %v800_v14  ;;  %v530_v14 = vld [vmem:[%s3787_s12 + $0x488] sm:$0xff] }
 0x25b   : > { %v1118_v43 = vadd.f32 %v1117_v46, %v801_v30  ;;  %847 = vmatmul.f32.gmra.mxu0 %v525_v47 }
 0x25c   : > { %1164 = vmatmul.f32.gmra.mxu1 %v526_v62 }
 0x25d   : > { %v1309_v31 = vmax.f32 %v1118_v43, 0.0 }
 0x25f   : > { %1388 = vrot.lane.b32.xlu2 %v1309_v31, %s3617_s21  ;;  %v531_v31 = vld [vmem:[%s3787_s12 + $0x490] sm:$0xff] }
 0x260   : > { %v803_v58 = vpop.f32.mrf.mxu0 }
 0x261   : > { %v1120_v50 = vpop.f32.mrf.mxu1  ;;  %v804_v42 = vadd.f32 %v4132_v34, %v803_v58  ;;  %v532_v58 = vld [vmem:[%s3787_s12 + $0x498] sm:$0xff] }
 0x263   : > { %v1121_v35 = vadd.f32 %v1120_v50, %v804_v42  ;;  %850 = vmatmul.f32.gmra.mxu0 %v527_v59 }
 0x264   : > { %1167 = vmatmul.f32.gmra.mxu1 %v528_v51 }
 0x265   : > { %v1310_v7 = vmax.f32 %v1121_v35, 0.0 }
 0x267   : > { %1390 = vrot.lane.b32.xlu0 %v1310_v7, %s3617_s21  ;;  %v533_v7 = vld [vmem:[%s3787_s12 + $0x4a0] sm:$0xff] }
 0x268   : > { %v806_v6 = vpop.f32.mrf.mxu0 }
 0x269   : > { %v1123_v63 = vpop.f32.mrf.mxu1  ;;  %v807_v46 = vadd.f32 %v4132_v34, %v806_v6  ;;  %v534_v6 = vld [vmem:[%s3787_s12 + $0x4a8] sm:$0xff] }
 0x26b   : > { %v1124_v47 = vadd.f32 %v1123_v63, %v807_v46  ;;  %853 = vmatmul.f32.gmra.mxu0 %v529_v15 }
 0x26c   : > { %1170 = vmatmul.f32.gmra.mxu1 %v530_v14 }
 0x26d   : > { %v1311_v62 = vmax.f32 %v1124_v47, 0.0 }
 0x26f   : > { %1392 = vrot.lane.b32.xlu2 %v1311_v62, %s3617_s21  ;;  %v535_v62 = vld [vmem:[%s3787_s12 + $0x4b0] sm:$0xff] }
 0x270   : > { %v809_v30 = vpop.f32.mrf.mxu0 }
 0x271   : > { %v1126_v43 = vpop.f32.mrf.mxu1  ;;  %v810_v50 = vadd.f32 %v4132_v34, %v809_v30  ;;  %v536_v30 = vld [vmem:[%s3787_s12 + $0x4b8] sm:$0xff] }
 0x273   : > { %v1127_v59 = vadd.f32 %v1126_v43, %v810_v50  ;;  %856 = vmatmul.f32.gmra.mxu0 %v531_v31 }
 0x274   : > { %1173 = vmatmul.f32.gmra.mxu1 %v532_v58 }
 0x275   : > { %v1312_v51 = vmax.f32 %v1127_v59, 0.0 }
 0x277   : > { %1394 = vrot.lane.b32.xlu1 %v1312_v51, %s3617_s21  ;;  %v537_v51 = vld [vmem:[%s3787_s12 + $0x4c0] sm:$0xff] }
 0x278   : > { %v812_v42 = vpop.f32.mrf.mxu0 }
 0x279   : > { %v1129_v35 = vpop.f32.mrf.mxu1  ;;  %v813_v63 = vadd.f32 %v4132_v34, %v812_v42  ;;  %v538_v42 = vld [vmem:[%s3787_s12 + $0x4c8] sm:$0xff] }
 0x27b   : > { %v1130_v15 = vadd.f32 %v1129_v35, %v813_v63  ;;  %859 = vmatmul.f32.gmra.mxu0 %v533_v7  ;;  %v581_v7 = vld [vmem:[%s3787_s12 + $0x620] sm:$0xff]  ;;  %v3332_v63 = vld [vmem:[%s6262_s3 + $0x78] sm:$0xff] }
 0x27c   : > { %1176 = vmatmul.f32.gmra.mxu1 %v534_v6  ;;  %931 = vmatmul.f32.vlgmr.msra.gmra.mxu2 %v581_v7  ;;  %v3327_v7 = vld [vmem:[%s6262_s3 + $0x50] sm:$0xff] }
 0x27d   : > { %v1313_v14 = vmax.f32 %v1130_v15, 0.0  ;;  %1680 = vmatpush.msrb.mxu2 %v3332_v63  ;;  %v3326_v63 = vld [vmem:[%s6262_s3 + $0x48] sm:$0xff] }
 0x27f   : > { %1396 = vrot.lane.b32.xlu2 %v1313_v14, %s3617_s21  ;;  %v3331_v14 = vld [vmem:[%s6262_s3 + $0x70] sm:$0xff] }
 0x280   : > { %v815_v46 = vpop.f32.mrf.mxu0  ;;  %1681 = vmatpush.msrb.mxu2 %v3331_v14 }
 0x281   : > { %v1132_v47 = vpop.f32.mrf.mxu1  ;;  %v816_v43 = vadd.f32 %v4132_v34, %v815_v46  ;;  %v3330_v46 = vld [vmem:[%s6262_s3 + $0x68] sm:$0xff] }
 0x282   : > { %1682 = vmatpush.msrb.mxu2 %v3330_v46 }
 0x283   : > { %v1133_v31 = vadd.f32 %v1132_v47, %v816_v43  ;;  %862 = vmatmul.f32.gmra.mxu0 %v535_v62  ;;  %v540_v43 = vld [vmem:[%s3787_s12 + $0x4d8] sm:$0xff] }
 0x284   : > { %1179 = vmatmul.f32.gmra.mxu1 %v536_v30  ;;  %v539_v30 = vld [vmem:[%s3787_s12 + $0x4d0] sm:$0xff] }
 0x285   : > { %v1314_v58 = vmax.f32 %v1133_v31, 0.0 }
 0x287   : > { %1398 = vrot.lane.b32.xlu0 %v1314_v58, %s3617_s21  ;;  %v3329_v58 = vld [vmem:[%s6262_s3 + $0x60] sm:$0xff] }
 0x288   : > { %v818_v50 = vpop.f32.mrf.mxu0  ;;  %1683 = vmatpush.msrb.mxu2 %v3329_v58 }
 0x289   : > { %v1135_v59 = vpop.f32.mrf.mxu1  ;;  %v819_v35 = vadd.f32 %v4132_v34, %v818_v50  ;;  %v583_v50 = vld [vmem:[%s3787_s12 + $0x630] sm:$0xff] }
 0x28a   : > { %934 = vmatmul.f32.gmra.mxu2 %v583_v50  ;;  %v1609_v50 = vld [vmem:[%s6262_s3 + $0x18] sm:$0xff] }
 0x28b   : > { %v1136_v6 = vadd.f32 %v1135_v59, %v819_v35  ;;  %865 = vmatmul.f32.gmra.mxu0 %v537_v51  ;;  %v3328_v51 = vld [vmem:[%s6262_s3 + $0x58] sm:$0xff] }
 0x28c   : > { %1182 = vmatmul.f32.gmra.mxu1 %v538_v42  ;;  %v1613_v42 = vld [vmem:[%s6262_s3 + $0x38] sm:$0xff]  ;;  %1684 = vmatpush.msrb.mxu2 %v3328_v51  ;;  %v1608_v51 = vld [vmem:[%s6262_s3 + $0x10] sm:$0xff] }
 0x28d   : > { %v1315_v15 = vmax.f32 %v1136_v6, 0.0  ;;  %1757 = vmatpush.msra.mxu3 %v1613_v42  ;;  %v1612_v6 = vld [vmem:[%s6262_s3 + $0x30] sm:$0xff] }
 0x28e   : > { %1685 = vmatpush.msrb.mxu2 %v3327_v7  ;;  %v543_v7 = vld [vmem:[%s3787_s12 + $0x4f0] sm:$0xff] }
 0x28f   : > { %1400 = vrot.lane.b32.xlu2 %v1315_v15, %s3617_s21  ;;  %1758 = vmatpush.msra.mxu3 %v1612_v6  ;;  %v1611_v15 = vld [vmem:[%s6262_s3 + $0x28] sm:$0xff]  ;;  %v544_v6 = vld [vmem:[%s3787_s12 + $0x4f8] sm:$0xff] }
 0x290   : > { %v821_v47 = vpop.f32.mrf.mxu0  ;;  %1686 = vmatpush.msrb.mxu2 %v3326_v63  ;;  %v1607_v63 = vld [vmem:[%s6262_s3 + $0x8] sm:$0xff] }
 0x291   : > { %v1138_v62 = vpop.f32.mrf.mxu1  ;;  %v822_v31 = vadd.f32 %v4132_v34, %v821_v47  ;;  %v541_v47 = vld [vmem:[%s3787_s12 + $0x4e0] sm:$0xff]  ;;  %1759 = vmatpush.msra.mxu3 %v1611_v15 }
 0x293   : > { %v1139_v59 = vadd.f32 %v1138_v62, %v822_v31  ;;  %868 = vmatmul.f32.gmra.mxu0 %v539_v30  ;;  %v542_v62 = vld [vmem:[%s3787_s12 + $0x4e8] sm:$0xff]  ;;  %v1610_v31 = vld [vmem:[%s6262_s3 + $0x20] sm:$0xff] }
 0x294   : > { %1185 = vmatmul.f32.gmra.mxu1 %v540_v43  ;;  %v3325_v43 = vld [vmem:[%s6262_s3 + $0x40] sm:$0xff]  ;;  %1760 = vmatpush.msra.mxu3 %v1610_v31  ;;  %v546_v31 = vld [vmem:[%s3787_s12 + $0x508] sm:$0xff] }
 0x295   : > { %v1316_v35 = vmax.f32 %v1139_v59, 0.0  ;;  %1687 = vmatpush.msrb.mxu2 %v3325_v43  ;;  %v545_v43 = vld [vmem:[%s3787_s12 + $0x500] sm:$0xff] }
 0x296   : > { %1761 = vmatpush.msra.mxu3 %v1609_v50 }
 0x297   : > { %1402 = vrot.lane.b32.xlu1 %v1316_v35, %s3617_s21 }
 0x298   : > { %v824_v14 = vpop.f32.mrf.mxu0  ;;  %1762 = vmatpush.msra.mxu3 %v1608_v51  ;;  %v642_v51 = vadd.f32 %v4132_v34, %v3833_v4  ;;  %v639_v4 = vadd.f32 %v4132_v34, %v3827_v0 }
 0x299   : > { %v1141_v46 = vpop.f32.mrf.mxu1  ;;  %v825_v30 = vadd.f32 %v4132_v34, %v824_v14  ;;  %v1606_v14 = vld [vmem:[%s6262_s3] sm:$0xff] }
 0x29a   : > { %1763 = vmatpush.msra.mxu3 %v1607_v63  ;;  %v956_v0 = vadd.f32 %v3829_v1, %v639_v4 }
 0x29b   : > { %v1142_v58 = vadd.f32 %v1141_v46, %v825_v30  ;;  %871 = vmatmul.f32.gmra.mxu0 %v541_v47 }
 0x29c   : > { %1188 = vmatmul.f32.gmra.mxu1 %v542_v62  ;;  %1764 = vmatpush.msra.mxu3 %v1606_v14  ;;  %v959_v14 = vadd.f32 %v3835_v5, %v642_v51 }
 0x29d   : > { %v1317_v59 = vmax.f32 %v1142_v58, 0.0 }
 0x29f   : > { %1404 = vrot.lane.b32.xlu0 %v1317_v59, %s3617_s21 }
 0x2a0   : > { %v827_v42 = vpop.f32.mrf.mxu0 }
 0x2a1   : > { %v1144_v35 = vpop.f32.mrf.mxu1  ;;  %v828_v15 = vadd.f32 %v4132_v34, %v827_v42 }
 0x2a3   : > { %v1145_v46 = vadd.f32 %v1144_v35, %v828_v15  ;;  %874 = vmatmul.f32.gmra.mxu0 %v543_v7  ;;  %v547_v7 = vld [vmem:[%s3787_s12 + $0x510] sm:$0xff] }
 0x2a4   : > { %1191 = vmatmul.f32.gmra.mxu1 %v544_v6  ;;  %v548_v6 = vld [vmem:[%s3787_s12 + $0x518] sm:$0xff] }
 0x2a5   : > { %v1318_v47 = vmax.f32 %v1145_v46, 0.0 }
 0x2a7   : > { %1406 = vrot.lane.b32.xlu1 %v1318_v47, %s3617_s21  ;;  %v1256_v47 = vmax.f32 %v959_v14, 0.0  ;;  %v551_v14 = vld [vmem:[%s3787_s12 + $0x530] sm:$0xff] }
 0x2a8   : > { %v830_v62 = vpop.f32.mrf.mxu0 }
 0x2a9   : > { %v1147_v30 = vpop.f32.mrf.mxu1  ;;  %v831_v58 = vadd.f32 %v4132_v34, %v830_v62  ;;  %v645_v62 = vadd.f32 %v4132_v34, %v3839_v8 }
 0x2ab   : > { %v1148_v50 = vadd.f32 %v1147_v30, %v831_v58  ;;  %877 = vmatmul.f32.gmra.mxu0 %v545_v43  ;;  %v550_v58 = vld [vmem:[%s3787_s12 + $0x528] sm:$0xff] }
 0x2ac   : > { %1194 = vmatmul.f32.gmra.mxu1 %v546_v31  ;;  %v549_v31 = vld [vmem:[%s3787_s12 + $0x520] sm:$0xff] }
 0x2ad   : > { %v1319_v59 = vmax.f32 %v1148_v50, 0.0 }
 0x2af   : > { %1408 = vrot.lane.b32.xlu2 %v1319_v59, %s3617_s21 }
 0x2b0   : > { %v833_v42 = vpop.f32.mrf.mxu0 }
 0x2b1   : > { %v1150_v35 = vpop.f32.mrf.mxu1  ;;  %v834_v63 = vadd.f32 %v4132_v34, %v833_v42  ;;  %v962_v42 = vadd.f32 %v3841_v9, %v645_v62 }
 0x2b3   : > { %v1151_v15 = vadd.f32 %v1150_v35, %v834_v63  ;;  %880 = vmatmul.f32.gmra.mxu0 %v547_v7  ;;  %v1255_v35 = vmax.f32 %v956_v0, 0.0  ;;  %v1257_v7 = vmax.f32 %v962_v42, 0.0  ;;  %v651_v0 = vadd.f32 %v4132_v34, %v3851_v16 }
 0x2b4   : > { %1197 = vmatmul.f32.gmra.mxu1 %v548_v6  ;;  %v648_v6 = vadd.f32 %v4132_v34, %v3845_v12 }
 0x2b5   : > { %v1320_v46 = vmax.f32 %v1151_v15, 0.0 }
 0x2b7   : > { %1410 = vrot.lane.b32.xlu1 %v1320_v46, %s3617_s21  ;;  %v552_v46 = vld [vmem:[%s3787_s12 + $0x538] sm:$0xff] }
 0x2b8   : > { %v836_v30 = vpop.f32.mrf.mxu0 }
 0x2b9   : > { %v1153_v43 = vpop.f32.mrf.mxu1  ;;  %v837_v50 = vadd.f32 %v4132_v34, %v836_v30  ;;  %v1383_v59 = vpop.permute.xlu0 %1382 }
 0x2ba   : > { %v1457_v5 = vsel %vm1455_vm0, %v1256_v47, %v1383_v59  ;;  %v553_v59 = vld [vmem:[%s3787_s12 + $0x540] sm:$0xff] }
 0x2bb   : > { %v1154_v51 = vadd.f32 %v1153_v43, %v837_v50  ;;  %883 = vmatmul.f32.gmra.mxu0 %v549_v31  ;;  %3333 = vmatmul.msk.f32.vlgmr.msrb.gmra.mxu2 %vm1623_vm1, %v1457_v5  ;;  %v965_v43 = vadd.f32 %v3847_v13, %v648_v6 }
 0x2bc   : > { %1200 = vmatmul.f32.gmra.mxu1 %v550_v58 }
 0x2bd   : > { %v1321_v8 = vmax.f32 %v1154_v51, 0.0  ;;  %v1258_v31 = vmax.f32 %v965_v43, 0.0  ;;  %v554_v51 = vld [vmem:[%s3787_s12 + $0x548] sm:$0xff] }
 0x2bf   : > { %1412 = vrot.lane.b32.xlu0 %v1321_v8, %s3617_s21 }
 0x2c0   : > { %v839_v63 = vpop.f32.mrf.mxu0 }
 0x2c1   : > { %v1156_v15 = vpop.f32.mrf.mxu1  ;;  %v840_v47 = vadd.f32 %v4132_v34, %v839_v63  ;;  %v1385_v1 = vpop.permute.xlu1 %1384 }
 0x2c2   : > { %v1381_v9 = vpop.permute.xlu0 %1380  ;;  %v1458_v4 = vsel %vm1455_vm0, %v1257_v7, %v1385_v1  ;;  %v968_v7 = vadd.f32 %v3853_v17, %v651_v0  ;;  %v1389_v63 = vpop.permute.xlu2 %1388  ;;  %v657_v1 = vadd.f32 %v4132_v34, %v3863_v24  ;;  %v660_v0 = vadd.f32 %v4132_v34, %v3869_v28 }
 0x2c3   : > { %v1456_v62 = vsel %vm1455_vm0, %v1255_v35, %v1381_v9  ;;  %v1157_v30 = vadd.f32 %v1156_v15, %v840_v47  ;;  %886 = vmatmul.f32.gmra.mxu0 %v551_v14  ;;  %3334 = vmatmul.msk.f32.gmra.mxu2 %vm1623_vm1, %v1458_v4  ;;  %v555_v14 = vld [vmem:[%s3787_s12 + $0x550] sm:$0xff] }
 0x2c4   : > { %1203 = vmatmul.f32.gmra.mxu1 %v552_v46  ;;  %3349 = vmatmul.msk.f32.vlgmr.msra.gmra.mxu3 %vm1623_vm1, %v1456_v62  ;;  %v556_v46 = vld [vmem:[%s3787_s12 + $0x558] sm:$0xff]  ;;  %v1259_v47 = vmax.f32 %v968_v7, 0.0 }
 0x2c5   : > { %v1322_v12 = vmax.f32 %v1157_v30, 0.0 }
 0x2c6   : > { %v1460_v17 = vsel %vm1455_vm0, %v1259_v47, %v1389_v63 }
 0x2c7   : > { %1414 = vrot.lane.b32.xlu2 %v1322_v12, %s3617_s21 }
 0x2c8   : > { %v842_v58 = vpop.f32.mrf.mxu0 }
 0x2c9   : > { %v1159_v50 = vpop.f32.mrf.mxu1  ;;  %v843_v42 = vadd.f32 %v4132_v34, %v842_v58  ;;  %v1387_v13 = vpop.permute.xlu1 %1386  ;;  %v558_v58 = vld [vmem:[%s3787_s12 + $0x568] sm:$0xff] }
 0x2ca   : > { %v1459_v8 = vsel %vm1455_vm0, %v1258_v31, %v1387_v13  ;;  %v1393_v43 = vpop.permute.xlu2 %1392  ;;  %v557_v31 = vld [vmem:[%s3787_s12 + $0x560] sm:$0xff]  ;;  %v559_v13 = vld [vmem:[%s3787_s12 + $0x570] sm:$0xff] }
 0x2cb   : > { %v1160_v35 = vadd.f32 %v1159_v50, %v843_v42  ;;  %889 = vmatmul.f32.gmra.mxu0 %v553_v59  ;;  %3335 = vmatmul.msk.f32.gmra.mxu2 %vm1623_vm1, %v1459_v8  ;;  %v654_v50 = vadd.f32 %v4132_v34, %v3857_v20 }
 0x2cc   : > { %1206 = vmatmul.f32.gmra.mxu1 %v554_v51  ;;  %3350 = vmatmul.msk.f32.gmra.mxu3 %vm1623_vm1, %v1457_v5  ;;  %v974_v5 = vadd.f32 %v3865_v25, %v657_v1 }
 0x2cd   : > { %v1323_v6 = vmax.f32 %v1160_v35, 0.0  ;;  %v971_v25 = vadd.f32 %v3859_v21, %v654_v50  ;;  %v560_v35 = vld [vmem:[%s3787_s12 + $0x578] sm:$0xff]  ;;  %v977_v21 = vadd.f32 %v3871_v29, %v660_v0  ;;  %v565_v50 = vld [vmem:[%s3787_s12 + $0x5a0] sm:$0xff] }
 0x2ce   : > { %v1261_v59 = vmax.f32 %v974_v5, 0.0  ;;  %v564_v5 = vld [vmem:[%s3787_s12 + $0x598] sm:$0xff] }
 0x2cf   : > { %1416 = vrot.lane.b32.xlu0 %v1323_v6, %s3617_s21  ;;  %v1260_v7 = vmax.f32 %v971_v25, 0.0  ;;  %v669_v25 = vadd.f32 %v4132_v34, %v3887_v40  ;;  %v672_v40 = vadd.f32 %v4132_v34, %v3893_v44 }
 0x2d0   : > { %v845_v16 = vpop.f32.mrf.mxu0 }
 0x2d1   : > { %v1162_v15 = vpop.f32.mrf.mxu1  ;;  %v846_v9 = vadd.f32 %v4132_v34, %v845_v16  ;;  %v561_v16 = vld [vmem:[%s3787_s12 + $0x580] sm:$0xff] }
 0x2d3   : > { %v1163_v62 = vadd.f32 %v1162_v15, %v846_v9  ;;  %892 = vmatmul.f32.gmra.mxu0 %v555_v14  ;;  %3336 = vmatmul.msk.f32.gmra.mxu2 %vm1623_vm1, %v1460_v17  ;;  %v562_v15 = vld [vmem:[%s3787_s12 + $0x588] sm:$0xff]  ;;  %v663_v14 = vadd.f32 %v4132_v34, %v3875_v32  ;;  %v666_v9 = vadd.f32 %v4132_v34, %v3881_v36  ;;  %v563_v17 = vld [vmem:[%s3787_s12 + $0x590] sm:$0xff] }
 0x2d4   : > { %1209 = vmatmul.f32.gmra.mxu1 %v556_v46  ;;  %3351 = vmatmul.msk.f32.gmra.mxu3 %vm1623_vm1, %v1458_v4  ;;  %v4301_v4 = vsel %vm1455_vm0, %v1261_v59, %v1393_v43  ;;  %v566_v59 = vld [vmem:[%s3787_s12 + $0x5a8] sm:$0xff] }
 0x2d5   : > { %v1324_v30 = vmax.f32 %v1163_v62, 0.0  ;;  %v980_v29 = vadd.f32 %v3877_v33, %v663_v14  ;;  %v983_v33 = vadd.f32 %v3883_v37, %v666_v9 }
 0x2d7   : > { %1418 = vrot.lane.b32.xlu1 %v1324_v30, %s3617_s21  ;;  %v1263_v30 = vmax.f32 %v980_v29, 0.0  ;;  %v1264_v36 = vmax.f32 %v983_v33, 0.0  ;;  %v569_v33 = vld [vmem:[%s3787_s12 + $0x5c0] sm:$0xff] }
 0x2d8   : > { %v4292_v12 = vpop.f32.mrf.mxu0 }
 0x2d9   : > { %v4294_v24 = vpop.f32.mrf.mxu1  ;;  %v1391_v51 = vpop.permute.xlu0 %1390 }
 0x2da   : > { %v4316_v6 = vsel %vm1455_vm0, %v1260_v7, %v1391_v51  ;;  %v1397_v1 = vpop.permute.xlu2 %1396 }
 0x2db   : > { %895 = vmatmul.f32.gmra.mxu0 %v557_v31  ;;  %3337 = vmatmul.msk.f32.gmra.mxu2 %vm1623_vm1, %v4301_v4  ;;  %v4346_v43 = vsel %vm1455_vm0, %v1263_v30, %v1397_v1 }
 0x2dc   : > { %1212 = vmatmul.f32.gmra.mxu1 %v558_v58  ;;  %3352 = vmatmul.msk.f32.gmra.mxu3 %vm1623_vm1, %v1459_v8  ;;  %v1262_v8 = vmax.f32 %v977_v21, 0.0 }
 0x2e0   : > { %v4309_v20 = vpop.f32.mrf.mxu0 }
 0x2e1   : > { %v4311_v42 = vpop.f32.mrf.mxu1 }
 0x2e3   : > { %898 = vmatmul.f32.gmra.mxu0 %v559_v13 }
 0x2e4   : > { %1215 = vmatmul.f32.gmra.mxu1 %v560_v35  ;;  %3353 = vmatmul.msk.f32.gmra.mxu3 %vm1623_vm1, %v4316_v6  ;;  %v986_v35 = vadd.f32 %v3889_v41, %v669_v25  ;;  %v989_v41 = vadd.f32 %v3895_v45, %v672_v40  ;;  %v572_v40 = vld [vmem:[%s3787_s12 + $0x5d8] sm:$0xff] }
 0x2e6   : > { %v1265_v14 = vmax.f32 %v986_v35, 0.0  ;;  %v1266_v9 = vmax.f32 %v989_v41, 0.0 }
 0x2e8   : > { %v4321_v63 = vpop.f32.mrf.mxu0 }
 0x2e9   : > { %v4323_v28 = vpop.f32.mrf.mxu1  ;;  %v1395_v46 = vpop.permute.xlu1 %1394 }
 0x2ea   : > { %v4330_v47 = vsel %vm1455_vm0, %v1262_v8, %v1395_v46  ;;  %v1401_v7 = vpop.permute.xlu2 %1400 }
 0x2eb   : > { %901 = vmatmul.f32.gmra.mxu0 %v561_v16  ;;  %3338 = vmatmul.msk.f32.gmra.mxu2 %vm1623_vm1, %v4330_v47  ;;  %v567_v16 = vld [vmem:[%s3787_s12 + $0x5b0] sm:$0xff]  ;;  %v4374_v1 = vsel %vm1455_vm0, %v1265_v14, %v1401_v7  ;;  %v3372_v14 = vld [vmem:[%s6262_s3 + $0xb8] sm:$0xff] }
 0x2ec   : > { %1218 = vmatmul.f32.gmra.mxu1 %v562_v15  ;;  %3354 = vmatmul.msk.f32.gmra.mxu3 %vm1623_vm1, %v4301_v4  ;;  %v568_v15 = vld [vmem:[%s3787_s12 + $0x5b8] sm:$0xff]  ;;  %v571_v7 = vld [vmem:[%s3787_s12 + $0x5d0] sm:$0xff] }
 0x2ed   : > { %1879 = vmatpush.msra.mxu2 %v3372_v14  ;;  %v577_v14 = vld [vmem:[%s3787_s12 + $0x600] sm:$0xff] }
 0x2f0   : > { %v4339_v32 = vpop.f32.mrf.mxu0 }
 0x2f1   : > { %v4341_v62 = vpop.f32.mrf.mxu1 }
 0x2f3   : > { %904 = vmatmul.f32.gmra.mxu0 %v563_v17  ;;  %3339 = vmatmul.msk.f32.gmra.mxu2 %vm1623_vm1, %v4346_v43  ;;  %v675_v17 = vadd.f32 %v4132_v34, %v3899_v48 }
 0x2f4   : > { %1221 = vmatmul.f32.gmra.mxu1 %v564_v5  ;;  %3355 = vmatmul.msk.f32.gmra.mxu3 %vm1623_vm1, %v4330_v47 }
 0x2f8   : > { %v860_v31 = vpop.f32.mrf.mxu0 }
 0x2f9   : > { %v1177_v58 = vpop.f32.mrf.mxu1  ;;  %v861_v51 = vadd.f32 %v4132_v34, %v860_v31  ;;  %v1399_v0 = vpop.permute.xlu0 %1398 }
 0x2fa   : > { %v4359_v37 = vsel %vm1455_vm0, %v1264_v36, %v1399_v0  ;;  %v570_v36 = vld [vmem:[%s3787_s12 + $0x5c8] sm:$0xff] }
 0x2fb   : > { %v4361_v13 = vadd.f32 %v1177_v58, %v861_v51  ;;  %907 = vmatmul.f32.gmra.mxu0 %v565_v50  ;;  %3340 = vmatmul.msk.f32.gmra.mxu2 %vm1623_vm1, %v4359_v37  ;;  %v678_v51 = vadd.f32 %v4132_v34, %v3905_v52 }
 0x2fc   : > { %1224 = vmatmul.f32.gmra.mxu1 %v566_v59  ;;  %3356 = vmatmul.msk.f32.gmra.mxu3 %vm1623_vm1, %v4346_v43  ;;  %v992_v59 = vadd.f32 %v3901_v49, %v675_v17  ;;  %v681_v17 = vadd.f32 %v4132_v34, %v3911_v56 }
 0x2fe   : > { %v1267_v25 = vmax.f32 %v992_v59, 0.0 }
 0x300   : > { %v863_v21 = vpop.f32.mrf.mxu0 }
 0x301   : > { %v1180_v8 = vpop.f32.mrf.mxu1  ;;  %v864_v46 = vadd.f32 %v4132_v34, %v863_v21 }
 0x303   : > { %v1181_v29 = vadd.f32 %v1180_v8, %v864_v46  ;;  %910 = vmatmul.f32.gmra.mxu0 %v567_v16  ;;  %v3396_v46 = vld [vmem:[%s6262_s3 + $0xf8] sm:$0xff] }
 0x304   : > { %1227 = vmatmul.f32.gmra.mxu1 %v568_v15  ;;  %3357 = vmatmul.msk.f32.gmra.mxu3 %vm1623_vm1, %v4374_v1  ;;  %v995_v15 = vadd.f32 %v3907_v53, %v678_v51  ;;  %v576_v51 = vld [vmem:[%s3787_s12 + $0x5f8] sm:$0xff] }
 0x305   : > { %v1330_v44 = vmax.f32 %v1181_v29, 0.0  ;;  %1981 = vmatpush.msrb.mxu3 %v3396_v46  ;;  %v578_v46 = vld [vmem:[%s3787_s12 + $0x608] sm:$0xff] }
 0x306   : > { %v1268_v53 = vmax.f32 %v995_v15, 0.0 }
 0x307   : > { %1506 = vrot.lane.b32.xlu2 %v1330_v44, %s3617_s21  ;;  %v573_v44 = vld [vmem:[%s3787_s12 + $0x5e0] sm:$0xff] }
 0x308   : > { %v866_v5 = vpop.f32.mrf.mxu0 }
 0x309   : > { %v1183_v30 = vpop.f32.mrf.mxu1  ;;  %v867_v31 = vadd.f32 %v4132_v34, %v866_v5  ;;  %v1403_v58 = vpop.permute.xlu1 %1402 }
 0x30a   : > { %v4386_v45 = vsel %vm1455_vm0, %v1266_v9, %v1403_v58  ;;  %v574_v9 = vld [vmem:[%s3787_s12 + $0x5e8] sm:$0xff]  ;;  %v1409_v58 = vpop.permute.xlu2 %1408 }
 0x30b   : > { %v1184_v50 = vadd.f32 %v1183_v30, %v867_v31  ;;  %913 = vmatmul.f32.gmra.mxu0 %v569_v33  ;;  %3341 = vmatmul.msk.f32.gmra.mxu2 %vm1623_vm1, %v4386_v45  ;;  %v998_v31 = vadd.f32 %v3913_v57, %v681_v17 }
 0x30c   : > { %1230 = vmatmul.f32.gmra.mxu1 %v570_v36  ;;  %3358 = vmatmul.msk.f32.gmra.mxu3 %vm1623_vm1, %v4386_v45 }
 0x30d   : > { %v1331_v48 = vmax.f32 %v1184_v50, 0.0  ;;  %v684_v50 = vadd.f32 %v4132_v34, %v3917_v60 }
 0x30f   : > { %1508 = vrot.lane.b32.xlu0 %v1331_v48, %s3617_s21 }
 0x310   : > { %v869_v0 = vpop.f32.mrf.mxu0 }
 0x311   : > { %v1186_v35 = vpop.f32.mrf.mxu1  ;;  %v870_v21 = vadd.f32 %v4132_v34, %v869_v0  ;;  %v1405_v49 = vpop.permute.xlu0 %1404  ;;  %v1269_v0 = vmax.f32 %v998_v31, 0.0  ;;  %v580_v31 = vld [vmem:[%s3787_s12 + $0x618] sm:$0xff] }
 0x312   : > { %v4400_v8 = vsel %vm1455_vm0, %v1267_v25, %v1405_v49  ;;  %v575_v25 = vld [vmem:[%s3787_s12 + $0x5f0] sm:$0xff] }
 0x313   : > { %v1187_v16 = vadd.f32 %v1186_v35, %v870_v21  ;;  %916 = vmatmul.f32.gmra.mxu0 %v571_v7  ;;  %3342 = vmatmul.msk.f32.gmra.mxu2 %vm1623_vm1, %v4400_v8  ;;  %v4434_v57 = vsel %vm1455_vm0, %v1269_v0, %v1409_v58  ;;  %v3371_v21 = vld [vmem:[%s6262_s3 + $0xb0] sm:$0xff] }
 0x314   : > { %1233 = vmatmul.f32.gmra.mxu1 %v572_v40  ;;  %3359 = vmatmul.msk.f32.gmra.mxu3 %vm1623_vm1, %v4400_v8  ;;  %v1001_v40 = vadd.f32 %v3919_v61, %v684_v50  ;;  %v3395_v49 = vld [vmem:[%s6262_s3 + $0xf0] sm:$0xff]  ;;  %v687_v61 = vadd.f32 %v4132_v34, %v3923_v2 }
 0x315   : > { %v1332_v52 = vmax.f32 %v1187_v16, 0.0  ;;  %1880 = vmatpush.msra.mxu2 %v3371_v21  ;;  %1982 = vmatpush.msrb.mxu3 %v3395_v49  ;;  %v3369_v49 = vld [vmem:[%s6262_s3 + $0xa0] sm:$0xff] }
 0x316   : > { %v1270_v16 = vmax.f32 %v1001_v40, 0.0 }
 0x317   : > { %1510 = vrot.lane.b32.xlu1 %v1332_v52, %s3617_s21 }
 0x318   : > { %v872_v29 = vpop.f32.mrf.mxu0 }
 0x319   : > { %v1189_v41 = vpop.f32.mrf.mxu1  ;;  %v873_v5 = vadd.f32 %v4132_v34, %v872_v29  ;;  %v1407_v30 = vpop.permute.xlu1 %1406 }
 0x31a   : > { %v4420_v33 = vsel %vm1455_vm0, %v1268_v53, %v1407_v30 }
 0x31b   : > { %v1190_v36 = vadd.f32 %v1189_v41, %v873_v5  ;;  %919 = vmatmul.f32.gmra.mxu0 %v573_v44  ;;  %3343 = vmatmul.msk.f32.gmra.mxu2 %vm1623_vm1, %v4420_v33 }
 0x31c   : > { %1236 = vmatmul.f32.gmra.mxu1 %v574_v9  ;;  %3360 = vmatmul.msk.f32.gmra.mxu3 %vm1623_vm1, %v4420_v33  ;;  %v1004_v9 = vadd.f32 %v3925_v3, %v687_v61 }
 0x31d   : > { %v1333_v56 = vmax.f32 %v1190_v36, 0.0  ;;  %v579_v36 = vld [vmem:[%s3787_s12 + $0x610] sm:$0xff] }
 0x31e   : > { %v1271_v17 = vmax.f32 %v1004_v9, 0.0  ;;  %v3366_v9 = vld [vmem:[%s6262_s3 + $0x88] sm:$0xff] }
 0x31f   : > { %1512 = vrot.lane.b32.xlu2 %v1333_v56, %s3617_s21  ;;  %v690_v56 = vadd.f32 %v4132_v34, %v3929_v10  ;;  %v3370_v10 = vld [vmem:[%s6262_s3 + $0xa8] sm:$0xff] }
 0x320   : > { %v875_v59 = vpop.f32.mrf.mxu0  ;;  %1881 = vmatpush.msra.mxu2 %v3370_v10 }
 0x321   : > { %v1192_v48 = vpop.f32.mrf.mxu1  ;;  %v876_v35 = vadd.f32 %v4132_v34, %v875_v59  ;;  %v1415_v0 = vpop.permute.xlu2 %1414 }
 0x322   : > { %1882 = vmatpush.msra.mxu2 %v3369_v49 }
 0x323   : > { %v1193_v7 = vadd.f32 %v1192_v48, %v876_v35  ;;  %922 = vmatmul.f32.gmra.mxu0 %v575_v25  ;;  %3344 = vmatmul.msk.f32.gmra.mxu2 %vm1623_vm1, %v4434_v57  ;;  %v1007_v48 = vadd.f32 %v3931_v11, %v690_v56  ;;  %v693_v35 = vadd.f32 %v4132_v34, %v3935_v18  ;;  %v582_v11 = vld [vmem:[%s3787_s12 + $0x628] sm:$0xff]  ;;  %v3368_v18 = vld [vmem:[%s6262_s3 + $0x98] sm:$0xff]  ;;  %v3393_v56 = vld [vmem:[%s6262_s3 + $0xe0] sm:$0xff] }
 0x324   : > { %1239 = vmatmul.f32.gmra.mxu1 %v576_v51  ;;  %v3394_v51 = vld [vmem:[%s6262_s3 + $0xe8] sm:$0xff]  ;;  %1883 = vmatpush.msra.mxu2 %v3368_v18 }
 0x325   : > { %v1334_v60 = vmax.f32 %v1193_v7, 0.0  ;;  %1983 = vmatpush.msrb.mxu3 %v3394_v51 }
 0x327   : > { %1514 = vrot.lane.b32.xlu0 %v1334_v60, %s3617_s21  ;;  %v1272_v60 = vmax.f32 %v1007_v48, 0.0  ;;  %1984 = vmatpush.msrb.mxu3 %v3393_v56 }
 0x328   : > { %v878_v15 = vpop.f32.mrf.mxu0 }
 0x329   : > { %v1195_v52 = vpop.f32.mrf.mxu1  ;;  %v879_v53 = vadd.f32 %v4132_v34, %v878_v15  ;;  %v1411_v29 = vpop.permute.xlu1 %1410  ;;  %v1010_v15 = vadd.f32 %v3937_v19, %v693_v35 }
 0x32a   : > { %v4452_v41 = vsel %vm1455_vm0, %v1270_v16, %v1411_v29  ;;  %v4486_v16 = vsel %vm1455_vm0, %v1272_v60, %v1415_v0  ;;  %v3392_v60 = vld [vmem:[%s6262_s3 + $0xd8] sm:$0xff] }
 0x32b   : > { %v1196_v44 = vadd.f32 %v1195_v52, %v879_v53  ;;  %925 = vmatmul.f32.gmra.mxu0 %v577_v14  ;;  %3361 = vmatmul.msk.f32.gmra.mxu3 %vm1623_vm1, %v4452_v41  ;;  %v3367_v14 = vld [vmem:[%s6262_s3 + $0x90] sm:$0xff]  ;;  %v1273_v19 = vmax.f32 %v1010_v15, 0.0 }
 0x32c   : > { %1242 = vmatmul.f32.gmra.mxu1 %v578_v46  ;;  %1884 = vmatpush.msra.mxu2 %v3367_v14  ;;  %v696_v46 = vadd.f32 %v4132_v34, %v3941_v26 }
 0x32d   : > { %v1335_v2 = vmax.f32 %v1196_v44, 0.0  ;;  %v584_v44 = vld [vmem:[%s3787_s12 + $0x638] sm:$0xff]  ;;  %1985 = vmatpush.msrb.mxu3 %v3392_v60 }
 0x32e   : > { %1885 = vmatpush.msra.mxu2 %v3366_v9  ;;  %v1013_v26 = vadd.f32 %v3943_v27, %v696_v46  ;;  %v3391_v46 = vld [vmem:[%s6262_s3 + $0xd0] sm:$0xff] }
 0x32f   : > { %1516 = vrot.lane.b32.xlu1 %v1335_v2, %s3617_s21  ;;  %1986 = vmatpush.msrb.mxu3 %v3391_v46 }
 0x330   : > { %v881_v5 = vpop.f32.mrf.mxu0 }
 0x331   : > { %v1198_v30 = vpop.f32.mrf.mxu1  ;;  %v882_v58 = vadd.f32 %v4132_v34, %v881_v5  ;;  %v1413_v50 = vpop.permute.xlu0 %1412 }
 0x332   : > { %v4464_v59 = vsel %vm1455_vm0, %v1271_v17, %v1413_v50 }
 0x333   : > { %v1199_v3 = vadd.f32 %v1198_v30, %v882_v58  ;;  %928 = vmatmul.f32.gmra.mxu0 %v579_v36  ;;  %3345 = vmatmul.msk.f32.gmra.mxu2 %vm1623_vm1, %v4464_v59  ;;  %v3365_v30 = vld [vmem:[%s6262_s3 + $0x80] sm:$0xff]  ;;  %v1274_v58 = vmax.f32 %v1013_v26, 0.0 }
 0x334   : > { %1245 = vmatmul.f32.gmra.mxu1 %v580_v31  ;;  %3362 = vmatmul.msk.f32.gmra.mxu3 %vm1623_vm1, %v4464_v59 }
 0x335   : > { %v1336_v25 = vmax.f32 %v1199_v3, 0.0  ;;  %1886 = vmatpush.msra.mxu2 %v3365_v30  ;;  %v3389_v30 = vld [vmem:[%s6262_s3 + $0xc0] sm:$0xff] }
 0x337   : > { %1518 = vrot.lane.b32.xlu2 %v1336_v25, %s3617_s21 }
 0x338   : > { %v884_v7 = vpop.f32.mrf.mxu0 }
 0x339   : > { %v1201_v40 = vpop.f32.mrf.mxu1  ;;  %v885_v21 = vadd.f32 %v4132_v34, %v884_v7  ;;  %v4532_v7 = vld [vmem:[%s6261_s2] ss:$0 sm:$0xff] }
 0x33a   : > { %v714_v49 = vadd.f32 %v4532_v7, %v3977_v22  ;;  %v3390_v22 = vld [vmem:[%s6262_s3 + $0xc8] sm:$0xff] }
 0x33b   : > { %v1202_v61 = vadd.f32 %v1201_v40, %v885_v21  ;;  %3346 = vmatmul.msk.f32.gmra.mxu2 %vm1623_vm1, %v4486_v16  ;;  %v4538_v21 = vpop.f32.mrf.mxu2  ;;  %1987 = vmatpush.msrb.mxu3 %v3390_v22 }
 0x33c   : > { %1248 = vmatmul.f32.gmra.mxu1 %v582_v11  ;;  %3363 = vmatmul.msk.f32.gmra.mxu3 %vm1623_vm1, %v4486_v16  ;;  %v1031_v14 = vadd.f32 %v3979_v23, %v714_v49 }
 0x33d   : > { %v1337_v52 = vmax.f32 %v1202_v61, 0.0  ;;  %1988 = vmatpush.msrb.mxu3 %v3389_v30 }
 0x33f   : > { %1520 = vrot.lane.b32.xlu0 %v1337_v52, %s3617_s21 }
 0x340   : > { %v887_v53 = vpop.f32.mrf.mxu0 }
 0x341   : > { %v1204_v29 = vpop.f32.mrf.mxu1  ;;  %v888_v2 = vadd.f32 %v4132_v34, %v887_v53  ;;  %v1417_v17 = vpop.permute.xlu0 %1416  ;;  %v1280_v53 = vmax.f32 %v1031_v14, 0.0 }
 0x342   : > { %v4508_v5 = vsel %vm1455_vm0, %v1273_v19, %v1417_v17 }
 0x343   : > { %v1205_v36 = vadd.f32 %v1204_v29, %v888_v2  ;;  %3347 = vmatmul.msk.f32.gmra.mxu2 %vm1623_vm1, %v4508_v5  ;;  %v4552_v9 = vpop.f32.mrf.mxu2 }
 0x344   : > { %1251 = vmatmul.f32.gmra.mxu1 %v584_v44  ;;  %3364 = vmatmul.msk.f32.gmra.mxu3 %vm1623_vm1, %v4508_v5 }
 0x345   : > { %v1338_v31 = vmax.f32 %v1205_v36, 0.0 }
 0x347   : > { %1522 = vrot.lane.b32.xlu1 %v1338_v31, %s3617_s21 }
 0x348   : > { %v890_v50 = vpop.f32.mrf.mxu0 }
 0x349   : > { %v1207_v3 = vpop.f32.mrf.mxu1  ;;  %v891_v48 = vadd.f32 %v4132_v34, %v890_v50  ;;  %v1419_v27 = vpop.permute.xlu1 %1418 }
 0x34a   : > { %v4524_v25 = vsel %vm1455_vm0, %v1274_v58, %v1419_v27  ;;  %v4564_v27 = vpop.f32.mrf.mxu3 }
 0x34b   : > { %v1208_v10 = vadd.f32 %v1207_v3, %v891_v48  ;;  %3348 = vmatmul.msk.f32.gmra.mxu2 %vm1623_vm1, %v4524_v25  ;;  %v4562_v50 = vpop.f32.mrf.mxu2 }
 0x34d   : > { %v1339_v51 = vmax.f32 %v1208_v10, 0.0 }
 0x34f   : > { %1524 = vrot.lane.b32.xlu2 %v1339_v51, %s3617_s21 }
 0x350   : > { %v893_v0 = vpop.f32.mrf.mxu0 }
 0x351   : > { %v1210_v35 = vpop.f32.mrf.mxu1  ;;  %v894_v34 = vadd.f32 %v4532_v7, %v893_v0 }
 0x353   : > { %v1211_v40 = vadd.f32 %v1210_v35, %v894_v34  ;;  %v4568_v34 = vpop.f32.mrf.mxu2 }
 0x355   : > { %v1340_v11 = vmax.f32 %v1211_v40, 0.0 }
 0x357   : > { %1526 = vrot.lane.b32.xlu0 %v1340_v11, %s3617_s21  ;;  %v717_v11 = vadd.f32 %v4532_v7, %v3983_v38 }
 0x358   : > { %v896_v61 = vpop.f32.mrf.mxu0 }
 0x359   : > { %v1213_v15 = vpop.f32.mrf.mxu1  ;;  %v897_v18 = vadd.f32 %v4532_v7, %v896_v61  ;;  %v4573_v61 = vpop.f32.mrf.mxu3 }
 0x35b   : > { %v1214_v52 = vadd.f32 %v1213_v15, %v897_v18 }
 0x35d   : > { %v1341_v19 = vmax.f32 %v1214_v52, 0.0  ;;  %v1034_v52 = vadd.f32 %v3985_v39, %v717_v11 }
 0x35f   : > { %1528 = vrot.lane.b32.xlu1 %v1341_v19, %s3617_s21  ;;  %v4577_v19 = vpop.f32.mrf.mxu2  ;;  %v1281_v46 = vmax.f32 %v1034_v52, 0.0 }
 0x360   : > { %v899_v29 = vpop.f32.mrf.mxu0 }
 0x361   : > { %v1216_v44 = vpop.f32.mrf.mxu1  ;;  %v900_v2 = vadd.f32 %v4532_v7, %v899_v29  ;;  %v1507_v23 = vpop.permute.xlu2 %1506 }
 0x362   : > { %v1581_v17 = vsel %vm1455_vm0, %v1280_v53, %v1507_v23  ;;  %v720_v53 = vadd.f32 %v4532_v7, %v3989_v54  ;;  %v4584_v23 = vpop.f32.mrf.mxu3 }
 0x363   : > { %v1217_v36 = vadd.f32 %v1216_v44, %v900_v2  ;;  %3373 = vmatmul.msk.f32.vlgmr.msra.gmra.mxu2 %vm1623_vm1, %v1581_v17 }
 0x364   : > { %v1037_v39 = vadd.f32 %v3991_v55, %v720_v53  ;;  %v6334_v55 = vld [vmem:[#allocation13_spill] sm:$0xff] }
 0x365   : > { %v1342_v26 = vmax.f32 %v1217_v36, 0.0  ;;  %v6333_v36 = vld [vmem:[#allocation12_spill] sm:$0xff] }
 0x366   : > { %v1282_v54 = vmax.f32 %v1037_v39, 0.0 }
 0x367   : > { %1530 = vrot.lane.b32.xlu2 %v1342_v26, %s3617_s21  ;;  %v723_v26 = vadd.f32 %v4532_v7, %v6333_v36 }
 0x368   : > { %v902_v31 = vpop.f32.mrf.mxu0 }
 0x369   : > { %v1219_v56 = vpop.f32.mrf.mxu1  ;;  %v903_v58 = vadd.f32 %v4532_v7, %v902_v31 }
 0x36b   : > { %v1220_v3 = vadd.f32 %v1219_v56, %v903_v58  ;;  %v4592_v58 = vpop.f32.mrf.mxu2 }
 0x36d   : > { %v1343_v48 = vmax.f32 %v1220_v3, 0.0 }
 0x36f   : > { %1532 = vrot.lane.b32.xlu0 %v1343_v48, %s3617_s21 }
 0x370   : > { %v905_v10 = vpop.f32.mrf.mxu0 }
 0x371   : > { %v1222_v51 = vpop.f32.mrf.mxu1  ;;  %v906_v0 = vadd.f32 %v4532_v7, %v905_v10 }
 0x373   : > { %v1223_v35 = vadd.f32 %v1222_v51, %v906_v0  ;;  %v1040_v0 = vadd.f32 %v6334_v55, %v723_v26  ;;  %v6337_v26 = vld [vmem:[#allocation16_spill] sm:$0xff] }
 0x375   : > { %v1344_v40 = vmax.f32 %v1223_v35, 0.0  ;;  %v849_v35 = vadd.f32 %v4532_v7, %v4292_v12 }
 0x377   : > { %1534 = vrot.lane.b32.xlu1 %v1344_v40, %s3617_s21  ;;  %v4601_v40 = vpop.f32.mrf.mxu3 }
 0x378   : > { %v908_v60 = vpop.f32.mrf.mxu0 }
 0x379   : > { %v1225_v49 = vpop.f32.mrf.mxu1  ;;  %v909_v15 = vadd.f32 %v4532_v7, %v908_v60  ;;  %v1513_v60 = vpop.permute.xlu2 %1512 }
 0x37b   : > { %v1226_v18 = vadd.f32 %v1225_v49, %v909_v15  ;;  %v1283_v49 = vmax.f32 %v1040_v0, 0.0  ;;  %v6335_v15 = vld [vmem:[#allocation14_spill] sm:$0xff] }
 0x37d   : > { %v1345_v14 = vmax.f32 %v1226_v18, 0.0  ;;  %v726_v18 = vadd.f32 %v4532_v7, %v6335_v15 }
 0x37f   : > { %1536 = vrot.lane.b32.xlu2 %v1345_v14, %s3617_s21  ;;  %v4624_v36 = vpop.f32.mrf.mxu3 }
 0x380   : > { %v911_v29 = vpop.f32.mrf.mxu0 }
 0x381   : > { %v1228_v38 = vpop.f32.mrf.mxu1  ;;  %v912_v44 = vadd.f32 %v4532_v7, %v911_v29  ;;  %v1509_v22 = vpop.permute.xlu0 %1508  ;;  %v1584_v29 = vsel %vm1455_vm0, %v1283_v49, %v1513_v60  ;;  %v6339_v49 = vld [vmem:[#allocation17_spill] sm:$0xff] }
 0x382   : > { %v1582_v2 = vsel %vm1455_vm0, %v1281_v46, %v1509_v22  ;;  %v1166_v46 = vadd.f32 %v4294_v24, %v849_v35  ;;  %v858_v24 = vadd.f32 %v4532_v7, %v4339_v32  ;;  %v729_v32 = vadd.f32 %v4532_v7, %v6337_v26 }
 0x383   : > { %v1229_v17 = vadd.f32 %v1228_v38, %v912_v44  ;;  %3374 = vmatmul.msk.f32.gmra.mxu2 %vm1623_vm1, %v1582_v2  ;;  %3397 = vmatmul.msk.f32.vlgmr.msrb.gmra.mxu3 %vm1623_vm1, %v1582_v2  ;;  %v4609_v38 = vpop.f32.mrf.mxu2  ;;  %v6336_v44 = vld [vmem:[#allocation15_spill] sm:$0xff] }
 0x384   : > { %v1043_v22 = vadd.f32 %v6336_v44, %v726_v18  ;;  %v1325_v2 = vmax.f32 %v1166_v46, 0.0  ;;  %v1046_v15 = vadd.f32 %v6339_v49, %v729_v32  ;;  %v6340_v18 = vld [vmem:[#allocation19_spill] sm:$0xff] }
 0x385   : > { %v1346_v30 = vmax.f32 %v1229_v17, 0.0  ;;  %v852_v17 = vadd.f32 %v4532_v7, %v4309_v20 }
 0x386   : > { %v1284_v20 = vmax.f32 %v1043_v22, 0.0 }
 0x387   : > { %1538 = vrot.lane.b32.xlu0 %v1346_v30, %s3617_s21  ;;  %v3420_v30 = vld [vmem:[%s6262_s3 + $0x138] sm:$0xff] }
 0x388   : > { %v914_v31 = vpop.f32.mrf.mxu0  ;;  %2083 = vmatpush.msrb.mxu2 %v3420_v30  ;;  %v3419_v30 = vld [vmem:[%s6262_s3 + $0x130] sm:$0xff] }
 0x389   : > { %v1231_v56 = vpop.f32.mrf.mxu1  ;;  %v915_v3 = vadd.f32 %v4532_v7, %v914_v31  ;;  %v1511_v48 = vpop.permute.xlu1 %1510  ;;  %v6338_v31 = vld [vmem:[#allocation18_spill] sm:$0xff] }
 0x38a   : > { %v1583_v10 = vsel %vm1455_vm0, %v1282_v54, %v1511_v48  ;;  %v3444_v54 = vld [vmem:[%s6262_s3 + $0x178] sm:$0xff]  ;;  %2084 = vmatpush.msrb.mxu2 %v3419_v30 }
 0x38b   : > { %v1232_v51 = vadd.f32 %v1231_v56, %v915_v3  ;;  %3375 = vmatmul.msk.f32.gmra.mxu2 %vm1623_vm1, %v1583_v10  ;;  %3398 = vmatmul.msk.f32.gmra.mxu3 %vm1623_vm1, %v1583_v10  ;;  %v732_v56 = vadd.f32 %v4532_v7, %v6338_v31  ;;  %v1169_v10 = vadd.f32 %v4311_v42, %v852_v17  ;;  %v6341_v31 = vld [vmem:[#allocation20_spill] sm:$0xff] }
 0x38c   : > { %2176 = vmatpush.msra.mxu3 %v3444_v54  ;;  %v855_v42 = vadd.f32 %v4532_v7, %v4321_v63 }
 0x38d   : > { %v1347_v11 = vmax.f32 %v1232_v51, 0.0  ;;  %v1175_v51 = vadd.f32 %v4341_v62, %v858_v24  ;;  %v4647_v24 = vpop.f32.mrf.mxu3 }
 0x38e   : > { %v1172_v17 = vadd.f32 %v4323_v28, %v855_v42  ;;  %v3443_v28 = vld [vmem:[%s6262_s3 + $0x170] sm:$0xff]  ;;  %v3418_v42 = vld [vmem:[%s6262_s3 + $0x128] sm:$0xff] }
 0x38f   : > { %1540 = vrot.lane.b32.xlu1 %v1347_v11, %s3617_s21  ;;  %v4636_v11 = vpop.f32.mrf.mxu2  ;;  %v1328_v46 = vmax.f32 %v1175_v51, 0.0  ;;  %2177 = vmatpush.msra.mxu3 %v3443_v28 }
 0x390   : > { %v917_v52 = vpop.f32.mrf.mxu0  ;;  %v1327_v32 = vmax.f32 %v1172_v17, 0.0  ;;  %2085 = vmatpush.msrb.mxu2 %v3418_v42 }
 0x391   : > { %v1234_v14 = vpop.f32.mrf.mxu1  ;;  %v918_v53 = vadd.f32 %v4532_v7, %v917_v52  ;;  %v1049_v52 = vadd.f32 %v6340_v18, %v732_v56  ;;  %v1519_v62 = vpop.permute.xlu2 %1518  ;;  %v735_v56 = vadd.f32 %v4532_v7, %v6341_v31 }
 0x393   : > { %v1235_v12 = vadd.f32 %v1234_v14, %v918_v53  ;;  %3376 = vmatmul.msk.f32.gmra.mxu2 %vm1623_vm1, %v1584_v29  ;;  %3399 = vmatmul.msk.f32.gmra.mxu3 %vm1623_vm1, %v1584_v29  ;;  %v1326_v14 = vmax.f32 %v1169_v10, 0.0  ;;  %v1285_v29 = vmax.f32 %v1046_v15, 0.0 }
 0x395   : > { %v1348_v39 = vmax.f32 %v1235_v12, 0.0  ;;  %v1286_v12 = vmax.f32 %v1049_v52, 0.0  ;;  %v6343_v52 = vld [vmem:[#allocation22_spill] sm:$0xff] }
 0x397   : > { %1542 = vrot.lane.b32.xlu2 %v1348_v39, %s3617_s21  ;;  %1420 = vrot.lane.b32.xlu1 %v1325_v2, %s3617_s21  ;;  %v4650_v39 = vsel %vm1455_vm0, %v1286_v12, %v1519_v62  ;;  %v4667_v26 = vpop.f32.mrf.mxu2 }
 0x398   : > { %v920_v3 = vpop.f32.mrf.mxu0 }
 0x399   : > { %v1237_v48 = vpop.f32.mrf.mxu1  ;;  %v921_v55 = vadd.f32 %v4532_v7, %v920_v3  ;;  %v1515_v0 = vpop.permute.xlu0 %1514 }
 0x39a   : > { %v1585_v35 = vsel %vm1455_vm0, %v1284_v20, %v1515_v0  ;;  %v1329_v20 = vmax.f32 %v4361_v13, 0.0  ;;  %v6342_v13 = vld [vmem:[#allocation21_spill] sm:$0xff] }
 0x39b   : > { %v1238_v60 = vadd.f32 %v1237_v48, %v921_v55  ;;  %3400 = vmatmul.msk.f32.gmra.mxu3 %vm1623_vm1, %v1585_v35  ;;  %v1052_v0 = vadd.f32 %v6342_v13, %v735_v56  ;;  %v4677_v35 = vpop.f32.mrf.mxu3  ;;  %v6347_v13 = vld [vmem:[#allocation25_spill] sm:$0xff] }
 0x39d   : > { %v1349_v53 = vmax.f32 %v1238_v60, 0.0  ;;  %v1287_v18 = vmax.f32 %v1052_v0, 0.0 }
 0x39f   : > { %1422 = vrot.lane.b32.xlu2 %v1326_v14, %s3617_s21  ;;  %1426 = vrot.lane.b32.xlu1 %v1328_v46, %s3617_s21  ;;  %v4679_v15 = vpop.f32.mrf.mxu2  ;;  %v738_v14 = vadd.f32 %v4532_v7, %v6343_v52  ;;  %v6348_v52 = vld [vmem:[#allocation26_spill] sm:$0xff] }
 0x3a0   : > { %1544 = vrot.lane.b32.xlu0 %v1349_v53, %s3617_s21  ;;  %v923_v44 = vpop.f32.mrf.mxu0 }
 0x3a1   : > { %v1240_v22 = vpop.f32.mrf.mxu1  ;;  %v1517_v2 = vpop.permute.xlu1 %1516  ;;  %v924_v54 = vadd.f32 %v4532_v7, %v923_v44  ;;  %v3442_v44 = vld [vmem:[%s6262_s3 + $0x168] sm:$0xff] }
 0x3a2   : > { %v4653_v63 = vsel %vm1455_vm0, %v1285_v29, %v1517_v2  ;;  %v6344_v2 = vld [vmem:[#allocation23_spill] sm:$0xff]  ;;  %2178 = vmatpush.msra.mxu3 %v3442_v44  ;;  %v3441_v44 = vld [vmem:[%s6262_s3 + $0x160] sm:$0xff] }
 0x3a3   : > { %3377 = vmatmul.msk.f32.gmra.mxu2 %vm1623_vm1, %v4653_v63  ;;  %3401 = vmatmul.msk.f32.gmra.mxu3 %vm1623_vm1, %v4650_v39  ;;  %v1241_v3 = vadd.f32 %v1240_v22, %v924_v54  ;;  %v1055_v17 = vadd.f32 %v6344_v2, %v738_v14  ;;  %v4700_v28 = vpop.f32.mrf.mxu3  ;;  %v933_v54 = vadd.f32 %v4532_v7, %v4538_v21  ;;  %v3417_v21 = vld [vmem:[%s6262_s3 + $0x120] sm:$0xff] }
 0x3a4   : > { %2086 = vmatpush.msrb.mxu2 %v3417_v21  ;;  %v744_v14 = vadd.f32 %v4532_v7, %v6348_v52  ;;  %2179 = vmatpush.msra.mxu3 %v3441_v44  ;;  %v6357_v52 = vld [vmem:[#allocation31_spill] sm:$0xff] }
 0x3a5   : > { %v1350_v60 = vmax.f32 %v1241_v3, 0.0 }
 0x3a7   : > { %1428 = vrot.lane.b32.xlu2 %v1329_v20, %s3617_s21  ;;  %v1288_v20 = vmax.f32 %v1055_v17, 0.0  ;;  %v4707_v56 = vpop.f32.mrf.mxu2 }
 0x3a8   : > { %1424 = vrot.lane.b32.xlu0 %v1327_v32, %s3617_s21  ;;  %v926_v48 = vpop.f32.mrf.mxu0  ;;  %v6345_v32 = vld [vmem:[#allocation24_spill] sm:$0xff]  ;;  %6346 = vst [vmem:[#allocation12_spill] sm:$0xff] %v4707_v56 }
 0x3a9   : > { %v1243_v10 = vpop.f32.mrf.mxu1  ;;  %v927_v51 = vadd.f32 %v4532_v7, %v926_v48  ;;  %v741_v31 = vadd.f32 %v4532_v7, %v6345_v32 }
 0x3ab   : > { %v1244_v55 = vadd.f32 %v1243_v10, %v927_v51  ;;  %3378 = vmatmul.msk.f32.gmra.mxu2 %vm1623_vm1, %v4650_v39  ;;  %v1058_v0 = vadd.f32 %v6347_v13, %v741_v31  ;;  %v6356_v13 = vld [vmem:[#allocation30_spill] sm:$0xff] }
 0x3ad   : > { %v1351_v49 = vmax.f32 %v1244_v55, 0.0 }
 0x3af   : > { %1548 = vrot.lane.b32.xlu1 %v1351_v49, %s3617_s21  ;;  %v1525_v49 = vpop.permute.xlu2 %1524 }
 0x3b0   : > { %1546 = vrot.lane.b32.xlu0 %v1350_v60, %s3617_s21  ;;  %v929_v46 = vpop.f32.mrf.mxu0  ;;  %v936_v60 = vadd.f32 %v4532_v7, %v4552_v9  ;;  %v6351_v9 = vld [vmem:[#allocation27_spill] sm:$0xff] }
 0x3b1   : > { %v1246_v53 = vpop.f32.mrf.mxu1  ;;  %v930_v62 = vadd.f32 %v4532_v7, %v929_v46  ;;  %v1521_v29 = vpop.permute.xlu0 %1520  ;;  %v1061_v2 = vadd.f32 %v6351_v9, %v744_v14  ;;  %v6360_v9 = vld [vmem:[#allocation32_spill] sm:$0xff] }
 0x3b2   : > { %v4690_v12 = vsel %vm1455_vm0, %v1287_v18, %v1521_v29  ;;  %v1289_v18 = vmax.f32 %v1058_v0, 0.0  ;;  %v4725_v46 = vpop.f32.mrf.mxu3  ;;  %v750_v0 = vadd.f32 %v4532_v7, %v6356_v13 }
 0x3b3   : > { %v1247_v22 = vadd.f32 %v1246_v53, %v930_v62  ;;  %3379 = vmatmul.msk.f32.gmra.mxu2 %vm1623_vm1, %v4690_v12  ;;  %3402 = vmatmul.msk.f32.gmra.mxu3 %vm1623_vm1, %v4690_v12  ;;  %6349 = vst [vmem:[#allocation13_spill] sm:$0xff] %v4725_v46  ;;  %v4727_v62 = vpop.f32.mrf.mxu2  ;;  %v1290_v17 = vmax.f32 %v1061_v2, 0.0  ;;  %v753_v2 = vadd.f32 %v4532_v7, %v6360_v9  ;;  %v6367_v9 = vld [vmem:[#allocation37_spill] sm:$0xff] }
 0x3b4   : > { %6350 = vst [vmem:[#allocation14_spill] sm:$0xff] %v4727_v62  ;;  %v4730_v29 = vsel %vm1455_vm0, %v1289_v18, %v1525_v49  ;;  %v3440_v18 = vld [vmem:[%s6262_s3 + $0x158] sm:$0xff]  ;;  %v1067_v14 = vadd.f32 %v6357_v52, %v750_v0  ;;  %v6365_v0 = vld [vmem:[#allocation36_spill] sm:$0xff] }
 0x3b5   : > { %v1352_v30 = vmax.f32 %v1247_v22, 0.0  ;;  %2180 = vmatpush.msra.mxu3 %v3440_v18 }
 0x3b7   : > { %1550 = vrot.lane.b32.xlu2 %v1352_v30, %s3617_s21  ;;  %v6352_v30 = vld [vmem:[#allocation28_spill] sm:$0xff] }
 0x3b9   : > { %v1249_v3 = vpop.f32.mrf.mxu1  ;;  %v1523_v10 = vpop.permute.xlu1 %1522 }
 0x3ba   : > { %v1250_v48 = vadd.f32 %v1249_v3, %v933_v54  ;;  %v4710_v51 = vsel %vm1455_vm0, %v1288_v20, %v1523_v10  ;;  %v747_v54 = vadd.f32 %v4532_v7, %v6352_v30  ;;  %v4741_v32 = vpop.f32.mrf.mxu3  ;;  %v3416_v3 = vld [vmem:[%s6262_s3 + $0x118] sm:$0xff]  ;;  %v3415_v30 = vld [vmem:[%s6262_s3 + $0x110] sm:$0xff] }
 0x3bb   : > { %3380 = vmatmul.msk.f32.gmra.mxu2 %vm1623_vm1, %v4710_v51  ;;  %3403 = vmatmul.msk.f32.gmra.mxu3 %vm1623_vm1, %v4710_v51  ;;  %6353 = vst [vmem:[#allocation15_spill] sm:$0xff] %v4741_v32 }
 0x3bc   : > { %v1353_v55 = vmax.f32 %v1250_v48, 0.0  ;;  %v6354_v48 = vld [vmem:[#allocation29_spill] sm:$0xff]  ;;  %2087 = vmatpush.msrb.mxu2 %v3416_v3 }
 0x3bd   : > { %v1064_v10 = vadd.f32 %v6354_v48, %v747_v54  ;;  %v6361_v54 = vld [vmem:[#allocation33_spill] sm:$0xff] }
 0x3be   : > { %1552 = vrot.lane.b32.xlu0 %v1353_v55, %s3617_s21  ;;  %v4752_v55 = vpop.f32.mrf.mxu2  ;;  %2088 = vmatpush.msrb.mxu2 %v3415_v30 }
 0x3bf   : > { %6355 = vst [vmem:[#allocation16_spill] sm:$0xff] %v4752_v55  ;;  %v1291_v21 = vmax.f32 %v1064_v10, 0.0 }
 0x3c1   : > { %v1252_v53 = vpop.f32.mrf.mxu1  ;;  %v1531_v44 = vpop.permute.xlu2 %1530 }
 0x3c2   : > { %v1253_v42 = vadd.f32 %v1252_v53, %v936_v60  ;;  %v4767_v53 = vpop.f32.mrf.mxu3 }
 0x3c3   : > { %3404 = vmatmul.msk.f32.gmra.mxu3 %vm1623_vm1, %v4730_v29  ;;  %6358 = vst [vmem:[#allocation18_spill] sm:$0xff] %v4767_v53  ;;  %v6378_v53 = vld [vmem:[#allocation44_spill] sm:$0xff] }
 0x3c4   : > { %v1354_v22 = vmax.f32 %v1253_v42, 0.0 }
 0x3c6   : > { %1554 = vrot.lane.b32.xlu1 %v1354_v22, %s3617_s21  ;;  %v4769_v42 = vpop.f32.mrf.mxu2  ;;  %v1292_v22 = vmax.f32 %v1067_v14, 0.0  ;;  %v3439_v14 = vld [vmem:[%s6262_s3 + $0x150] sm:$0xff]  ;;  %s3618_s21 = smov 64  }
 0x3c7   : > { %6359 = vst [vmem:[#allocation17_spill] sm:$0xff] %v4769_v42  ;;  %2181 = vmatpush.msra.mxu3 %v3439_v14 }
 0x3c9   : > { %v1527_v20 = vpop.permute.xlu0 %1526 }
 0x3ca   : > { %v4744_v31 = vsel %vm1455_vm0, %v1290_v17, %v1527_v20  ;;  %v4774_v17 = vsel %vm1455_vm0, %v1292_v22, %v1531_v44  ;;  %v1070_v20 = vadd.f32 %v6361_v54, %v753_v2  ;;  %v4784_v3 = vpop.f32.mrf.mxu3  ;;  %v6366_v44 = vld [vmem:[#allocation35_spill] sm:$0xff] }
 0x3cb   : > { %3381 = vmatmul.msk.f32.gmra.mxu2 %vm1623_vm1, %v4744_v31  ;;  %6362 = vst [vmem:[#allocation19_spill] sm:$0xff] %v4784_v3  ;;  %v6377_v3 = vld [vmem:[#allocation43_spill] sm:$0xff] }
 0x3cc   : > { %v1293_v10 = vmax.f32 %v1070_v20, 0.0 }
 0x3ce   : > { %v4786_v48 = vpop.f32.mrf.mxu2 }
 0x3cf   : > { %6363 = vst [vmem:[#allocation20_spill] sm:$0xff] %v4786_v48 }
 0x3d1   : > { %v1529_v60 = vpop.permute.xlu1 %1528 }
 0x3d2   : > { %v4757_v49 = vsel %vm1455_vm0, %v1291_v21, %v1529_v60  ;;  %v6364_v21 = vld [vmem:[#allocation34_spill] sm:$0xff]  ;;  %v759_v60 = vadd.f32 %v4532_v7, %v6365_v0  ;;  %v4804_v30 = vpop.f32.mrf.mxu3 }
 0x3d3   : > { %3382 = vmatmul.msk.f32.gmra.mxu2 %vm1623_vm1, %v4757_v49  ;;  %3405 = vmatmul.msk.f32.gmra.mxu3 %vm1623_vm1, %v4757_v49  ;;  %v756_v13 = vadd.f32 %v4532_v7, %v6364_v21  ;;  %6368 = vst [vmem:[#allocation21_spill] sm:$0xff] %v4804_v30 }
 0x3d4   : > { %v1076_v2 = vadd.f32 %v6367_v9, %v759_v60  ;;  %v6370_v60 = vld [vmem:[#allocation38_spill] sm:$0xff] }
 0x3d5   : > { %v1073_v22 = vadd.f32 %v6366_v44, %v756_v13  ;;  %v3414_v13 = vld [vmem:[%s6262_s3 + $0x108] sm:$0xff]  ;;  %v762_v14 = vadd.f32 %v4532_v7, %v6370_v60  ;;  %v3413_v9 = vld [vmem:[%s6262_s3 + $0x100] sm:$0xff] }
 0x3d6   : > { %v4806_v21 = vpop.f32.mrf.mxu2  ;;  %2089 = vmatpush.msrb.mxu2 %v3414_v13 }
 0x3d7   : > { %v1294_v20 = vmax.f32 %v1073_v22, 0.0 }
 0x3d8   : > { %2090 = vmatpush.msrb.mxu2 %v3413_v9  ;;  %v3437_v9 = vld [vmem:[%s6262_s3 + $0x140] sm:$0xff] }
 0x3d9   : > { %v1537_v54 = vpop.permute.xlu2 %1536 }
 0x3da   : > { %v4823_v44 = vpop.f32.mrf.mxu3 }
 0x3db   : > { %3383 = vmatmul.msk.f32.gmra.mxu2 %vm1623_vm1, %v4774_v17  ;;  %3406 = vmatmul.msk.f32.gmra.mxu3 %vm1623_vm1, %v4774_v17 }
 0x3de   : > { %v4825_v22 = vpop.f32.mrf.mxu2 }
 0x3e1   : > { %v1533_v18 = vpop.permute.xlu0 %1532 }
 0x3e2   : > { %v4793_v52 = vsel %vm1455_vm0, %v1293_v10, %v1533_v18  ;;  %v1295_v10 = vmax.f32 %v1076_v2, 0.0  ;;  %v3438_v2 = vld [vmem:[%s6262_s3 + $0x148] sm:$0xff]  ;;  %v4836_v13 = vpop.f32.mrf.mxu3 }
 0x3e3   : > { %3384 = vmatmul.msk.f32.gmra.mxu2 %vm1623_vm1, %v4793_v52  ;;  %3407 = vmatmul.msk.f32.gmra.mxu3 %vm1623_vm1, %v4793_v52 }
 0x3e4   : > { %v4809_v18 = vsel %vm1455_vm0, %v1295_v10, %v1537_v54  ;;  %v6371_v54 = vld [vmem:[#allocation39_spill] sm:$0xff]  ;;  %2182 = vmatpush.msra.mxu3 %v3438_v2 }
 0x3e6   : > { %2183 = vmatpush.msra.mxu3 %v3437_v9 }
 0x3e9   : > { %v1535_v0 = vpop.permute.xlu1 %1534 }
 0x3ea   : > { %v4812_v46 = vsel %vm1455_vm0, %v1294_v20, %v1535_v0  ;;  %v1079_v20 = vadd.f32 %v6371_v54, %v762_v14  ;;  %v6372_v0 = vld [vmem:[#allocation40_spill] sm:$0xff]  ;;  %v6374_v14 = vld [vmem:[#allocation41_spill] sm:$0xff]  ;;  %v4849_v54 = vpop.f32.mrf.mxu2 }
 0x3eb   : > { %6369 = vst [vmem:[#allocation22_spill] sm:$0xff] %v4812_v46  ;;  %3385 = vmatmul.msk.f32.gmra.mxu2 %vm1623_vm1, %v4809_v18  ;;  %3408 = vmatmul.msk.f32.gmra.mxu3 %vm1623_vm1, %v4812_v46  ;;  %v765_v60 = vadd.f32 %v4532_v7, %v6372_v0  ;;  %v6375_v0 = vld [vmem:[#allocation42_spill] sm:$0xff] }
 0x3ec   : > { %v1296_v10 = vmax.f32 %v1079_v20, 0.0 }
 0x3ed   : > { %v1082_v2 = vadd.f32 %v6374_v14, %v765_v60  ;;  %v4861_v60 = vpop.f32.mrf.mxu3 }
 0x3ef   : > { %v1297_v20 = vmax.f32 %v1082_v2, 0.0 }
 0x3f1   : > { %v1543_v9 = vpop.permute.xlu2 %1542 }
 0x3f2   : > { %v4863_v14 = vpop.f32.mrf.mxu2 }
 0x3f9   : > { %v1539_v56 = vpop.permute.xlu0 %1538 }
 0x3fa   : > { %v4839_v30 = vsel %vm1455_vm0, %v1296_v10, %v1539_v56  ;;  %v768_v56 = vadd.f32 %v4532_v7, %v6375_v0  ;;  %v771_v0 = vadd.f32 %v4532_v7, %v6378_v53  ;;  %v3492_v53 = vld [vmem:[%s6262_s3 + $0x1f8] sm:$0xff] }
 0x3fb   : > { %6373 = vst [vmem:[#allocation23_spill] sm:$0xff] %v4839_v30  ;;  %3386 = vmatmul.msk.f32.gmra.mxu2 %vm1623_vm1, %v4839_v30  ;;  %3409 = vmatmul.msk.f32.gmra.mxu3 %vm1623_vm1, %v4839_v30 }
 0x3fc   : > { %v1085_v42 = vadd.f32 %v6377_v3, %v768_v56  ;;  %v6380_v56 = vld [vmem:[#allocation45_spill] sm:$0xff]  ;;  %2371 = vmatpush.msrb.mxu3 %v3492_v53 }
 0x3fd   : > { %v1088_v55 = vadd.f32 %v6380_v56, %v771_v0 }
 0x3fe   : > { %v1298_v2 = vmax.f32 %v1085_v42, 0.0  ;;  %v3468_v42 = vld [vmem:[%s6262_s3 + $0x1b8] sm:$0xff] }
 0x3ff   : > { %2278 = vmatpush.msra.mxu2 %v3468_v42 }
 0x401   : > { %v1541_v10 = vpop.permute.xlu1 %1540 }
 0x402   : > { %v4854_v48 = vsel %vm1455_vm0, %v1297_v20, %v1541_v10  ;;  %v4868_v20 = vsel %vm1455_vm0, %v1298_v2, %v1543_v9  ;;  %v1299_v9 = vmax.f32 %v1088_v55, 0.0  ;;  %v3467_v55 = vld [vmem:[%s6262_s3 + $0x1b0] sm:$0xff] }
 0x403   : > { %6376 = vst [vmem:[#allocation24_spill] sm:$0xff] %v4854_v48  ;;  %3387 = vmatmul.msk.f32.gmra.mxu2 %vm1623_vm1, %v4854_v48  ;;  %3410 = vmatmul.msk.f32.gmra.mxu3 %vm1623_vm1, %v4854_v48 }
 0x404   : > { %6379 = vst [vmem:[#allocation25_spill] sm:$0xff] %v4868_v20  ;;  %2279 = vmatpush.msra.mxu2 %v3467_v55  ;;  %v3490_v55 = vld [vmem:[%s6262_s3 + $0x1e8] sm:$0xff] }
 0x406   : > { %v4874_v10 = vpop.f32.mrf.mxu2  ;;  %v4876_v3 = vpop.f32.mrf.mxu3 }
 0x40b   : > { %3388 = vmatmul.msk.f32.gmra.mxu2 %vm1623_vm1, %v4868_v20  ;;  %3411 = vmatmul.msk.f32.gmra.mxu3 %vm1623_vm1, %v4868_v20 }
 0x40e   : > { %v4892_v0 = vpop.f32.mrf.mxu2  ;;  %v4894_v56 = vpop.f32.mrf.mxu3 }
 0x412   : > { %v1545_v2 = vpop.permute.xlu0 %1544 }
 0x413   : > { %v4886_v32 = vsel %vm1455_vm0, %v1299_v9, %v1545_v2  ;;  %3421 = vmatmul.msk.f32.vlgmr.msrb.gmra.mxu2 %vm1623_vm1, %v4316_v6  ;;  %v3491_v6 = vld [vmem:[%s6262_s3 + $0x1f0] sm:$0xff]  ;;  %v3466_v2 = vld [vmem:[%s6262_s3 + $0x1a8] sm:$0xff] }
 0x414   : > { %6381 = vst [vmem:[#allocation26_spill] sm:$0xff] %v4886_v32  ;;  %3412 = vmatmul.msk.f32.gmra.mxu3 %vm1623_vm1, %v4886_v32  ;;  %2280 = vmatpush.msra.mxu2 %v3466_v2  ;;  %v3465_v2 = vld [vmem:[%s6262_s3 + $0x1a0] sm:$0xff] }
 0x415   : > { %2372 = vmatpush.msrb.mxu3 %v3491_v6 }
 0x416   : > { %v4906_v42 = vpop.f32.mrf.mxu2  ;;  %v4908_v53 = vpop.f32.mrf.mxu3  ;;  %2281 = vmatpush.msra.mxu2 %v3465_v2  ;;  %v3464_v2 = vld [vmem:[%s6262_s3 + $0x198] sm:$0xff] }
 0x417   : > { %2373 = vmatpush.msrb.mxu3 %v3490_v55 }
 0x418   : > { %2282 = vmatpush.msra.mxu2 %v3464_v2  ;;  %v3463_v2 = vld [vmem:[%s6262_s3 + $0x190] sm:$0xff] }
 0x41a   : > { %2283 = vmatpush.msra.mxu2 %v3463_v2 }
 0x41b   : > { %3422 = vmatmul.msk.f32.gmra.mxu2 %vm1623_vm1, %v4301_v4 }
 0x41c   : > { %3445 = vmatmul.msk.f32.vlgmr.msra.gmra.mxu3 %vm1623_vm1, %v4301_v4 }
 0x41e   : > { %v4916_v9 = vpop.f32.mrf.mxu3 }
 0x423   : > { %3423 = vmatmul.msk.f32.gmra.mxu2 %vm1623_vm1, %v4330_v47 }
 0x424   : > { %3446 = vmatmul.msk.f32.gmra.mxu3 %vm1623_vm1, %v4330_v47 }
 0x426   : > { %v4914_v4 = vpop.f32.mrf.mxu2  ;;  %v4932_v6 = vpop.f32.mrf.mxu3 }
 0x42b   : > { %3424 = vmatmul.msk.f32.gmra.mxu2 %vm1623_vm1, %v4346_v43 }
 0x42c   : > { %3447 = vmatmul.msk.f32.gmra.mxu3 %vm1623_vm1, %v4346_v43 }
 0x42e   : > { %v4928_v47 = vpop.f32.mrf.mxu2 }
 0x433   : > { %3425 = vmatmul.msk.f32.gmra.mxu2 %vm1623_vm1, %v4374_v1  ;;  %v3489_v1 = vld [vmem:[%s6262_s3 + $0x1e0] sm:$0xff] }
 0x434   : > { %3448 = vmatmul.msk.f32.gmra.mxu3 %vm1623_vm1, %v4359_v37 }
 0x435   : > { %2374 = vmatpush.msrb.mxu3 %v3489_v1 }
 0x436   : > { %v4938_v43 = vpop.f32.mrf.mxu2  ;;  %v4940_v62 = vpop.f32.mrf.mxu3 }
 0x43b   : > { %3426 = vmatmul.msk.f32.gmra.mxu2 %vm1623_vm1, %v4386_v45 }
 0x43c   : > { %3449 = vmatmul.msk.f32.gmra.mxu3 %vm1623_vm1, %v4386_v45 }
 0x43e   : > { %v4954_v37 = vpop.f32.mrf.mxu2  ;;  %v4956_v55 = vpop.f32.mrf.mxu3 }
 0x443   : > { %3427 = vmatmul.msk.f32.gmra.mxu2 %vm1623_vm1, %v4400_v8 }
 0x444   : > { %3450 = vmatmul.msk.f32.gmra.mxu3 %vm1623_vm1, %v4400_v8  ;;  %v3488_v8 = vld [vmem:[%s6262_s3 + $0x1d8] sm:$0xff] }
 0x445   : > { %2375 = vmatpush.msrb.mxu3 %v3488_v8 }
 0x446   : > { %v4970_v1 = vpop.f32.mrf.mxu3 }
 0x447   : > { %6383 = vst [vmem:[#allocation28_spill] sm:$0xff] %v4970_v1  ;;  %v6396_v1 = vld [vmem:[#allocation6_spill] sm:$0xff] }
 0x44b   : > { %3428 = vmatmul.msk.f32.gmra.mxu2 %vm1623_vm1, %v4420_v33 }
 0x44c   : > { %3451 = vmatmul.msk.f32.gmra.mxu3 %vm1623_vm1, %v4420_v33 }
 0x44e   : > { %v4962_v45 = vpop.f32.mrf.mxu2 }
 0x44f   : > { %6382 = vst [vmem:[#allocation27_spill] sm:$0xff] %v4962_v45 }
 0x453   : > { %3429 = vmatmul.msk.f32.gmra.mxu2 %vm1623_vm1, %v4452_v41  ;;  %v3487_v41 = vld [vmem:[%s6262_s3 + $0x1d0] sm:$0xff] }
 0x454   : > { %3452 = vmatmul.msk.f32.gmra.mxu3 %vm1623_vm1, %v4434_v57 }
 0x455   : > { %2376 = vmatpush.msrb.mxu3 %v3487_v41 }
 0x456   : > { %v4976_v33 = vpop.f32.mrf.mxu2  ;;  %v4978_v45 = vpop.f32.mrf.mxu3 }
 0x457   : > { %6384 = vst [vmem:[#allocation29_spill] sm:$0xff] %v4976_v33  ;;  %v6389_v33 = vld [vmem:[#allocation3_spill] sm:$0xff] }
 0x458   : > { %6385 = vst [vmem:[#allocation30_spill] sm:$0xff] %v4978_v45 }
 0x45b   : > { %3430 = vmatmul.msk.f32.gmra.mxu2 %vm1623_vm1, %v4464_v59 }
 0x45c   : > { %3453 = vmatmul.msk.f32.gmra.mxu3 %vm1623_vm1, %v4464_v59  ;;  %v6388_v59 = vld [vmem:[#allocation2_spill] sm:$0xff] }
 0x45d   : > { %v699_v45 = vadd.f32 %v4532_v7, %v6388_v59  ;;  %v3461_v59 = vld [vmem:[%s6262_s3 + $0x180] sm:$0xff] }
 0x45e   : > { %v4990_v57 = vpop.f32.mrf.mxu2  ;;  %v4992_v8 = vpop.f32.mrf.mxu3 }
 0x45f   : > { %6386 = vst [vmem:[#allocation31_spill] sm:$0xff] %v4990_v57  ;;  %v1016_v32 = vadd.f32 %v6389_v33, %v699_v45  ;;  %v1421_v57 = vpop.permute.xlu1 %1420  ;;  %v3486_v45 = vld [vmem:[%s6262_s3 + $0x1c8] sm:$0xff] }
 0x460   : > { %6387 = vst [vmem:[#allocation32_spill] sm:$0xff] %v4992_v8  ;;  %2377 = vmatpush.msrb.mxu3 %v3486_v45  ;;  %v6393_v8 = vld [vmem:[#allocation5_spill] sm:$0xff] }
 0x461   : > { %v1275_v33 = vmax.f32 %v1016_v32, 0.0  ;;  %v1423_v32 = vpop.permute.xlu2 %1422 }
 0x463   : > { %3431 = vmatmul.msk.f32.gmra.mxu2 %vm1623_vm1, %v4486_v16 }
 0x464   : > { %3454 = vmatmul.msk.f32.gmra.mxu3 %vm1623_vm1, %v4486_v16  ;;  %v3462_v16 = vld [vmem:[%s6262_s3 + $0x188] sm:$0xff] }
 0x465   : > { %2284 = vmatpush.msra.mxu2 %v3462_v16 }
 0x466   : > { %v5003_v2 = vpop.f32.mrf.mxu2  ;;  %v5005_v41 = vpop.f32.mrf.mxu3 }
 0x467   : > { %6390 = vst [vmem:[#allocation33_spill] sm:$0xff] %v5003_v2  ;;  %v6392_v2 = vld [vmem:[#allocation4_spill] sm:$0xff]  ;;  %2285 = vmatpush.msra.mxu2 %v3461_v59 }
 0x468   : > { %6391 = vst [vmem:[#allocation34_spill] sm:$0xff] %v5005_v41  ;;  %v702_v41 = vadd.f32 %v4532_v7, %v6392_v2  ;;  %v705_v2 = vadd.f32 %v4532_v7, %v6396_v1 }
 0x46a   : > { %v1019_v20 = vadd.f32 %v6393_v8, %v702_v41  ;;  %v6397_v8 = vld [vmem:[#allocation7_spill] sm:$0xff] }
 0x46b   : > { %3432 = vmatmul.msk.f32.gmra.mxu2 %vm1623_vm1, %v4508_v5 }
 0x46c   : > { %3455 = vmatmul.msk.f32.gmra.mxu3 %vm1623_vm1, %v4508_v5  ;;  %v1476_v5 = vsel %vm1455_vm0, %v1275_v33, %v1421_v57  ;;  %v1276_v46 = vmax.f32 %v1019_v20, 0.0  ;;  %v3485_v57 = vld [vmem:[%s6262_s3 + $0x1c0] sm:$0xff]  ;;  %v1425_v20 = vpop.permute.xlu0 %1424  ;;  %v6399_v33 = vld [vmem:[#allocation8_spill] sm:$0xff] }
 0x46d   : > { %2378 = vmatpush.msrb.mxu3 %v3485_v57  ;;  %v708_v1 = vadd.f32 %v4532_v7, %v6399_v33  ;;  %v1806_v57 = vadd.f32 %v4823_v44, %v4806_v21  ;;  %v1809_v21 = vadd.f32 %v4836_v13, %v4825_v22  ;;  %v6402_v44 = vld [vmem:[#allocation11_spill] sm:$0xff] }
 0x46e   : > { %v5025_v48 = vpop.f32.mrf.mxu2  ;;  %v5027_v30 = vpop.f32.mrf.mxu3  ;;  %v1477_v16 = vsel %vm1455_vm0, %v1276_v46, %v1423_v32  ;;  %v6400_v46 = vld [vmem:[#allocation9_spill] sm:$0xff] }
 0x46f   : > { %6394 = vst [vmem:[#allocation36_spill] sm:$0xff] %v5025_v48  ;;  %v1025_v32 = vadd.f32 %v6400_v46, %v708_v1  ;;  %v6401_v48 = vld [vmem:[#allocation10_spill] sm:$0xff]  ;;  %v1429_v46 = vpop.permute.xlu2 %1428 }
 0x470   : > { %6395 = vst [vmem:[#allocation35_spill] sm:$0xff] %v5027_v30  ;;  %v711_v33 = vadd.f32 %v4532_v7, %v6401_v48  ;;  %v1812_v48 = vadd.f32 %v4861_v60, %v4849_v54 }
 0x473   : > { %3433 = vmatmul.msk.f32.gmra.mxu2 %vm1623_vm1, %v1476_v5 }
 0x474   : > { %3456 = vmatmul.msk.f32.gmra.mxu3 %vm1623_vm1, %v4524_v25  ;;  %v1022_v25 = vadd.f32 %v6397_v8, %v705_v2 }
 0x476   : > { %v1277_v45 = vmax.f32 %v1022_v25, 0.0  ;;  %v1278_v25 = vmax.f32 %v1025_v32, 0.0 }
 0x478   : > { %v1478_v5 = vsel %vm1455_vm0, %v1277_v45, %v1425_v20 }
 0x47b   : > { %3434 = vmatmul.msk.f32.gmra.mxu2 %vm1623_vm1, %v1477_v16 }
 0x47c   : > { %3457 = vmatmul.msk.f32.gmra.mxu3 %vm1623_vm1, %v1477_v16 }
 0x47e   : > { %v1927_v41 = vpop.f32.mrf.mxu2  ;;  %v5038_v59 = vpop.f32.mrf.mxu3 }
 0x47f   : > { %6398 = vst [vmem:[#allocation37_spill] sm:$0xff] %v5038_v59  ;;  %v1949_v2 = vadd.f32 %v1927_v41, %v1806_v57  ;;  %v1427_v59 = vpop.permute.xlu1 %1426  ;;  %v1028_v41 = vadd.f32 %v6402_v44, %v711_v33  ;;  %v1770_v33 = vadd.f32 %v4573_v61, %v4568_v34 }
 0x480   : > { %v1479_v20 = vsel %vm1455_vm0, %v1278_v25, %v1427_v59 }
 0x481   : > { %v1279_v32 = vmax.f32 %v1028_v41, 0.0  ;;  %v1776_v41 = vadd.f32 %v4601_v40, %v4592_v58 }
 0x483   : > { %3435 = vmatmul.msk.f32.gmra.mxu2 %vm1623_vm1, %v1478_v5  ;;  %v1480_v7 = vsel %vm1455_vm0, %v1279_v32, %v1429_v46  ;;  %v1785_v32 = vadd.f32 %v4677_v35, %v4667_v26  ;;  %v6403_v35 = vld [vmem:[#allocation28_spill] sm:$0xff] }
 0x484   : > { %3458 = vmatmul.msk.f32.gmra.mxu3 %vm1623_vm1, %v1478_v5 }
 0x486   : > { %v1930_v16 = vpop.f32.mrf.mxu2  ;;  %v2029_v8 = vpop.f32.mrf.mxu3 }
 0x487   : > { %v5048_v30 = vadd.f32 %v2029_v8, %v1949_v2  ;;  %v1950_v45 = vadd.f32 %v1930_v16, %v1809_v21  ;;  %v1767_v2 = vadd.f32 %v4564_v27, %v4562_v50  ;;  %v1937_v50 = vadd.f32 %v4874_v10, %v1770_v33  ;;  %v6408_v33 = vld [vmem:[#allocation25_spill] sm:$0xff] }
 0x488   : > { %v1773_v21 = vadd.f32 %v4584_v23, %v4577_v19  ;;  %v1939_v19 = vadd.f32 %v4906_v42, %v1776_v41  ;;  %v6412_v41 = vld [vmem:[#allocation26_spill] sm:$0xff] }
 0x489   : > { %v1936_v8 = vadd.f32 %v4863_v14, %v1767_v2  ;;  %v2039_v27 = vadd.f32 %v4894_v56, %v1937_v50  ;;  %v6409_v50 = vld [vmem:[#allocation47_spill] sm:$0xff] }
 0x48a   : > { %v1938_v34 = vadd.f32 %v4892_v0, %v1773_v21  ;;  %v2041_v23 = vadd.f32 %v4916_v9, %v1939_v19 }
 0x48b   : > { %3436 = vmatmul.msk.f32.gmra.mxu2 %vm1623_vm1, %v1479_v20 }
 0x48c   : > { %3459 = vmatmul.msk.f32.gmra.mxu3 %vm1623_vm1, %v1479_v20  ;;  %v2040_v61 = vadd.f32 %v4908_v53, %v1938_v34  ;;  %v6410_v34 = vld [vmem:[#allocation48_spill] sm:$0xff] }
 0x48e   : > { %v1933_v1 = vpop.f32.mrf.mxu2  ;;  %v2032_v5 = vpop.f32.mrf.mxu3 }
 0x48f   : > { %v5058_v57 = vadd.f32 %v2032_v5, %v1950_v45  ;;  %v1951_v22 = vadd.f32 %v1933_v1, %v1812_v48  ;;  %v1788_v48 = vadd.f32 %v4700_v28, %v4679_v15 }
 0x491   : > { %v1943_v26 = vadd.f32 %v4954_v37, %v1788_v48 }
 0x493   : > { %3469 = vmatmul.msk.f32.vlgmr.msra.gmra.mxu2 %vm1623_vm1, %v4653_v63  ;;  %v2038_v63 = vadd.f32 %v4876_v3, %v1936_v8  ;;  %v6405_v8 = vld [vmem:[#allocation23_spill] sm:$0xff] }
 0x494   : > { %3460 = vmatmul.msk.f32.gmra.mxu3 %vm1623_vm1, %v1480_v7 }
 0x496   : > { %v2092_v13 = vpop.f32.mrf.mxu2 }
 0x497   : > { %v2035_v59 = vpop.f32.mrf.mxu3  ;;  %v2140_v54 = vadd.f32 %v2092_v13, %v2038_v63  ;;  %v6404_v13 = vld [vmem:[#allocation22_spill] sm:$0xff] }
 0x498   : > { %v5068_v16 = vadd.f32 %v2035_v59, %v1951_v22 }
 0x49b   : > { %3470 = vmatmul.msk.f32.gmra.mxu2 %vm1623_vm1, %v4650_v39 }
 0x49c   : > { %3493 = vmatmul.msk.f32.vlgmr.msrb.gmra.mxu3 %vm1623_vm1, %v4650_v39 }
 0x49e   : > { %v2095_v60 = vpop.f32.mrf.mxu2 }
 0x49f   : > { %v2185_v25 = vpop.f32.mrf.mxu3  ;;  %v2141_v14 = vadd.f32 %v2095_v60, %v2039_v27  ;;  %v6407_v60 = vld [vmem:[#allocation46_spill] sm:$0xff] }
 0x4a0   : > { %v5078_v20 = vadd.f32 %v2185_v25, %v2140_v54  ;;  %v3608_v54 = vld [vmem:[%s6261_s2] ss:$0 sm:$0xff] }
 0x4a1   : > { %v774_v25 = vadd.f32 %v3608_v54, %v6407_v60 }
 0x4a3   : > { %3471 = vmatmul.msk.f32.gmra.mxu2 %vm1623_vm1, %v4690_v12  ;;  %v1091_v27 = vadd.f32 %v6409_v50, %v774_v25 }
 0x4a4   : > { %3494 = vmatmul.msk.f32.gmra.mxu3 %vm1623_vm1, %v4690_v12 }
 0x4a5   : > { %v1300_v21 = vmax.f32 %v1091_v27, 0.0  ;;  %v3532_v27 = vld [vmem:[%s6264_s5 + $0x178] sm:$0xff] }
 0x4a6   : > { %v2098_v39 = vpop.f32.mrf.mxu2  ;;  %2606 = vmatpush.msra.mxu3 %v3532_v27 }
 0x4a7   : > { %v2188_v3 = vpop.f32.mrf.mxu3  ;;  %v2142_v10 = vadd.f32 %v2098_v39, %v2040_v61  ;;  %v1547_v39 = vpop.permute.xlu0 %1546  ;;  %v777_v61 = vadd.f32 %v3608_v54, %v6410_v34  ;;  %v3530_v34 = vld [vmem:[%s6264_s5 + $0x168] sm:$0xff] }
 0x4a8   : > { %v5088_v44 = vadd.f32 %v2188_v3, %v2141_v14 }
 0x4ab   : > { %3472 = vmatmul.msk.f32.gmra.mxu2 %vm1623_vm1, %v4710_v51 }
 0x4ac   : > { %3495 = vmatmul.msk.f32.gmra.mxu3 %vm1623_vm1, %v4710_v51  ;;  %v1779_v51 = vadd.f32 %v4624_v36, %v4609_v38  ;;  %v1782_v38 = vadd.f32 %v4647_v24, %v4636_v11  ;;  %v1942_v11 = vadd.f32 %v4938_v43, %v1785_v32  ;;  %v2045_v43 = vadd.f32 %v6403_v35, %v1943_v26  ;;  %v6418_v35 = vld [vmem:[#allocation55_spill] sm:$0xff] }
 0x4ae   : > { %v2101_v12 = vpop.f32.mrf.mxu2  ;;  %v1940_v58 = vadd.f32 %v4914_v4, %v1779_v51  ;;  %v1941_v4 = vadd.f32 %v4928_v47, %v1782_v38  ;;  %v2044_v24 = vadd.f32 %v4956_v55, %v1942_v11 }
 0x4af   : > { %v2191_v56 = vpop.f32.mrf.mxu3  ;;  %v2143_v0 = vadd.f32 %v2101_v12, %v2041_v23  ;;  %v6411_v12 = vld [vmem:[#allocation49_spill] sm:$0xff]  ;;  %v1549_v23 = vpop.permute.xlu1 %1548 }
 0x4b0   : > { %v5098_v45 = vadd.f32 %v2191_v56, %v2142_v10  ;;  %v2043_v5 = vadd.f32 %v4940_v62, %v1941_v4  ;;  %v1601_v10 = vsel %vm1455_vm0, %v1300_v21, %v1547_v39  ;;  %v1094_v56 = vadd.f32 %v6411_v12, %v777_v61  ;;  %v3531_v21 = vld [vmem:[%s6264_s5 + $0x170] sm:$0xff]  ;;  %v3529_v61 = vld [vmem:[%s6264_s5 + $0x160] sm:$0xff]  ;;  %v3528_v12 = vld [vmem:[%s6264_s5 + $0x158] sm:$0xff] }
 0x4b1   : > { %2607 = vmatpush.msra.mxu3 %v3531_v21  ;;  %v2521_v21 = vld [vmem:[%s6264_s5 + $0xa8] sm:$0xff] }
 0x4b3   : > { %3473 = vmatmul.msk.f32.gmra.mxu2 %vm1623_vm1, %v4744_v31  ;;  %v2042_v31 = vadd.f32 %v4932_v6, %v1940_v58  ;;  %2608 = vmatpush.msra.mxu3 %v3530_v34  ;;  %v6419_v34 = vld [vmem:[#allocation14_spill] sm:$0xff] }
 0x4b4   : > { %3496 = vmatmul.msk.f32.gmra.mxu3 %vm1623_vm1, %v4730_v29 }
 0x4b5   : > { %2609 = vmatpush.msra.mxu3 %v3529_v61  ;;  %v6420_v61 = vld [vmem:[#allocation15_spill] sm:$0xff] }
 0x4b6   : > { %v2104_v53 = vpop.f32.mrf.mxu2 }
 0x4b7   : > { %v2194_v1 = vpop.f32.mrf.mxu3  ;;  %v2144_v42 = vadd.f32 %v2104_v53, %v2042_v31  ;;  %v6413_v53 = vld [vmem:[#allocation50_spill] sm:$0xff]  ;;  %v6414_v31 = vld [vmem:[#allocation51_spill] sm:$0xff]  ;;  %2610 = vmatpush.msra.mxu3 %v3528_v12  ;;  %v1794_v12 = vadd.f32 %v6420_v61, %v6419_v34 }
 0x4b8   : > { %v5109_v40 = vadd.f32 %v2194_v1, %v2143_v0  ;;  %v1301_v0 = vmax.f32 %v1094_v56, 0.0  ;;  %v780_v1 = vadd.f32 %v3608_v54, %v6413_v53  ;;  %v6426_v61 = vld [vmem:[#allocation34_spill] sm:$0xff] }
 0x4ba   : > { %v1602_v58 = vsel %vm1455_vm0, %v1301_v0, %v1549_v23  ;;  %v3526_v23 = vld [vmem:[%s6264_s5 + $0x148] sm:$0xff]  ;;  %v3525_v0 = vld [vmem:[%s6264_s5 + $0x140] sm:$0xff] }
 0x4bb   : > { %3474 = vmatmul.msk.f32.gmra.mxu2 %vm1623_vm1, %v4757_v49 }
 0x4bc   : > { %3497 = vmatmul.msk.f32.gmra.mxu3 %vm1623_vm1, %v4757_v49 }
 0x4be   : > { %v2107_v29 = vpop.f32.mrf.mxu2 }
 0x4bf   : > { %v2197_v9 = vpop.f32.mrf.mxu3  ;;  %v2145_v6 = vadd.f32 %v2107_v29, %v2043_v5  ;;  %v6415_v5 = vld [vmem:[#allocation52_spill] sm:$0xff] }
 0x4c0   : > { %v5118_v36 = vadd.f32 %v2197_v9, %v2144_v42  ;;  %v1097_v42 = vadd.f32 %v6414_v31, %v780_v1  ;;  %v1551_v9 = vpop.permute.xlu2 %1550 }
 0x4c2   : > { %v1302_v4 = vmax.f32 %v1097_v42, 0.0 }
 0x4c3   : > { %3475 = vmatmul.msk.f32.gmra.mxu2 %vm1623_vm1, %v4774_v17 }
 0x4c4   : > { %3498 = vmatmul.msk.f32.gmra.mxu3 %vm1623_vm1, %v4774_v17 }
 0x4c6   : > { %v2110_v49 = vpop.f32.mrf.mxu2 }
 0x4c7   : > { %v2200_v46 = vpop.f32.mrf.mxu3  ;;  %v2146_v62 = vadd.f32 %v2110_v49, %v2044_v24  ;;  %v1603_v49 = vsel %vm1455_vm0, %v1302_v4, %v1551_v9  ;;  %v1553_v24 = vpop.permute.xlu0 %1552 }
 0x4c8   : > { %v5128_v7 = vadd.f32 %v2200_v46, %v2145_v6  ;;  %v783_v6 = vadd.f32 %v3608_v54, %v6415_v5  ;;  %v6416_v46 = vld [vmem:[#allocation53_spill] sm:$0xff]  ;;  %v5264_v5 = vld [vmem:[%s6263_s4] ss:$0 sm:$0xff] }
 0x4ca   : > { %v1100_v32 = vadd.f32 %v6416_v46, %v783_v6  ;;  %v3524_v46 = vld [vmem:[%s6264_s5 + $0x138] sm:$0xff] }
 0x4cb   : > { %3476 = vmatmul.msk.f32.gmra.mxu2 %vm1623_vm1, %v4793_v52 }
 0x4cc   : > { %3499 = vmatmul.msk.f32.gmra.mxu3 %vm1623_vm1, %v4793_v52  ;;  %2569 = vmatpush.msrb.mxu2 %v3524_v46  ;;  %v2519_v46 = vld [vmem:[%s6264_s5 + $0x98] sm:$0xff] }
 0x4ce   : > { %v2113_v17 = vpop.f32.mrf.mxu2 }
 0x4cf   : > { %v2203_v47 = vpop.f32.mrf.mxu3  ;;  %v2147_v55 = vadd.f32 %v2113_v17, %v2045_v43  ;;  %v1303_v17 = vmax.f32 %v1100_v32, 0.0 }
 0x4d0   : > { %v5138_v22 = vadd.f32 %v2203_v47, %v2146_v62  ;;  %v6417_v47 = vld [vmem:[#allocation54_spill] sm:$0xff] }
 0x4d1   : > { %v786_v48 = vadd.f32 %v3608_v54, %v6417_v47  ;;  %v1604_v26 = vsel %vm1455_vm0, %v1303_v17, %v1553_v24 }
 0x4d3   : > { %3477 = vmatmul.msk.f32.gmra.mxu2 %vm1623_vm1, %v4809_v18  ;;  %v6406_v18 = vld [vmem:[#allocation24_spill] sm:$0xff]  ;;  %v1103_v43 = vadd.f32 %v6418_v35, %v786_v48 }
 0x4d4   : > { %3500 = vmatmul.msk.f32.gmra.mxu3 %vm1623_vm1, %v6404_v13 }
 0x4d6   : > { %v5146_v52 = vpop.f32.mrf.mxu2 }
 0x4d7   : > { %v2206_v59 = vpop.f32.mrf.mxu3 }
 0x4d8   : > { %v5148_v2 = vadd.f32 %v2206_v59, %v2147_v55  ;;  %v1555_v59 = vpop.permute.xlu1 %1554 }
 0x4db   : > { %3478 = vmatmul.msk.f32.gmra.mxu2 %vm1623_vm1, %v6405_v8 }
 0x4dc   : > { %3501 = vmatmul.msk.f32.gmra.mxu3 %vm1623_vm1, %v6405_v8  ;;  %v1304_v8 = vmax.f32 %v1103_v43, 0.0 }
 0x4de   : > { %v5154_v15 = vpop.f32.mrf.mxu2 }
 0x4df   : > { %v5156_v28 = vpop.f32.mrf.mxu3 }
 0x4e3   : > { %3479 = vmatmul.msk.f32.gmra.mxu2 %vm1623_vm1, %v6406_v18 }
 0x4e4   : > { %3502 = vmatmul.msk.f32.gmra.mxu3 %vm1623_vm1, %v6406_v18  ;;  %v1605_v18 = vsel %vm1455_vm0, %v1304_v8, %v1555_v59  ;;  %v3523_v59 = vld [vmem:[%s6264_s5 + $0x130] sm:$0xff] }
 0x4e5   : > { %2570 = vmatpush.msrb.mxu2 %v3523_v59 }
 0x4e6   : > { %v5162_v37 = vpop.f32.mrf.mxu2 }
 0x4e7   : > { %v5164_v63 = vpop.f32.mrf.mxu3 }
 0x4eb   : > { %3480 = vmatmul.msk.f32.gmra.mxu2 %vm1623_vm1, %v6408_v33 }
 0x4ec   : > { %3503 = vmatmul.msk.f32.gmra.mxu3 %vm1623_vm1, %v6408_v33 }
 0x4ee   : > { %v5175_v14 = vpop.f32.mrf.mxu2 }
 0x4ef   : > { %v5177_v3 = vpop.f32.mrf.mxu3 }
 0x4f3   : > { %3481 = vmatmul.msk.f32.gmra.mxu2 %vm1623_vm1, %v1601_v10 }
 0x4f4   : > { %3504 = vmatmul.msk.f32.gmra.mxu3 %vm1623_vm1, %v6412_v41  ;;  %v3527_v41 = vld [vmem:[%s6264_s5 + $0x150] sm:$0xff] }
 0x4f5   : > { %2611 = vmatpush.msra.mxu3 %v3527_v41 }
 0x4f6   : > { %v5185_v19 = vpop.f32.mrf.mxu2 }
 0x4f7   : > { %v5187_v51 = vpop.f32.mrf.mxu3  ;;  %2612 = vmatpush.msra.mxu3 %v3526_v23 }
 0x4f9   : > { %2613 = vmatpush.msra.mxu3 %v3525_v0  ;;  %v3522_v0 = vld [vmem:[%s6264_s5 + $0x128] sm:$0xff] }
 0x4fa   : > { %2571 = vmatpush.msrb.mxu2 %v3522_v0 }
 0x4fb   : > { %3482 = vmatmul.msk.f32.gmra.mxu2 %vm1623_vm1, %v1602_v58 }
 0x4fc   : > { %3505 = vmatmul.msk.f32.gmra.mxu3 %vm1623_vm1, %v1602_v58 }
 0x4fe   : > { %v5194_v29 = vpop.f32.mrf.mxu2 }
 0x4ff   : > { %v5196_v38 = vpop.f32.mrf.mxu3 }
 0x503   : > { %3483 = vmatmul.msk.f32.gmra.mxu2 %vm1623_vm1, %v1603_v49 }
 0x504   : > { %3506 = vmatmul.msk.f32.gmra.mxu3 %vm1623_vm1, %v1603_v49 }
 0x506   : > { %v5203_v11 = vpop.f32.mrf.mxu2 }
 0x507   : > { %v5205_v62 = vpop.f32.mrf.mxu3 }
 0x50b   : > { %3484 = vmatmul.msk.f32.gmra.mxu2 %vm1623_vm1, %v1604_v26 }
 0x50c   : > { %3507 = vmatmul.msk.f32.gmra.mxu3 %vm1623_vm1, %v1604_v26 }
 0x50e   : > { %v5212_v13 = vpop.f32.mrf.mxu2 }
 0x50f   : > { %v5214_v55 = vpop.f32.mrf.mxu3 }
 0x514   : > { %3508 = vmatmul.msk.f32.gmra.mxu3 %vm1623_vm1, %v1605_v18  ;;  %v2523_v18 = vld [vmem:[%s6264_s5 + $0xb8] sm:$0xff] }
 0x515   : > { %2669 = vmatpush.msrb.mxu3 %v2523_v18  ;;  %v2516_v18 = vld [vmem:[%s6264_s5 + $0x80] sm:$0xff] }
 0x516   : > { %v5218_v60 = vpop.f32.mrf.mxu2 }
 0x517   : > { %v5220_v54 = vpop.f32.mrf.mxu3 }
 0x51e   : > { %v2290_v25 = vpop.f32.mrf.mxu2 }
 0x51f   : > { %v5222_v33 = vpop.f32.mrf.mxu3  ;;  %v2336_v48 = vadd.f32 %v2290_v25, %v5088_v44 }
 0x526   : > { %v5224_v50 = vpop.f32.mrf.mxu2 }
 0x527   : > { %v2383_v39 = vpop.f32.mrf.mxu3 }
 0x528   : > { %v2429_v35 = vadd.f32 %v2383_v39, %v2336_v48  ;;  %v2517_v48 = vld [vmem:[%s6264_s5 + $0x88] sm:$0xff] }
 0x52a   : > { %v5295_v25 = vadd.f32 %v5264_v5, %v2429_v35  ;;  %v6424_v35 = vld [vmem:[#allocation18_spill] sm:$0xff] }
 0x52c   : > { %v2465_v23 = vmax.f32 %v5295_v25, 0.0 }
 0x52e   : > { %v5238_v10 = vpop.f32.mrf.mxu2 }
 0x52f   : > { %v5243_v56 = vpop.f32.mrf.mxu3 }
 0x536   : > { %v5254_v53 = vpop.f32.mrf.mxu2 }
 0x537   : > { %v5256_v1 = vpop.f32.mrf.mxu3 }
 0x53e   : > { %v2302_v58 = vpop.f32.mrf.mxu2 }
 0x53f   : > { %v5258_v31 = vpop.f32.mrf.mxu3  ;;  %v2340_v42 = vadd.f32 %v2302_v58, %v5128_v7  ;;  %v2520_v58 = vld [vmem:[%s6264_s5 + $0xa0] sm:$0xff] }
 0x546   : > { %v2305_v9 = vpop.f32.mrf.mxu2 }
 0x547   : > { %v2395_v4 = vpop.f32.mrf.mxu3  ;;  %v2341_v7 = vadd.f32 %v2305_v9, %v5138_v22 }
 0x548   : > { %v2433_v6 = vadd.f32 %v2395_v4, %v2340_v42  ;;  %v6421_v42 = vld [vmem:[#allocation29_spill] sm:$0xff] }
 0x549   : > { %v1945_v9 = vadd.f32 %v6421_v42, %v1794_v12  ;;  %v2337_v42 = vadd.f32 %v5224_v50, %v5098_v45  ;;  %v6432_v50 = vld [vmem:[#allocation36_spill] sm:$0xff] }
 0x54a   : > { %v5267_v49 = vadd.f32 %v5264_v5, %v2433_v6 }
 0x54c   : > { %v2469_v32 = vmax.f32 %v5267_v49, 0.0  ;;  %v2502_v49 = vld [vmem:[%s6264_s5 + $0x10] sm:$0xff] }
 0x54e   : > { %2488 = vrot.lane.b32.xlu2 %v2469_v32, %s3618_s21  ;;  %v2308_v24 = vpop.f32.mrf.mxu2 }
 0x54f   : > { %v2398_v17 = vpop.f32.mrf.mxu3  ;;  %v2342_v22 = vadd.f32 %v2308_v24, %v5148_v2  ;;  %v2522_v2 = vld [vmem:[%s6264_s5 + $0xb0] sm:$0xff] }
 0x550   : > { %v2434_v47 = vadd.f32 %v2398_v17, %v2341_v7  ;;  %2670 = vmatpush.msrb.mxu3 %v2522_v2  ;;  %v6422_v7 = vld [vmem:[#allocation32_spill] sm:$0xff] }
 0x551   : > { %v2047_v24 = vadd.f32 %v6422_v7, %v1945_v9  ;;  %v2518_v17 = vld [vmem:[%s6264_s5 + $0x90] sm:$0xff]  ;;  %v6427_v9 = vld [vmem:[#allocation17_spill] sm:$0xff] }
 0x552   : > { %v2454_v26 = vadd.f32 %v5264_v5, %v2434_v47  ;;  %2671 = vmatpush.msrb.mxu3 %v2521_v21 }
 0x553   : > { %v2149_v47 = vadd.f32 %v5154_v15, %v2047_v24  ;;  %v6425_v15 = vld [vmem:[#allocation31_spill] sm:$0xff] }
 0x554   : > { %v5279_v43 = vmax.f32 %v2454_v26, 0.0  ;;  %2672 = vmatpush.msrb.mxu3 %v2520_v58  ;;  %v6423_v26 = vld [vmem:[#allocation16_spill] sm:$0xff] }
 0x555   : > { %v1797_v59 = vadd.f32 %v6424_v35, %v6423_v26  ;;  %v2430_v26 = vadd.f32 %v5243_v56, %v2337_v42  ;;  %v6431_v35 = vld [vmem:[#allocation33_spill] sm:$0xff]  ;;  %v3519_v42 = vld [vmem:[%s6264_s5 + $0x110] sm:$0xff] }
 0x556   : > { %2490 = vrot.lane.b32.xlu0 %v5279_v43, %s3618_s21  ;;  %3533 = vmatmul.msk.f32.vlgmr.msra.gmra.mxu3 %vm1623_vm1, %v5279_v43  ;;  %v5289_v8 = vpop.f32.mrf.mxu2 }
 0x557   : > { %v2401_v44 = vpop.f32.mrf.mxu3  ;;  %2673 = vmatpush.msrb.mxu3 %v2519_v46  ;;  %v6428_v46 = vld [vmem:[#allocation19_spill] sm:$0xff] }
 0x558   : > { %v2435_v27 = vadd.f32 %v2401_v44, %v2342_v22  ;;  %v2242_v22 = vadd.f32 %v5164_v63, %v2149_v47  ;;  %v3521_v44 = vld [vmem:[%s6264_s5 + $0x120] sm:$0xff]  ;;  %v1800_v7 = vadd.f32 %v6428_v46, %v6427_v9  ;;  %v6429_v47 = vld [vmem:[#allocation20_spill] sm:$0xff] }
 0x559   : > { %2674 = vmatpush.msrb.mxu3 %v2518_v17  ;;  %2572 = vmatpush.msrb.mxu2 %v3521_v44  ;;  %v3520_v17 = vld [vmem:[%s6264_s5 + $0x118] sm:$0xff] }
 0x55a   : > { %v5301_v39 = vadd.f32 %v5264_v5, %v2435_v27  ;;  %v1946_v27 = vadd.f32 %v6425_v15, %v1797_v59  ;;  %v1947_v59 = vadd.f32 %v6431_v35, %v1800_v7  ;;  %v3562_v35 = vld [vmem:[%s6264_s5 + $0x228] sm:$0xff] }
 0x55b   : > { %2675 = vmatpush.msrb.mxu3 %v2517_v48  ;;  %v6430_v48 = vld [vmem:[#allocation21_spill] sm:$0xff]  ;;  %2573 = vmatpush.msrb.mxu2 %v3520_v17 }
 0x55c   : > { %v2471_v41 = vmax.f32 %v5301_v39, 0.0  ;;  %v2048_v12 = vadd.f32 %v6426_v61, %v1946_v27  ;;  %v2450_v61 = vadd.f32 %v5264_v5, %v2430_v26  ;;  %v3516_v26 = vld [vmem:[%s6264_s5 + $0xf8] sm:$0xff] }
 0x55d   : > { %2676 = vmatpush.msrb.mxu3 %v2516_v18  ;;  %v6433_v18 = vld [vmem:[#allocation35_spill] sm:$0xff]  ;;  %2574 = vmatpush.msrb.mxu2 %v3519_v42 }
 0x55e   : > { %3534 = vmatmul.msk.f32.gmra.mxu3 %vm1623_vm1, %v2471_v41  ;;  %2484 = vrot.lane.b32.xlu0 %v2465_v23, %s3618_s21  ;;  %v2314_v4 = vpop.f32.mrf.mxu2  ;;  %v2150_v63 = vadd.f32 %v5162_v37, %v2048_v12  ;;  %v1803_v37 = vadd.f32 %v6430_v48, %v6429_v47  ;;  %v2049_v15 = vadd.f32 %v6433_v18, %v1947_v59  ;;  %v2466_v46 = vmax.f32 %v2450_v61, 0.0  ;;  %v3517_v47 = vld [vmem:[%s6264_s5 + $0x100] sm:$0xff]  ;;  %v3563_v48 = vld [vmem:[%s6264_s5 + $0x230] sm:$0xff] }
 0x55f   : > { %v5323_v6 = vpop.f32.mrf.mxu3  ;;  %v2344_v2 = vadd.f32 %v2314_v4, %v2242_v22  ;;  %v3513_v18 = vld [vmem:[%s6264_s5 + $0xe0] sm:$0xff]  ;;  %v2153_v61 = vadd.f32 %v5194_v29, %v5048_v30  ;;  %v3510_v29 = vld [vmem:[%s6264_s5 + $0xc8] sm:$0xff] }
 0x560   : > { %v2243_v24 = vadd.f32 %v5177_v3, %v2150_v63  ;;  %v1948_v22 = vadd.f32 %v6432_v50, %v1803_v37  ;;  %v2151_v56 = vadd.f32 %v5175_v14, %v2049_v15  ;;  %v3514_v50 = vld [vmem:[%s6264_s5 + $0xe8] sm:$0xff]  ;;  %v3557_v30 = vld [vmem:[%s6264_s5 + $0x200] sm:$0xff] }
 0x566   : > { %v2317_v21 = vpop.f32.mrf.mxu2 }
 0x567   : > { %v2407_v34 = vpop.f32.mrf.mxu3  ;;  %v2345_v45 = vadd.f32 %v2317_v21, %v2243_v24  ;;  %v3518_v24 = vld [vmem:[%s6264_s5 + $0x108] sm:$0xff] }
 0x568   : > { %v2437_v0 = vadd.f32 %v2407_v34, %v2344_v2  ;;  %v6434_v2 = vld [vmem:[#allocation37_spill] sm:$0xff]  ;;  %2575 = vmatpush.msrb.mxu2 %v3518_v24 }
 0x569   : > { %v2050_v34 = vadd.f32 %v6434_v2, %v1948_v22  ;;  %v3560_v22 = vld [vmem:[%s6264_s5 + $0x218] sm:$0xff] }
 0x56a   : > { %v5349_v58 = vadd.f32 %v5264_v5, %v2437_v0  ;;  %v2244_v0 = vadd.f32 %v5187_v51, %v2151_v56  ;;  %2576 = vmatpush.msrb.mxu2 %v3517_v47  ;;  %v2338_v56 = vadd.f32 %v5238_v10, %v5109_v40 }
 0x56b   : > { %v2152_v21 = vadd.f32 %v5185_v19, %v2050_v34  ;;  %v3512_v34 = vld [vmem:[%s6264_s5 + $0xd8] sm:$0xff] }
 0x56c   : > { %v2473_v4 = vmax.f32 %v5349_v58, 0.0  ;;  %2577 = vmatpush.msrb.mxu2 %v3516_v26  ;;  %v2431_v42 = vadd.f32 %v5256_v1, %v2338_v56  ;;  %v3509_v1 = vld [vmem:[%s6264_s5 + $0xc0] sm:$0xff] }
 0x56d   : > { %v2245_v9 = vadd.f32 %v5196_v38, %v2152_v21  ;;  %v3564_v38 = vld [vmem:[%s6264_s5 + $0x238] sm:$0xff]  ;;  %v3511_v21 = vld [vmem:[%s6264_s5 + $0xd0] sm:$0xff] }
 0x56e   : > { %2526 = vrot.lane.b32.xlu1 %v2473_v4, %s3618_s21  ;;  %v2320_v3 = vpop.f32.mrf.mxu2  ;;  %2767 = vmatpush.msra.mxu3 %v3564_v38 }
 0x56f   : > { %v2410_v44 = vpop.f32.mrf.mxu3  ;;  %v2346_v7 = vadd.f32 %v2320_v3, %v2244_v0  ;;  %v3561_v3 = vld [vmem:[%s6264_s5 + $0x220] sm:$0xff]  ;;  %v2246_v0 = vadd.f32 %v5205_v62, %v2153_v61  ;;  %v2451_v62 = vadd.f32 %v5264_v5, %v2431_v42  ;;  %v6436_v42 = vld [vmem:[#allocation13_spill] sm:$0xff] }
 0x570   : > { %v2438_v27 = vadd.f32 %v2410_v44, %v2345_v45  ;;  %2768 = vmatpush.msra.mxu3 %v3563_v48  ;;  %v3515_v45 = vld [vmem:[%s6264_s5 + $0xf0] sm:$0xff] }
 0x571   : > { %2578 = vmatpush.msrb.mxu2 %v3515_v45 }
 0x572   : > { %v2458_v12 = vadd.f32 %v5264_v5, %v2438_v27  ;;  %2769 = vmatpush.msra.mxu3 %v3562_v35  ;;  %v3559_v27 = vld [vmem:[%s6264_s5 + $0x210] sm:$0xff] }
 0x573   : > { %2579 = vmatpush.msrb.mxu2 %v3514_v50  ;;  %v2510_v50 = vld [vmem:[%s6264_s5 + $0x50] sm:$0xff] }
 0x574   : > { %v5375_v63 = vmax.f32 %v2458_v12, 0.0  ;;  %2770 = vmatpush.msra.mxu3 %v3561_v3  ;;  %v3558_v12 = vld [vmem:[%s6264_s5 + $0x208] sm:$0xff] }
 0x575   : > { %2580 = vmatpush.msrb.mxu2 %v3513_v18  ;;  %v2508_v18 = vld [vmem:[%s6264_s5 + $0x40] sm:$0xff] }
 0x576   : > { %3535 = vmatmul.msk.f32.gmra.mxu3 %vm1623_vm1, %v5375_v63  ;;  %2528 = vrot.lane.b32.xlu2 %v5375_v63, %s3618_s21  ;;  %v2323_v14 = vpop.f32.mrf.mxu2 }
 0x577   : > { %2486 = vrot.lane.b32.xlu1 %v2466_v46, %s3618_s21  ;;  %v2347_v19 = vadd.f32 %v2323_v14, %v2245_v9  ;;  %v2413_v51 = vpop.f32.mrf.mxu3  ;;  %2771 = vmatpush.msra.mxu3 %v3560_v22 }
 0x578   : > { %v2439_v17 = vadd.f32 %v2413_v51, %v2346_v7  ;;  %2581 = vmatpush.msrb.mxu2 %v3512_v34  ;;  %v2154_v7 = vadd.f32 %v5203_v11, %v5058_v57  ;;  %v2467_v51 = vmax.f32 %v2451_v62, 0.0  ;;  %v2505_v34 = vld [vmem:[%s6264_s5 + $0x28] sm:$0xff] }
 0x579   : > { %2772 = vmatpush.msra.mxu3 %v3559_v27  ;;  %v2507_v27 = vld [vmem:[%s6264_s5 + $0x38] sm:$0xff] }
 0x57a   : > { %v5399_v37 = vadd.f32 %v5264_v5, %v2439_v17  ;;  %2582 = vmatpush.msrb.mxu2 %v3511_v21  ;;  %v2503_v21 = vld [vmem:[%s6264_s5 + $0x18] sm:$0xff] }
 0x57b   : > { %2773 = vmatpush.msra.mxu3 %v3558_v12  ;;  %v2504_v12 = vld [vmem:[%s6264_s5 + $0x20] sm:$0xff] }
 0x57c   : > { %v2475_v59 = vmax.f32 %v5399_v37, 0.0  ;;  %2583 = vmatpush.msrb.mxu2 %v3510_v29  ;;  %v2512_v37 = vld [vmem:[%s6264_s5 + $0x60] sm:$0xff]  ;;  %v2501_v29 = vld [vmem:[%s6264_s5 + $0x8] sm:$0xff] }
 0x57d   : > { %2774 = vmatpush.msra.mxu3 %v3557_v30 }
 0x57e   : > { %3536 = vmatmul.msk.f32.gmra.mxu3 %vm1623_vm1, %v2475_v59  ;;  %v2326_v2 = vpop.f32.mrf.mxu2  ;;  %2584 = vmatpush.msrb.mxu2 %v3509_v1 }
 0x57f   : > { %v2416_v44 = vpop.f32.mrf.mxu3  ;;  %v2348_v40 = vadd.f32 %v2326_v2, %v2246_v0  ;;  %v2506_v2 = vld [vmem:[%s6264_s5 + $0x30] sm:$0xff] }
 0x580   : > { %v5426_v15 = vadd.f32 %v2416_v44, %v2347_v19  ;;  %v2247_v19 = vadd.f32 %v5214_v55, %v2154_v7  ;;  %v2339_v55 = vadd.f32 %v5254_v53, %v5118_v36  ;;  %v2155_v36 = vadd.f32 %v5212_v13, %v5068_v16  ;;  %v2513_v16 = vld [vmem:[%s6264_s5 + $0x68] sm:$0xff]  ;;  %v6435_v0 = vld [vmem:[#allocation12_spill] sm:$0xff]  ;;  %v3556_v7 = vld [vmem:[%s6264_s5 + $0x1f8] sm:$0xff] }
 0x581   : > { %v2509_v44 = vld [vmem:[%s6264_s5 + $0x48] sm:$0xff]  ;;  %v1791_v30 = vadd.f32 %v6436_v42, %v6435_v0 }
 0x582   : > { %v2432_v48 = vadd.f32 %v5258_v31, %v2339_v55  ;;  %v2248_v31 = vadd.f32 %v5220_v54, %v2155_v36 }
 0x584   : > { %v2452_v26 = vadd.f32 %v5264_v5, %v2432_v48  ;;  %v3549_v48 = vld [vmem:[%s6264_s5 + $0x1c0] sm:$0xff] }
 0x586   : > { %3537 = vmatmul.msk.f32.vlgmr.msrb.gmra.mxu3 %vm1623_vm1, %v2466_v46  ;;  %v2329_v14 = vpop.f32.mrf.mxu2  ;;  %v2468_v35 = vmax.f32 %v2452_v26, 0.0  ;;  %v3548_v26 = vld [vmem:[%s6264_s5 + $0x1b8] sm:$0xff] }
 0x587   : > { %v2419_v10 = vpop.f32.mrf.mxu3  ;;  %v2349_v38 = vadd.f32 %v2329_v14, %v2247_v19  ;;  %v3555_v19 = vld [vmem:[%s6264_s5 + $0x1f0] sm:$0xff] }
 0x588   : > { %v2441_v9 = vadd.f32 %v2419_v10, %v2348_v40  ;;  %v6438_v10 = vld [vmem:[#allocation30_spill] sm:$0xff] }
 0x58a   : > { %v5460_v46 = vadd.f32 %v5264_v5, %v2441_v9  ;;  %v2500_v9 = vld [vmem:[%s6264_s5] sm:$0xff] }
 0x58c   : > { %v2477_v24 = vmax.f32 %v5460_v46, 0.0 }
 0x58e   : > { %2692 = vrot.lane.b32.xlu2 %v2477_v24, %s3618_s21  ;;  %3538 = vmatmul.msk.f32.gmra.mxu3 %vm1623_vm1, %v2467_v51  ;;  %v2332_v53 = vpop.f32.mrf.mxu2 }
 0x58f   : > { %v2422_v17 = vpop.f32.mrf.mxu3  ;;  %v2350_v3 = vadd.f32 %v2332_v53, %v2248_v31  ;;  %v3546_v53 = vld [vmem:[%s6264_s5 + $0x1a8] sm:$0xff] }
 0x590   : > { %v2442_v47 = vadd.f32 %v2422_v17, %v2349_v38  ;;  %v3554_v38 = vld [vmem:[%s6264_s5 + $0x1e8] sm:$0xff]  ;;  %v3552_v17 = vld [vmem:[%s6264_s5 + $0x1d8] sm:$0xff] }
 0x592   : > { %v2462_v57 = vadd.f32 %v5264_v5, %v2442_v47 }
 0x594   : > { %v2478_v11 = vmax.f32 %v2462_v57, 0.0 }
 0x596   : > { %3539 = vmatmul.msk.f32.gmra.mxu3 %vm1623_vm1, %v5279_v43  ;;  %2694 = vrot.lane.b32.xlu0 %v2478_v11, %s3618_s21 }
 0x597   : > { %v2425_v39 = vpop.f32.mrf.mxu3 }
 0x598   : > { %v2443_v13 = vadd.f32 %v2425_v39, %v2350_v3 }
 0x59a   : > { %v2463_v54 = vadd.f32 %v5264_v5, %v2443_v13 }
 0x59c   : > { %v2479_v22 = vmax.f32 %v2463_v54, 0.0 }
 0x59e   : > { %3540 = vmatmul.msk.f32.gmra.mxu3 %vm1623_vm1, %v2471_v41  ;;  %v2515_v41 = vld [vmem:[%s6264_s5 + $0x78] sm:$0xff] }
 0x59f   : > { %2632 = vmatpush.msra.mxu2 %v2515_v41  ;;  %v3545_v41 = vld [vmem:[%s6264_s5 + $0x1a0] sm:$0xff] }
 0x5a6   : > { %3565 = vmatmul.msk.f32.vlgmr.msra.gmra.mxu3 %vm1623_vm1, %v5375_v63  ;;  %v2514_v63 = vld [vmem:[%s6264_s5 + $0x70] sm:$0xff] }
 0x5a7   : > { %2633 = vmatpush.msra.mxu2 %v2514_v63 }
 0x5a8   : > { %v2489_v45 = vpop.permute.xlu2 %2488 }
 0x5a9   : > { %v5482_v43 = vsel %vm1623_vm1, %v2468_v35, %v2489_v45  ;;  %2634 = vmatpush.msra.mxu2 %v2513_v16  ;;  %v3547_v35 = vld [vmem:[%s6264_s5 + $0x1b0] sm:$0xff]  ;;  %v2335_v45 = vadd.f32 %v5218_v60, %v5078_v20  ;;  %v3544_v20 = vld [vmem:[%s6264_s5 + $0x198] sm:$0xff]  ;;  %v3541_v16 = vld [vmem:[%s6264_s5 + $0x180] sm:$0xff] }
 0x5aa   : > { %2585 = vmatmul.f32.vlgmr.msrb.gmra.mxu2 %v5482_v43 }
 0x5ab   : > { %2635 = vmatpush.msra.mxu2 %v2512_v37  ;;  %v2428_v31 = vadd.f32 %v5222_v33, %v2335_v45  ;;  %v3543_v33 = vld [vmem:[%s6264_s5 + $0x190] sm:$0xff]  ;;  %v2460_v37 = vadd.f32 %v5264_v5, %v5426_v15  ;;  %v2914_v45 = vld [vmem:[%s6266_s7 + $0x320] sm:$0xff] }
 0x5ad   : > { %v2448_v60 = vadd.f32 %v5264_v5, %v2428_v31  ;;  %v2846_v31 = vld [vmem:[%s6266_s7 + $0x100] sm:$0xff] }
 0x5ae   : > { %3566 = vmatmul.msk.f32.gmra.mxu3 %vm1623_vm1, %v2475_v59  ;;  %v2511_v59 = vld [vmem:[%s6264_s5 + $0x58] sm:$0xff] }
 0x5af   : > { %2636 = vmatpush.msra.mxu2 %v2511_v59  ;;  %v2464_v63 = vmax.f32 %v2448_v60, 0.0 }
 0x5b1   : > { %2637 = vmatpush.msra.mxu2 %v2510_v50  ;;  %v2476_v50 = vmax.f32 %v2460_v37, 0.0 }
 0x5b3   : > { %2638 = vmatpush.msra.mxu2 %v2509_v44 }
 0x5b5   : > { %2639 = vmatpush.msra.mxu2 %v2508_v18 }
 0x5b6   : > { %3567 = vmatmul.msk.f32.gmra.mxu3 %vm1623_vm1, %v2478_v11 }
 0x5b7   : > { %2640 = vmatpush.msra.mxu2 %v2507_v27 }
 0x5b9   : > { %2641 = vmatpush.msra.mxu2 %v2506_v2 }
 0x5bb   : > { %2642 = vmatpush.msra.mxu2 %v2505_v34 }
 0x5bd   : > { %2643 = vmatpush.msra.mxu2 %v2504_v12 }
 0x5be   : > { %3568 = vmatmul.msk.f32.gmra.mxu3 %vm1623_vm1, %v2479_v22 }
 0x5bf   : > { %2644 = vmatpush.msra.mxu2 %v2503_v21 }
 0x5c1   : > { %2645 = vmatpush.msra.mxu2 %v2502_v49 }
 0x5c3   : > { %2646 = vmatpush.msra.mxu2 %v2501_v29 }
 0x5c5   : > { %2647 = vmatpush.msra.mxu2 %v2500_v9 }
 0x5c7   : > { %2730 = vmatpush.msrb.mxu2 %v3556_v7 }
 0x5c8   : > { %v2491_v61 = vpop.permute.xlu0 %2490 }
 0x5c9   : > { %v5530_v56 = vsel %vm1623_vm1, %v2469_v32, %v2491_v61  ;;  %v6437_v32 = vld [vmem:[#allocation27_spill] sm:$0xff]  ;;  %2731 = vmatpush.msrb.mxu2 %v3555_v19  ;;  %v2938_v19 = vld [vmem:[%s6266_s7 + $0x3e0] sm:$0xff] }
 0x5ca   : > { %2588 = vmatmul.f32.gmra.mxu2 %v5530_v56  ;;  %v1944_v40 = vadd.f32 %v6437_v32, %v1791_v30  ;;  %2972 = vmatpush.msrb.mxu3 %v2938_v19  ;;  %v2927_v19 = vld [vmem:[%s6266_s7 + $0x388] sm:$0xff] }
 0x5cb   : > { %2732 = vmatpush.msrb.mxu2 %v3554_v38 }
 0x5cc   : > { %v2046_v62 = vadd.f32 %v6438_v10, %v1944_v40 }
 0x5ce   : > { %v2148_v1 = vadd.f32 %v5146_v52, %v2046_v62 }
 0x5d0   : > { %v2241_v14 = vadd.f32 %v5156_v28, %v2148_v1  ;;  %v3553_v28 = vld [vmem:[%s6264_s5 + $0x1e0] sm:$0xff]  ;;  %v2529_v36 = vpop.permute.xlu2 %2528  ;;  %v2485_v58 = vpop.permute.xlu0 %2484 }
 0x5d1   : > { %2733 = vmatpush.msrb.mxu2 %v3553_v28  ;;  %v2533_v39 = vsel %vm1623_vm1, %v2473_v4, %v2529_v36  ;;  %v3542_v4 = vld [vmem:[%s6264_s5 + $0x188] sm:$0xff]  ;;  %v2496_v3 = vsel %vm1623_vm1, %v2464_v63, %v2485_v58  ;;  %v5634_v1 = vld [vmem:[%s6265_s6] ss:$0 sm:$0xff] }
 0x5d2   : > { %v2343_v51 = vadd.f32 %v5289_v8, %v2241_v14  ;;  %v3551_v8 = vld [vmem:[%s6264_s5 + $0x1d0] sm:$0xff]  ;;  %v2874_v14 = vld [vmem:[%s6266_s7 + $0x1e0] sm:$0xff] }
 0x5d3   : > { %2734 = vmatpush.msrb.mxu2 %v3552_v17  ;;  %v2866_v17 = vld [vmem:[%s6266_s7 + $0x1a0] sm:$0xff] }
 0x5d4   : > { %v2436_v52 = vadd.f32 %v5323_v6, %v2343_v51  ;;  %v3550_v6 = vld [vmem:[%s6264_s5 + $0x1c8] sm:$0xff]  ;;  %v2870_v51 = vld [vmem:[%s6266_s7 + $0x1c0] sm:$0xff] }
 0x5d5   : > { %2735 = vmatpush.msrb.mxu2 %v3551_v8  ;;  %v2862_v8 = vld [vmem:[%s6266_s7 + $0x180] sm:$0xff] }
 0x5d6   : > { %v2456_v47 = vadd.f32 %v5264_v5, %v2436_v52  ;;  %v2934_v52 = vld [vmem:[%s6266_s7 + $0x3c0] sm:$0xff] }
 0x5d7   : > { %2736 = vmatpush.msrb.mxu2 %v3550_v6  ;;  %2973 = vmatpush.msrb.mxu3 %v2934_v52  ;;  %v2926_v6 = vld [vmem:[%s6266_s7 + $0x380] sm:$0xff]  ;;  %v2855_v52 = vld [vmem:[%s6266_s7 + $0x148] sm:$0xff] }
 0x5d8   : > { %v2472_v57 = vmax.f32 %v2456_v47, 0.0  ;;  %v2930_v47 = vld [vmem:[%s6266_s7 + $0x3a0] sm:$0xff] }
 0x5d9   : > { %2737 = vmatpush.msrb.mxu2 %v3549_v48  ;;  %2974 = vmatpush.msrb.mxu3 %v2930_v47  ;;  %v2854_v48 = vld [vmem:[%s6266_s7 + $0x140] sm:$0xff]  ;;  %v2851_v47 = vld [vmem:[%s6266_s7 + $0x128] sm:$0xff] }
 0x5da   : > { %v2842_v58 = vld [vmem:[%s6266_s7 + $0xe0] sm:$0xff] }
 0x5db   : > { %2738 = vmatpush.msrb.mxu2 %v3548_v26  ;;  %2975 = vmatpush.msrb.mxu3 %v2926_v6  ;;  %v2918_v26 = vld [vmem:[%s6266_s7 + $0x340] sm:$0xff]  ;;  %v2847_v6 = vld [vmem:[%s6266_s7 + $0x108] sm:$0xff] }
 0x5dd   : > { %2739 = vmatpush.msrb.mxu2 %v3547_v35  ;;  %v2850_v35 = vld [vmem:[%s6266_s7 + $0x120] sm:$0xff] }
 0x5df   : > { %2740 = vmatpush.msrb.mxu2 %v3546_v53 }
 0x5e0   : > { %v2527_v11 = vpop.permute.xlu1 %2526 }
 0x5e1   : > { %v2532_v55 = vsel %vm1623_vm1, %v2472_v57, %v2527_v11  ;;  %2741 = vmatpush.msrb.mxu2 %v3545_v41  ;;  %v2858_v11 = vld [vmem:[%s6266_s7 + $0x160] sm:$0xff] }
 0x5e2   : > { %2591 = vmatmul.f32.gmra.mxu2 %v2532_v55 }
 0x5e3   : > { %2742 = vmatpush.msrb.mxu2 %v3544_v20 }
 0x5e5   : > { %2743 = vmatpush.msrb.mxu2 %v3543_v33 }
 0x5e7   : > { %2744 = vmatpush.msrb.mxu2 %v3542_v4  ;;  %v2906_v4 = vld [vmem:[%s6266_s7 + $0x2e0] sm:$0xff] }
 0x5e8   : > { %v2693_v59 = vpop.permute.xlu2 %2692 }
 0x5e9   : > { %2745 = vmatpush.msrb.mxu2 %v3541_v16  ;;  %v2487_v13 = vpop.permute.xlu1 %2486  ;;  %v2698_v22 = vsel %vm1623_vm1, %v2476_v50, %v2693_v59 }
 0x5ea   : > { %2594 = vmatmul.f32.gmra.mxu2 %v2533_v39  ;;  %v2497_v54 = vsel %vm1623_vm1, %v2465_v23, %v2487_v13  ;;  %v2615_v23 = vpop.f32.mrf.mxu3  ;;  %v2838_v13 = vld [vmem:[%s6266_s7 + $0xc0] sm:$0xff] }
 0x5f2   : > { %2648 = vmatmul.f32.vlgmr.msra.gmra.mxu2 %v2496_v3 }
 0x5f3   : > { %2952 = vmatpush.msra.mxu2 %v2874_v14  ;;  %v2863_v14 = vld [vmem:[%s6266_s7 + $0x188] sm:$0xff] }
 0x5f5   : > { %2953 = vmatpush.msra.mxu2 %v2870_v51  ;;  %v2859_v51 = vld [vmem:[%s6266_s7 + $0x168] sm:$0xff] }
 0x5f7   : > { %2954 = vmatpush.msra.mxu2 %v2866_v17  ;;  %v2919_v17 = vld [vmem:[%s6266_s7 + $0x348] sm:$0xff] }
 0x5f9   : > { %2955 = vmatpush.msra.mxu2 %v2862_v8  ;;  %v2915_v8 = vld [vmem:[%s6266_s7 + $0x328] sm:$0xff] }
 0x5fa   : > { %2651 = vmatmul.f32.gmra.mxu2 %v2497_v54  ;;  %v2902_v54 = vld [vmem:[%s6266_s7 + $0x2c0] sm:$0xff] }
 0x5fb   : > { %2956 = vmatpush.msra.mxu2 %v2858_v11  ;;  %v2843_v11 = vld [vmem:[%s6266_s7 + $0xe8] sm:$0xff] }
 0x5fd   : > { %2957 = vmatpush.msra.mxu2 %v2854_v48  ;;  %v2839_v48 = vld [vmem:[%s6266_s7 + $0xc8] sm:$0xff] }
 0x5ff   : > { %2958 = vmatpush.msra.mxu2 %v2850_v35  ;;  %v2835_v35 = vld [vmem:[%s6266_s7 + $0xa8] sm:$0xff] }
 0x601   : > { %2959 = vmatpush.msra.mxu2 %v2846_v31  ;;  %v2827_v31 = vld [vmem:[%s6266_s7 + $0x68] sm:$0xff] }
 0x602   : > { %2654 = vmatmul.f32.gmra.mxu2 %v5482_v43  ;;  %v2618_v43 = vpop.f32.mrf.mxu3 }
 0x603   : > { %2960 = vmatpush.msra.mxu2 %v2842_v58  ;;  %v2815_v58 = vld [vmem:[%s6266_s7 + $0x8] sm:$0xff] }
 0x605   : > { %2961 = vmatpush.msra.mxu2 %v2838_v13 }
 0x608   : > { %v2695_v44 = vpop.permute.xlu0 %2694 }
 0x609   : > { %v2699_v25 = vsel %vm1623_vm1, %v2477_v24, %v2695_v44  ;;  %v2898_v44 = vld [vmem:[%s6266_s7 + $0x2a0] sm:$0xff] }
 0x60a   : > { %2657 = vmatmul.f32.gmra.mxu2 %v5530_v56  ;;  %v2621_v18 = vpop.f32.mrf.mxu3 }
 0x612   : > { %2746 = vmatmul.f32.vlgmr.msrb.gmra.mxu2 %v2532_v55  ;;  %v5625_v2 = vpop.f32.mrf.mxu3  ;;  %v2922_v55 = vld [vmem:[%s6266_s7 + $0x360] sm:$0xff] }
 0x613   : > { %2976 = vmatpush.msrb.mxu3 %v2922_v55  ;;  %v2907_v55 = vld [vmem:[%s6266_s7 + $0x2e8] sm:$0xff] }
 0x615   : > { %2977 = vmatpush.msrb.mxu3 %v2918_v26  ;;  %v2903_v26 = vld [vmem:[%s6266_s7 + $0x2c8] sm:$0xff] }
 0x617   : > { %2978 = vmatpush.msrb.mxu3 %v2914_v45  ;;  %v2899_v45 = vld [vmem:[%s6266_s7 + $0x2a8] sm:$0xff] }
 0x61a   : > { %2749 = vmatmul.f32.gmra.mxu2 %v2533_v39  ;;  %v2678_v5 = vpop.f32.mrf.mxu3  ;;  %v2910_v39 = vld [vmem:[%s6266_s7 + $0x300] sm:$0xff] }
 0x61b   : > { %2979 = vmatpush.msrb.mxu3 %v2910_v39  ;;  %v2891_v39 = vld [vmem:[%s6266_s7 + $0x268] sm:$0xff] }
 0x61d   : > { %2980 = vmatpush.msrb.mxu3 %v2906_v4  ;;  %v2879_v4 = vld [vmem:[%s6266_s7 + $0x208] sm:$0xff] }
 0x61f   : > { %2981 = vmatpush.msrb.mxu3 %v2902_v54 }
 0x621   : > { %2982 = vmatpush.msrb.mxu3 %v2898_v44 }
 0x622   : > { %2752 = vmatmul.f32.gmra.mxu2 %v2698_v22  ;;  %v5627_v56 = vpop.f32.mrf.mxu3  ;;  %v2834_v22 = vld [vmem:[%s6266_s7 + $0xa0] sm:$0xff] }
 0x623   : > { %2962 = vmatpush.msra.mxu2 %v2834_v22 }
 0x62a   : > { %2755 = vmatmul.f32.gmra.mxu2 %v2699_v25  ;;  %v2684_v42 = vpop.f32.mrf.mxu3 }
 0x62d   : > { %v2586_v27 = vpop.f32.mrf.mxu2 }
 0x62e   : > { %v2616_v12 = vadd.f32 %v2615_v23, %v2586_v27  ;;  %v2830_v23 = vld [vmem:[%s6266_s7 + $0x80] sm:$0xff] }
 0x62f   : > { %2963 = vmatpush.msra.mxu2 %v2830_v23  ;;  %v2932_v23 = vld [vmem:[%s6266_s7 + $0x3b0] sm:$0xff] }
 0x632   : > { %v5629_v24 = vpop.f32.mrf.mxu3 }
 0x63a   : > { %v2776_v29 = vpop.f32.mrf.mxu3 }
 0x642   : > { %v2779_v38 = vpop.f32.mrf.mxu3 }
 0x64a   : > { %v2782_v36 = vpop.f32.mrf.mxu3 }
 0x64d   : > { %v2589_v34 = vpop.f32.mrf.mxu2 }
 0x64e   : > { %v2619_v53 = vadd.f32 %v2618_v43, %v2589_v34  ;;  %v2894_v43 = vld [vmem:[%s6266_s7 + $0x280] sm:$0xff] }
 0x64f   : > { %2983 = vmatpush.msrb.mxu3 %v2894_v43  ;;  %v2864_v43 = vld [vmem:[%s6266_s7 + $0x190] sm:$0xff] }
 0x665   : > { %v2592_v61 = vpop.f32.mrf.mxu2 }
 0x666   : > { %v2622_v30 = vadd.f32 %v2621_v18, %v2592_v61  ;;  %v2785_v18 = vpop.f32.mrf.mxu3  ;;  %v2826_v61 = vld [vmem:[%s6266_s7 + $0x60] sm:$0xff] }
 0x667   : > { %2964 = vmatpush.msra.mxu2 %v2826_v61  ;;  %v2920_v61 = vld [vmem:[%s6266_s7 + $0x350] sm:$0xff] }
 0x66d   : > { %v2595_v15 = vpop.f32.mrf.mxu2 }
 0x66e   : > { %v2625_v63 = vadd.f32 %v5625_v2, %v2595_v15 }
 0x675   : > { %v2649_v21 = vpop.f32.mrf.mxu2 }
 0x676   : > { %v2650_v0 = vadd.f32 %v2649_v21, %v2616_v12  ;;  %v2822_v12 = vld [vmem:[%s6266_s7 + $0x40] sm:$0xff] }
 0x677   : > { %v2886_v21 = vld [vmem:[%s6266_s7 + $0x240] sm:$0xff]  ;;  %2965 = vmatpush.msra.mxu2 %v2822_v12  ;;  %v2912_v12 = vld [vmem:[%s6266_s7 + $0x310] sm:$0xff] }
 0x678   : > { %v2679_v62 = vadd.f32 %v2678_v5, %v2650_v0  ;;  %v2890_v5 = vld [vmem:[%s6266_s7 + $0x260] sm:$0xff] }
 0x679   : > { %2984 = vmatpush.msrb.mxu3 %v2890_v5  ;;  %v2852_v5 = vld [vmem:[%s6266_s7 + $0x130] sm:$0xff] }
 0x67b   : > { %2985 = vmatpush.msrb.mxu3 %v2886_v21  ;;  %v2844_v21 = vld [vmem:[%s6266_s7 + $0xf0] sm:$0xff] }
 0x67d   : > { %v2652_v46 = vpop.f32.mrf.mxu2 }
 0x67e   : > { %v2653_v20 = vadd.f32 %v2652_v46, %v2619_v53  ;;  %v2882_v46 = vld [vmem:[%s6266_s7 + $0x220] sm:$0xff]  ;;  %v2895_v53 = vld [vmem:[%s6266_s7 + $0x288] sm:$0xff] }
 0x67f   : > { %2986 = vmatpush.msrb.mxu3 %v2882_v46  ;;  %v2904_v46 = vld [vmem:[%s6266_s7 + $0x2d0] sm:$0xff] }
 0x680   : > { %v2682_v37 = vadd.f32 %v5627_v56, %v2653_v20  ;;  %v2887_v20 = vld [vmem:[%s6266_s7 + $0x248] sm:$0xff] }
 0x685   : > { %v2655_v49 = vpop.f32.mrf.mxu2 }
 0x686   : > { %v2656_v32 = vadd.f32 %v2655_v49, %v2622_v30  ;;  %v2814_v49 = vld [vmem:[%s6266_s7] sm:$0xff] }
 0x688   : > { %v2685_v60 = vadd.f32 %v2684_v42, %v2656_v32  ;;  %v2818_v42 = vld [vmem:[%s6266_s7 + $0x20] sm:$0xff] }
 0x689   : > { %v2878_v32 = vld [vmem:[%s6266_s7 + $0x200] sm:$0xff]  ;;  %2966 = vmatpush.msra.mxu2 %v2818_v42  ;;  %v2840_v42 = vld [vmem:[%s6266_s7 + $0xd0] sm:$0xff] }
 0x68a   : > { %2987 = vmatpush.msrb.mxu3 %v2878_v32  ;;  %v2896_v32 = vld [vmem:[%s6266_s7 + $0x290] sm:$0xff] }
 0x68b   : > { %2967 = vmatpush.msra.mxu2 %v2814_v49  ;;  %v2832_v49 = vld [vmem:[%s6266_s7 + $0x90] sm:$0xff] }
 0x68d   : > { %v2658_v40 = vpop.f32.mrf.mxu2 }
 0x68e   : > { %v2659_v59 = vadd.f32 %v2658_v40, %v2625_v63  ;;  %v2875_v40 = vld [vmem:[%s6266_s7 + $0x1e8] sm:$0xff] }
 0x68f   : > { %2992 = vmatpush.msrb.mxu2 %v2875_v40  ;;  %v2828_v40 = vld [vmem:[%s6266_s7 + $0x70] sm:$0xff] }
 0x690   : > { %v2688_v2 = vadd.f32 %v5629_v24, %v2659_v59  ;;  %v2940_v59 = vld [vmem:[%s6266_s7 + $0x3f0] sm:$0xff] }
 0x695   : > { %v2747_v10 = vpop.f32.mrf.mxu2 }
 0x696   : > { %v2777_v9 = vadd.f32 %v2776_v29, %v2747_v10  ;;  %v2939_v10 = vld [vmem:[%s6266_s7 + $0x3e8] sm:$0xff] }
 0x697   : > { %3012 = vmatpush.msra.mxu3 %v2939_v10  ;;  %v2824_v10 = vld [vmem:[%s6266_s7 + $0x50] sm:$0xff] }
 0x698   : > { %v2788_v7 = vadd.f32 %v2777_v9, %v2679_v62  ;;  %v2871_v62 = vld [vmem:[%s6266_s7 + $0x1c8] sm:$0xff] }
 0x699   : > { %v2935_v9 = vld [vmem:[%s6266_s7 + $0x3c8] sm:$0xff]  ;;  %2993 = vmatpush.msrb.mxu2 %v2871_v62  ;;  %v2888_v62 = vld [vmem:[%s6266_s7 + $0x250] sm:$0xff] }
 0x69a   : > { %v5649_v28 = vadd.f32 %v5634_v1, %v2788_v7  ;;  %v2931_v7 = vld [vmem:[%s6266_s7 + $0x3a8] sm:$0xff]  ;;  %3013 = vmatpush.msra.mxu3 %v2935_v9  ;;  %v2820_v9 = vld [vmem:[%s6266_s7 + $0x30] sm:$0xff] }
 0x69c   : > { %3014 = vmatpush.msra.mxu3 %v2931_v7  ;;  %v2816_v7 = vld [vmem:[%s6266_s7 + $0x10] sm:$0xff] }
 0x69d   : > { %v2750_v57 = vpop.f32.mrf.mxu2 }
 0x69e   : > { %v2780_v3 = vadd.f32 %v2779_v38, %v2750_v57  ;;  %v2923_v38 = vld [vmem:[%s6266_s7 + $0x368] sm:$0xff]  ;;  %3015 = vmatpush.msra.mxu3 %v2927_v19  ;;  %v2877_v19 = vld [vmem:[%s6266_s7 + $0x1f8] sm:$0xff] }
 0x69f   : > { %v2911_v57 = vld [vmem:[%s6266_s7 + $0x308] sm:$0xff] }
 0x6a0   : > { %v2789_v25 = vadd.f32 %v2780_v3, %v2682_v37  ;;  %3016 = vmatpush.msra.mxu3 %v2923_v38  ;;  %v2800_v3 = vmax.f32 %v5649_v28, 0.0  ;;  %v2876_v37 = vld [vmem:[%s6266_s7 + $0x1f0] sm:$0xff]  ;;  %v2873_v38 = vld [vmem:[%s6266_s7 + $0x1d8] sm:$0xff] }
 0x6a1   : > { %v2872_v28 = vld [vmem:[%s6266_s7 + $0x1d0] sm:$0xff] }
 0x6a2   : > { %v2797_v15 = vadd.f32 %v5634_v1, %v2789_v25  ;;  %3017 = vmatpush.msra.mxu3 %v2919_v17  ;;  %v2868_v25 = vld [vmem:[%s6266_s7 + $0x1b0] sm:$0xff]  ;;  %v2869_v17 = vld [vmem:[%s6266_s7 + $0x1b8] sm:$0xff] }
 0x6a4   : > { %v2801_v30 = vmax.f32 %v2797_v15, 0.0  ;;  %3018 = vmatpush.msra.mxu3 %v2915_v8  ;;  %v2916_v15 = vld [vmem:[%s6266_s7 + $0x330] sm:$0xff]  ;;  %v2865_v8 = vld [vmem:[%s6266_s7 + $0x198] sm:$0xff] }
 0x6a5   : > { %v2753_v41 = vpop.f32.mrf.mxu2 }
 0x6a6   : > { %v2783_v33 = vadd.f32 %v2782_v36, %v2753_v41  ;;  %3019 = vmatpush.msra.mxu3 %v2911_v57  ;;  %v2831_v36 = vld [vmem:[%s6266_s7 + $0x88] sm:$0xff]  ;;  %v2861_v57 = vld [vmem:[%s6266_s7 + $0x178] sm:$0xff] }
 0x6a7   : > { %v2823_v41 = vld [vmem:[%s6266_s7 + $0x48] sm:$0xff] }
 0x6a8   : > { %v2790_v16 = vadd.f32 %v2783_v33, %v2685_v60  ;;  %3020 = vmatpush.msra.mxu3 %v2907_v55  ;;  %v2819_v60 = vld [vmem:[%s6266_s7 + $0x28] sm:$0xff]  ;;  %v2857_v55 = vld [vmem:[%s6266_s7 + $0x158] sm:$0xff] }
 0x6a9   : > { %v2883_v33 = vld [vmem:[%s6266_s7 + $0x228] sm:$0xff] }
 0x6aa   : > { %v5702_v50 = vadd.f32 %v5634_v1, %v2790_v16  ;;  %3021 = vmatpush.msra.mxu3 %v2903_v26  ;;  %v2853_v26 = vld [vmem:[%s6266_s7 + $0x138] sm:$0xff] }
 0x6ac   : > { %3022 = vmatpush.msra.mxu3 %v2899_v45  ;;  %v2802_v16 = vmax.f32 %v5702_v50, 0.0  ;;  %v2936_v50 = vld [vmem:[%s6266_s7 + $0x3d0] sm:$0xff]  ;;  %v2849_v45 = vld [vmem:[%s6266_s7 + $0x118] sm:$0xff] }
 0x6ad   : > { %v2756_v27 = vpop.f32.mrf.mxu2 }
 0x6ae   : > { %v2786_v34 = vadd.f32 %v2785_v18, %v2756_v27  ;;  %3023 = vmatpush.msra.mxu3 %v2895_v53  ;;  %v2928_v18 = vld [vmem:[%s6266_s7 + $0x390] sm:$0xff]  ;;  %v2845_v53 = vld [vmem:[%s6266_s7 + $0xf8] sm:$0xff] }
 0x6af   : > { %v2860_v27 = vld [vmem:[%s6266_s7 + $0x170] sm:$0xff] }
 0x6b0   : > { %v2791_v56 = vadd.f32 %v2786_v34, %v2688_v2  ;;  %3024 = vmatpush.msra.mxu3 %v2891_v39  ;;  %v2924_v2 = vld [vmem:[%s6266_s7 + $0x370] sm:$0xff]  ;;  %v2841_v39 = vld [vmem:[%s6266_s7 + $0xd8] sm:$0xff] }
 0x6b1   : > { %v2856_v34 = vld [vmem:[%s6266_s7 + $0x150] sm:$0xff] }
 0x6b2   : > { %v2799_v0 = vadd.f32 %v5634_v1, %v2791_v56  ;;  %v2867_v1 = vld [vmem:[%s6266_s7 + $0x1a8] sm:$0xff]  ;;  %3025 = vmatpush.msra.mxu3 %v2887_v20  ;;  %v2848_v56 = vld [vmem:[%s6266_s7 + $0x110] sm:$0xff]  ;;  %v2837_v20 = vld [vmem:[%s6266_s7 + $0xb8] sm:$0xff] }
 0x6b3   : > { %2994 = vmatpush.msrb.mxu2 %v2867_v1  ;;  %v2884_v1 = vld [vmem:[%s6266_s7 + $0x230] sm:$0xff] }
 0x6b4   : > { %v2803_v24 = vmax.f32 %v2799_v0, 0.0  ;;  %3026 = vmatpush.msra.mxu3 %v2883_v33  ;;  %v2908_v0 = vld [vmem:[%s6266_s7 + $0x2f0] sm:$0xff]  ;;  %v2833_v33 = vld [vmem:[%s6266_s7 + $0x98] sm:$0xff] }
 0x6b5   : > { %2995 = vmatpush.msrb.mxu2 %v2863_v14  ;;  %v2880_v14 = vld [vmem:[%s6266_s7 + $0x210] sm:$0xff] }
 0x6b6   : > { %v3598_v29 = vpack.i.bf16 %v2803_v24, %v2801_v30  ;;  %3027 = vmatpush.msra.mxu3 %v2879_v4  ;;  %v2836_v30 = vld [vmem:[%s6266_s7 + $0xb0] sm:$0xff]  ;;  %v2829_v4 = vld [vmem:[%s6266_s7 + $0x78] sm:$0xff] }
 0x6b7   : > { %2996 = vmatpush.msrb.mxu2 %v2859_v51  ;;  %v2900_v24 = vld [vmem:[%s6266_s7 + $0x2b0] sm:$0xff]  ;;  %v2941_v51 = vld [vmem:[%s6266_s7 + $0x3f8] sm:$0xff] }
 0x6b8   : > { %3599 = vrot.lane.b32.xlu1 %v3598_v29, %s3618_s21  ;;  %v2892_v29 = vld [vmem:[%s6266_s7 + $0x270] sm:$0xff] }
 0x6b9   : > { %2997 = vmatpush.msrb.mxu2 %v2855_v52  ;;  %v2937_v52 = vld [vmem:[%s6266_s7 + $0x3d8] sm:$0xff] }
 0x6bb   : > { %2998 = vmatpush.msrb.mxu2 %v2851_v47  ;;  %v2933_v47 = vld [vmem:[%s6266_s7 + $0x3b8] sm:$0xff] }
 0x6bd   : > { %2999 = vmatpush.msrb.mxu2 %v2847_v6  ;;  %v2929_v6 = vld [vmem:[%s6266_s7 + $0x398] sm:$0xff] }
 0x6bf   : > { %3000 = vmatpush.msrb.mxu2 %v2843_v11  ;;  %v2925_v11 = vld [vmem:[%s6266_s7 + $0x378] sm:$0xff] }
 0x6c1   : > { %3001 = vmatpush.msrb.mxu2 %v2839_v48  ;;  %v2921_v48 = vld [vmem:[%s6266_s7 + $0x358] sm:$0xff] }
 0x6c3   : > { %3002 = vmatpush.msrb.mxu2 %v2835_v35  ;;  %v2917_v35 = vld [vmem:[%s6266_s7 + $0x338] sm:$0xff] }
 0x6c5   : > { %3003 = vmatpush.msrb.mxu2 %v2831_v36  ;;  %v2913_v36 = vld [vmem:[%s6266_s7 + $0x318] sm:$0xff] }
 0x6c7   : > { %3004 = vmatpush.msrb.mxu2 %v2827_v31  ;;  %v2909_v31 = vld [vmem:[%s6266_s7 + $0x2f8] sm:$0xff] }
 0x6c9   : > { %3005 = vmatpush.msrb.mxu2 %v2823_v41  ;;  %v2905_v41 = vld [vmem:[%s6266_s7 + $0x2d8] sm:$0xff] }
 0x6cb   : > { %3006 = vmatpush.msrb.mxu2 %v2819_v60  ;;  %v2901_v60 = vld [vmem:[%s6266_s7 + $0x2b8] sm:$0xff] }
 0x6cd   : > { %3007 = vmatpush.msrb.mxu2 %v2815_v58  ;;  %v2897_v58 = vld [vmem:[%s6266_s7 + $0x298] sm:$0xff] }
 0x72a   : > { %v3600_v63 = vpop.permute.xlu1 %3599 }
 0x72b   : > { %v3602_v13 = vunpack.i.h.bf16 %v3600_v63  ;;  %v3601_v54 = vunpack.i.l.bf16 %v3600_v63  ;;  %v2893_v63 = vld [vmem:[%s6266_s7 + $0x278] sm:$0xff] }
 0x72d   : > { %v5849_v22 = vsel %vm1623_vm1, %v2802_v16, %v3602_v13  ;;  %v5852_v44 = vsel %vm1623_vm1, %v2800_v3, %v3601_v54  ;;  %v2825_v3 = vld [vmem:[%s6266_s7 + $0x58] sm:$0xff] }
 0x72e   : > { %2968 = vmatmul.f32.vlgmr.msra.gmra.mxu2 %v5852_v44  ;;  %2988 = vmatmul.f32.vlgmr.msrb.gmra.mxu3 %v5849_v22  ;;  %v2889_v16 = vld [vmem:[%s6266_s7 + $0x258] sm:$0xff] }
 0x72f   : > { %3032 = vmatpush.msra.mxu2 %v2876_v37  ;;  %3052 = vmatpush.msrb.mxu3 %v2940_v59  ;;  %v2821_v13 = vld [vmem:[%s6266_s7 + $0x38] sm:$0xff] }
 0x730   : > { %v2885_v54 = vld [vmem:[%s6266_s7 + $0x238] sm:$0xff] }
 0x731   : > { %3033 = vmatpush.msra.mxu2 %v2872_v28  ;;  %3053 = vmatpush.msrb.mxu3 %v2936_v50  ;;  %v2817_v37 = vld [vmem:[%s6266_s7 + $0x18] sm:$0xff] }
 0x732   : > { %v2881_v59 = vld [vmem:[%s6266_s7 + $0x218] sm:$0xff] }
 0x733   : > { %3034 = vmatpush.msra.mxu2 %v2868_v25  ;;  %3054 = vmatpush.msrb.mxu3 %v2932_v23  ;;  %v3131_v28 = vld [vmem:[%s6268_s9 + $0x78] sm:$0xff]  ;;  %v3130_v25 = vld [vmem:[%s6268_s9 + $0x70] sm:$0xff] }
 0x734   : > { %v3147_v50 = vld [vmem:[%s6268_s9 + $0xf8] sm:$0xff]  ;;  %v3146_v23 = vld [vmem:[%s6268_s9 + $0xf0] sm:$0xff] }
 0x735   : > { %3035 = vmatpush.msra.mxu2 %v2864_v43  ;;  %3055 = vmatpush.msrb.mxu3 %v2928_v18  ;;  %v3129_v43 = vld [vmem:[%s6268_s9 + $0x68] sm:$0xff]  ;;  %v3144_v18 = vld [vmem:[%s6268_s9 + $0xe0] sm:$0xff] }
 0x736   : > { %3008 = vmatmul.f32.vlgmr.msrb.gmra.mxu2 %v5852_v44  ;;  %3028 = vmatmul.f32.vlgmr.msra.gmra.mxu3 %v5849_v22 }
 0x737   : > { %3036 = vmatpush.msra.mxu2 %v2860_v27  ;;  %3056 = vmatpush.msrb.mxu3 %v2924_v2  ;;  %v3127_v27 = vld [vmem:[%s6268_s9 + $0x58] sm:$0xff] }
 0x738   : > { %v3143_v2 = vld [vmem:[%s6268_s9 + $0xd8] sm:$0xff] }
 0x739   : > { %3037 = vmatpush.msra.mxu2 %v2856_v34  ;;  %3057 = vmatpush.msrb.mxu3 %v2920_v61  ;;  %v3126_v34 = vld [vmem:[%s6268_s9 + $0x50] sm:$0xff] }
 0x73a   : > { %v3142_v61 = vld [vmem:[%s6268_s9 + $0xd0] sm:$0xff] }
 0x73b   : > { %3038 = vmatpush.msra.mxu2 %v2852_v5  ;;  %3058 = vmatpush.msrb.mxu3 %v2916_v15  ;;  %v3125_v5 = vld [vmem:[%s6268_s9 + $0x48] sm:$0xff] }
 0x73c   : > { %v3141_v15 = vld [vmem:[%s6268_s9 + $0xc8] sm:$0xff] }
 0x73d   : > { %3039 = vmatpush.msra.mxu2 %v2848_v56  ;;  %3059 = vmatpush.msrb.mxu3 %v2912_v12  ;;  %v3124_v56 = vld [vmem:[%s6268_s9 + $0x40] sm:$0xff] }
 0x73e   : > { %v3140_v12 = vld [vmem:[%s6268_s9 + $0xc0] sm:$0xff] }
 0x73f   : > { %3040 = vmatpush.msra.mxu2 %v2844_v21  ;;  %3060 = vmatpush.msrb.mxu3 %v2908_v0  ;;  %v3123_v21 = vld [vmem:[%s6268_s9 + $0x38] sm:$0xff]  ;;  %v3122_v0 = vld [vmem:[%s6268_s9 + $0x30] sm:$0xff] }
 0x741   : > { %3041 = vmatpush.msra.mxu2 %v2840_v42  ;;  %3061 = vmatpush.msrb.mxu3 %v2904_v46  ;;  %v3121_v42 = vld [vmem:[%s6268_s9 + $0x28] sm:$0xff]  ;;  %v3120_v46 = vld [vmem:[%s6268_s9 + $0x20] sm:$0xff] }
 0x743   : > { %3042 = vmatpush.msra.mxu2 %v2836_v30  ;;  %3062 = vmatpush.msrb.mxu3 %v2900_v24  ;;  %v3119_v30 = vld [vmem:[%s6268_s9 + $0x18] sm:$0xff] }
 0x744   : > { %v3139_v24 = vld [vmem:[%s6268_s9 + $0xb8] sm:$0xff] }
 0x745   : > { %3043 = vmatpush.msra.mxu2 %v2832_v49  ;;  %3063 = vmatpush.msrb.mxu3 %v2896_v32  ;;  %v3118_v49 = vld [vmem:[%s6268_s9 + $0x10] sm:$0xff] }
 0x746   : > { %v3138_v32 = vld [vmem:[%s6268_s9 + $0xb0] sm:$0xff] }
 0x747   : > { %3044 = vmatpush.msra.mxu2 %v2828_v40  ;;  %3064 = vmatpush.msrb.mxu3 %v2892_v29  ;;  %v3117_v40 = vld [vmem:[%s6268_s9 + $0x8] sm:$0xff] }
 0x748   : > { %v3137_v29 = vld [vmem:[%s6268_s9 + $0xa8] sm:$0xff] }
 0x749   : > { %3045 = vmatpush.msra.mxu2 %v2824_v10  ;;  %3065 = vmatpush.msrb.mxu3 %v2888_v62  ;;  %v3116_v10 = vld [vmem:[%s6268_s9] sm:$0xff] }
 0x74a   : > { %v3136_v62 = vld [vmem:[%s6268_s9 + $0xa0] sm:$0xff] }
 0x74b   : > { %3046 = vmatpush.msra.mxu2 %v2820_v9  ;;  %3066 = vmatpush.msrb.mxu3 %v2884_v1  ;;  %v3163_v9 = vld [vmem:[%s6268_s9 + $0x178] sm:$0xff] }
 0x74c   : > { %v3135_v1 = vld [vmem:[%s6268_s9 + $0x98] sm:$0xff] }
 0x74d   : > { %3047 = vmatpush.msra.mxu2 %v2816_v7  ;;  %3067 = vmatpush.msrb.mxu3 %v2880_v14  ;;  %v3162_v7 = vld [vmem:[%s6268_s9 + $0x170] sm:$0xff] }
 0x74e   : > { %3048 = vmatmul.f32.vlgmr.msra.gmra.mxu2 %v5852_v44  ;;  %3068 = vmatmul.f32.vlgmr.msrb.gmra.mxu3 %v5849_v22  ;;  %v3134_v14 = vld [vmem:[%s6268_s9 + $0x90] sm:$0xff] }
 0x74f   : > { %3072 = vmatpush.msrb.mxu2 %v2877_v19  ;;  %3092 = vmatpush.msra.mxu3 %v2941_v51  ;;  %v3161_v19 = vld [vmem:[%s6268_s9 + $0x168] sm:$0xff] }
 0x750   : > { %v3133_v51 = vld [vmem:[%s6268_s9 + $0x88] sm:$0xff] }
 0x751   : > { %3073 = vmatpush.msrb.mxu2 %v2873_v38  ;;  %3093 = vmatpush.msra.mxu3 %v2937_v52  ;;  %v3160_v38 = vld [vmem:[%s6268_s9 + $0x160] sm:$0xff] }
 0x752   : > { %v3132_v52 = vld [vmem:[%s6268_s9 + $0x80] sm:$0xff] }
 0x753   : > { %3074 = vmatpush.msrb.mxu2 %v2869_v17  ;;  %3094 = vmatpush.msra.mxu3 %v2933_v47  ;;  %v3159_v17 = vld [vmem:[%s6268_s9 + $0x158] sm:$0xff]  ;;  %v3158_v47 = vld [vmem:[%s6268_s9 + $0x150] sm:$0xff] }
 0x755   : > { %3075 = vmatpush.msrb.mxu2 %v2865_v8  ;;  %3095 = vmatpush.msra.mxu3 %v2929_v6  ;;  %v3157_v8 = vld [vmem:[%s6268_s9 + $0x148] sm:$0xff]  ;;  %v3156_v6 = vld [vmem:[%s6268_s9 + $0x140] sm:$0xff] }
 0x757   : > { %3076 = vmatpush.msrb.mxu2 %v2861_v57  ;;  %3096 = vmatpush.msra.mxu3 %v2925_v11  ;;  %v3155_v57 = vld [vmem:[%s6268_s9 + $0x138] sm:$0xff]  ;;  %v3154_v11 = vld [vmem:[%s6268_s9 + $0x130] sm:$0xff] }
 0x759   : > { %3077 = vmatpush.msrb.mxu2 %v2857_v55  ;;  %3097 = vmatpush.msra.mxu3 %v2921_v48  ;;  %v6177_v55 = vld [vmem:[%s6267_s8] sm:$0xf]  ;;  %v3153_v48 = vld [vmem:[%s6268_s9 + $0x128] sm:$0xff] }
 0x75b   : > { %3078 = vmatpush.msrb.mxu2 %v2853_v26  ;;  %3098 = vmatpush.msra.mxu3 %v2917_v35  ;;  %v3152_v26 = vld [vmem:[%s6268_s9 + $0x120] sm:$0xff]  ;;  %v2944_v35 = vperm.slane %v6177_v55, 0 }
 0x75d   : > { %3079 = vmatpush.msrb.mxu2 %v2849_v45  ;;  %3099 = vmatpush.msra.mxu3 %v2913_v36 }
 0x75f   : > { %3080 = vmatpush.msrb.mxu2 %v2845_v53  ;;  %3100 = vmatpush.msra.mxu3 %v2909_v31  ;;  %v3151_v53 = vld [vmem:[%s6268_s9 + $0x118] sm:$0xff] }
 0x761   : > { %3081 = vmatpush.msrb.mxu2 %v2841_v39  ;;  %3101 = vmatpush.msra.mxu3 %v2905_v41  ;;  %v3150_v39 = vld [vmem:[%s6268_s9 + $0x110] sm:$0xff] }
 0x763   : > { %3082 = vmatpush.msrb.mxu2 %v2837_v20  ;;  %3102 = vmatpush.msra.mxu3 %v2901_v60  ;;  %v3149_v20 = vld [vmem:[%s6268_s9 + $0x108] sm:$0xff] }
 0x765   : > { %3083 = vmatpush.msrb.mxu2 %v2833_v33  ;;  %3103 = vmatpush.msra.mxu3 %v2897_v58  ;;  %v2945_v33 = vperm.slane %v6177_v55, 1  ;;  %v3148_v58 = vld [vmem:[%s6268_s9 + $0x100] sm:$0xff] }
 0x767   : > { %3084 = vmatpush.msrb.mxu2 %v2829_v4  ;;  %3104 = vmatpush.msra.mxu3 %v2893_v63  ;;  %v3179_v4 = vld [vmem:[%s6268_s9 + $0x1f8] sm:$0xff]  ;;  %v3178_v63 = vld [vmem:[%s6268_s9 + $0x1f0] sm:$0xff] }
 0x769   : > { %3085 = vmatpush.msrb.mxu2 %v2825_v3  ;;  %3105 = vmatpush.msra.mxu3 %v2889_v16 }
 0x76b   : > { %3086 = vmatpush.msrb.mxu2 %v2821_v13  ;;  %3106 = vmatpush.msra.mxu3 %v2885_v54  ;;  %v3177_v13 = vld [vmem:[%s6268_s9 + $0x1e8] sm:$0xff] }
 0x76d   : > { %3087 = vmatpush.msrb.mxu2 %v2817_v37  ;;  %3107 = vmatpush.msra.mxu3 %v2881_v59  ;;  %v3176_v59 = vld [vmem:[%s6268_s9 + $0x1e0] sm:$0xff] }
 0x76e   : > { %3088 = vmatmul.f32.vlgmr.msrb.gmra.mxu2 %v5852_v44  ;;  %3108 = vmatmul.f32.vlgmr.msra.gmra.mxu3 %v5849_v22  ;;  %v3145_v44 = vld [vmem:[%s6268_s9 + $0xe8] sm:$0xff]  ;;  %v3128_v22 = vld [vmem:[%s6268_s9 + $0x60] sm:$0xff] }
 0x76f   : > { %3184 = vmatpush.msra.mxu2 %v3131_v28  ;;  %3204 = vmatpush.msrb.mxu3 %v3147_v50  ;;  %v3175_v50 = vld [vmem:[%s6268_s9 + $0x1d8] sm:$0xff] }
 0x771   : > { %3185 = vmatpush.msra.mxu2 %v3130_v25  ;;  %3205 = vmatpush.msrb.mxu3 %v3146_v23  ;;  %v3174_v25 = vld [vmem:[%s6268_s9 + $0x1d0] sm:$0xff]  ;;  %v3173_v23 = vld [vmem:[%s6268_s9 + $0x1c8] sm:$0xff] }
 0x773   : > { %3186 = vmatpush.msra.mxu2 %v3129_v43  ;;  %3206 = vmatpush.msrb.mxu3 %v3145_v44  ;;  %v3172_v43 = vld [vmem:[%s6268_s9 + $0x1c0] sm:$0xff]  ;;  %v3171_v44 = vld [vmem:[%s6268_s9 + $0x1b8] sm:$0xff] }
 0x775   : > { %3187 = vmatpush.msra.mxu2 %v3128_v22  ;;  %3207 = vmatpush.msrb.mxu3 %v3144_v18  ;;  %v3170_v22 = vld [vmem:[%s6268_s9 + $0x1b0] sm:$0xff]  ;;  %v3169_v18 = vld [vmem:[%s6268_s9 + $0x1a8] sm:$0xff] }
 0x777   : > { %3188 = vmatpush.msra.mxu2 %v3127_v27  ;;  %3208 = vmatpush.msrb.mxu3 %v3143_v2  ;;  %v3168_v27 = vld [vmem:[%s6268_s9 + $0x1a0] sm:$0xff]  ;;  %v2946_v2 = vperm.slane %v6177_v55, 2 }
 0x779   : > { %3189 = vmatpush.msra.mxu2 %v3126_v34  ;;  %3209 = vmatpush.msrb.mxu3 %v3142_v61  ;;  %v3167_v34 = vld [vmem:[%s6268_s9 + $0x198] sm:$0xff] }
 0x77b   : > { %3190 = vmatpush.msra.mxu2 %v3125_v5  ;;  %3210 = vmatpush.msrb.mxu3 %v3141_v15  ;;  %v3166_v15 = vld [vmem:[%s6268_s9 + $0x190] sm:$0xff] }
 0x77d   : > { %3191 = vmatpush.msra.mxu2 %v3124_v56  ;;  %3211 = vmatpush.msrb.mxu3 %v3140_v12 }
 0x77f   : > { %3192 = vmatpush.msra.mxu2 %v3123_v21  ;;  %3212 = vmatpush.msrb.mxu3 %v3139_v24  ;;  %v3165_v21 = vld [vmem:[%s6268_s9 + $0x188] sm:$0xff] }
 0x781   : > { %3193 = vmatpush.msra.mxu2 %v3122_v0  ;;  %3213 = vmatpush.msrb.mxu3 %v3138_v32 }
 0x783   : > { %3194 = vmatpush.msra.mxu2 %v3121_v42  ;;  %3214 = vmatpush.msrb.mxu3 %v3137_v29  ;;  %v3164_v42 = vld [vmem:[%s6268_s9 + $0x180] sm:$0xff] }
 0x785   : > { %3195 = vmatpush.msra.mxu2 %v3120_v46  ;;  %3215 = vmatpush.msrb.mxu3 %v3136_v62  ;;  %v2947_v46 = vperm.slane %v6177_v55, 3 }
 0x787   : > { %3196 = vmatpush.msra.mxu2 %v3119_v30  ;;  %3216 = vmatpush.msrb.mxu3 %v3135_v1 }
 0x789   : > { %3197 = vmatpush.msra.mxu2 %v3118_v49  ;;  %3217 = vmatpush.msrb.mxu3 %v3134_v14 }
 0x78b   : > { %3198 = vmatpush.msra.mxu2 %v3117_v40  ;;  %3218 = vmatpush.msrb.mxu3 %v3133_v51 }
 0x78d   : > { %3199 = vmatpush.msra.mxu2 %v3116_v10  ;;  %3219 = vmatpush.msrb.mxu3 %v3132_v52  ;;  %v3606_v10 = vld [vmem:[%s6269_s10] ss:$0 sm:$0xff] }
 0x78f   : > { %3224 = vmatpush.msrb.mxu2 %v3163_v9  ;;  %3244 = vmatpush.msra.mxu3 %v3179_v4 }
 0x791   : > { %3225 = vmatpush.msrb.mxu2 %v3162_v7  ;;  %3245 = vmatpush.msra.mxu3 %v3178_v63 }
 0x793   : > { %3226 = vmatpush.msrb.mxu2 %v3161_v19  ;;  %3246 = vmatpush.msra.mxu3 %v3177_v13 }
 0x795   : > { %3227 = vmatpush.msrb.mxu2 %v3160_v38  ;;  %3247 = vmatpush.msra.mxu3 %v3176_v59 }
 0x797   : > { %3228 = vmatpush.msrb.mxu2 %v3159_v17  ;;  %3248 = vmatpush.msra.mxu3 %v3175_v50 }
 0x799   : > { %3229 = vmatpush.msrb.mxu2 %v3158_v47  ;;  %3249 = vmatpush.msra.mxu3 %v3174_v25 }
 0x79b   : > { %3230 = vmatpush.msrb.mxu2 %v3157_v8  ;;  %3250 = vmatpush.msra.mxu3 %v3173_v23 }
 0x79d   : > { %3231 = vmatpush.msrb.mxu2 %v3156_v6  ;;  %3251 = vmatpush.msra.mxu3 %v3172_v43 }
 0x79f   : > { %3232 = vmatpush.msrb.mxu2 %v3155_v57  ;;  %3252 = vmatpush.msra.mxu3 %v3171_v44 }
 0x7a1   : > { %3233 = vmatpush.msrb.mxu2 %v3154_v11  ;;  %3253 = vmatpush.msra.mxu3 %v3170_v22 }
 0x7a3   : > { %3234 = vmatpush.msrb.mxu2 %v3153_v48  ;;  %3254 = vmatpush.msra.mxu3 %v3169_v18 }
 0x7a5   : > { %3235 = vmatpush.msrb.mxu2 %v3152_v26  ;;  %3255 = vmatpush.msra.mxu3 %v3168_v27 }
 0x7a7   : > { %3236 = vmatpush.msrb.mxu2 %v3151_v53  ;;  %3256 = vmatpush.msra.mxu3 %v3167_v34 }
 0x7a9   : > { %3237 = vmatpush.msrb.mxu2 %v3150_v39  ;;  %3257 = vmatpush.msra.mxu3 %v3166_v15 }
 0x7ab   : > { %3238 = vmatpush.msrb.mxu2 %v3149_v20  ;;  %3258 = vmatpush.msra.mxu3 %v3165_v21 }
 0x7ad   : > { %3239 = vmatpush.msrb.mxu2 %v3148_v58  ;;  %3259 = vmatpush.msra.mxu3 %v3164_v42 }
 0x7b1   : > { %v2969_v45 = vpop.f32.mrf.mxu2  ;;  %v2989_v36 = vpop.f32.mrf.mxu3 }
 0x7b2   : > { %v2970_v31 = vadd.f32 %v2969_v45, %v2944_v35 }
 0x7b4   : > { %v2990_v41 = vadd.f32 %v2989_v36, %v2970_v31 }
 0x7b6   : > { %v3112_v60 = vmax.f32 %v2990_v41, 0.0 }
 0x7b8   : > { %3200 = vmatmul.f32.vlgmr.msra.gmra.mxu2 %v3112_v60 }
 0x7b9   : > { %v3009_v3 = vpop.f32.mrf.mxu2  ;;  %v3029_v54 = vpop.f32.mrf.mxu3 }
 0x7ba   : > { %v3010_v16 = vadd.f32 %v3009_v3, %v2945_v33 }
 0x7bc   : > { %v3030_v37 = vadd.f32 %v3029_v54, %v3010_v16 }
 0x7be   : > { %v3113_v28 = vmax.f32 %v3030_v37, 0.0 }
 0x7c0   : > { %3220 = vmatmul.f32.vlgmr.msrb.gmra.mxu3 %v3113_v28 }
 0x7d1   : > { %v3049_v61 = vpop.f32.mrf.mxu2  ;;  %v3069_v56 = vpop.f32.mrf.mxu3 }
 0x7d2   : > { %v3050_v5 = vadd.f32 %v3049_v61, %v2946_v2 }
 0x7d4   : > { %v3070_v12 = vadd.f32 %v3069_v56, %v3050_v5 }
 0x7d6   : > { %v3114_v0 = vmax.f32 %v3070_v12, 0.0 }
 0x7d8   : > { %3240 = vmatmul.f32.vlgmr.msrb.gmra.mxu2 %v3114_v0 }
 0x7f1   : > { %v3089_v30 = vpop.f32.mrf.mxu2  ;;  %v3109_v49 = vpop.f32.mrf.mxu3 }
 0x7f2   : > { %v3090_v24 = vadd.f32 %v3089_v30, %v2947_v46 }
 0x7f4   : > { %v3110_v32 = vadd.f32 %v3109_v49, %v3090_v24 }
 0x7f6   : > { %v3115_v40 = vmax.f32 %v3110_v32, 0.0 }
 0x7f8   : > { %3260 = vmatmul.f32.vlgmr.msra.gmra.mxu3 %v3115_v40 }
 0x83b   : > { %v3201_v29 = vpop.f32.mrf.mxu2 }
 0x83c   : > { %v3202_v9 = vadd.f32 %v3606_v10, %v3201_v29 }
 0x843   : > { %v3221_v62 = vpop.f32.mrf.mxu3 }
 0x844   : > { %v3222_v7 = vadd.f32 %v3221_v62, %v3202_v9 }
 0x85b   : > { %v3241_v1 = vpop.f32.mrf.mxu2 }
 0x85c   : > { %v3242_v14 = vadd.f32 %v3241_v1, %v3222_v7 }
 0x87b   : > { %v3261_v19 = vpop.f32.mrf.mxu3 }
 0x87c   : > { %v3262_v51 = vadd.f32 %v3261_v19, %v3242_v14 }
 0x87e   : > { %3264 = vst [vmem:[%s384_s14] sm:$0xff] %v3262_v51 }
 0x87f PF: > { %s21_s17 = sadd.s32 1, %s3615_s17  }
 0x880   : > { %p18_p4 = scmp.ge.s32.totalorder %s21_s17, 4  }
 0x882   :  { %20 = sbr.rel (!%p18_p4) target bundleno = 1 (0x1), region = 103 }

</bundles_post_ra>
